<compile_context>
chip_gen: v5e
topology: v5e:2x2
jax: 0.10.0
libtpu: 0.0.40
codegen_flags: <defaults>
</compile_context>

<pallas_src>
import math
from functools import partial

import jax
import jax.numpy as jnp
from jax import lax
from jax.experimental import pallas as pl
from jax.experimental.pallas import tpu as pltpu

_LANE = 128
_SUBLANE = 8


def _round_up(x, m):
    return (x + m - 1) // m * m


# -----------------------------------------------------------------------------
# Padded, row-flattened activation layout
# -----------------------------------------------------------------------------
def _flat_geometry(h, w):
    """Geometry of the padded row-flattened layout.

    A (C, H, W) image is zero-padded by 1 pixel on every side; each padded row
    (width W2 = W+2) is laid out contiguously along the lane axis; the whole
    thing is zero-padded up to L_in_p (a multiple of 128).  A conv tap (dy, dx)
    becomes a static 1-D slice at offset dy*W2+dx of length L_out_p.  Output
    position y*W2 + x holds output pixel (y, x); columns W..W+1 of each row are
    junk and are sliced away in the wrapper.
    """
    w2, h2 = w + 2, h + 2
    l_out = h * w2
    l_out_p = _round_up(max(l_out, _LANE), _LANE)
    l_in_p = _round_up(2 * w2 + 2 + l_out_p, _LANE)   # >= h2*w2 always
    return h2, w2, l_out, l_out_p, l_in_p


def _pad_flatten(x_cnhw, l_in_p):
    """(C, N, H, W) -> (C, N * L_in_p) padded row-flattened layout."""
    c, n, h, w = x_cnhw.shape
    xp = jnp.pad(x_cnhw, ((0, 0), (0, 0), (1, 1), (1, 1)))
    xf = xp.reshape(c, n, (h + 2) * (w + 2))
    xf = jnp.pad(xf, ((0, 0), (0, 0), (0, l_in_p - (h + 2) * (w + 2))))
    return xf.reshape(c, n * l_in_p)


def _unflatten(out2d, co, n, h, w, l_out_p):
    """(Co, N * L_out_p) -> (Co, N, H, W), dropping per-row junk columns."""
    w2 = w + 2
    o = out2d.reshape(co, n, l_out_p)[:, :, : h * w2].reshape(co, n, h, w2)
    return o[..., :w]


def _compiler_params(block_bytes):
    limit = int(min(max(32 * 1024 * 1024, 6 * block_bytes), 60 * 1024 * 1024))
    return pltpu.CompilerParams(dimension_semantics=("parallel",),
                                vmem_limit_bytes=limit)


def _cost(flops, bytes_accessed):
    return pl.CostEstimate(flops=flops, transcendentals=0,
                           bytes_accessed=bytes_accessed)


_TAPS3 = [(dy, dx) for dy in range(3) for dx in range(3)]


# -----------------------------------------------------------------------------
# Kernels
# -----------------------------------------------------------------------------
def _conv3x3_kernel(x_ref, w_ref, b_ref, o_ref, *, w2, l_out_p, relu_in, relu_out):
    """o = act(conv3x3(act_in(x)) + b), shift-and-matmul over 9 static taps."""
    x = x_ref[...]                                     # (C, L_in_p)
    if relu_in:
        x = jnp.maximum(x, 0.0)                        # ReLU once per block, not per tap
    acc = None
    for t, (dy, dx) in enumerate(_TAPS3):
        off = dy * w2 + dx
        d = jnp.dot(w_ref[t], x[:, off:off + l_out_p],
                    preferred_element_type=jnp.float32)
        acc = d if acc is None else acc + d
    y = acc + b_ref[...]
    if relu_out:
        y = jnp.maximum(y, 0.0)
    o_ref[...] = y.astype(o_ref.dtype)


def _resblock_kernel(x_ref, w3_ref, b3_ref, w1_ref, b1_ref, o_ref, *,
                     w2, l_out_p, final_relu):
    """One full residual layer: h + conv1x1(relu(conv3x3(relu(h)))) [+ ReLU].

    The intermediate stays in VMEM/vregs (no HBM round-trip) and the residual
    is the center slice of the already-loaded padded input.
    """
    x = x_ref[...]                                     # (Ch, L_in_p), un-ReLU'd padded h
    xr = jnp.maximum(x, 0.0)
    acc = None
    for t, (dy, dx) in enumerate(_TAPS3):
        off = dy * w2 + dx
        d = jnp.dot(w3_ref[t], xr[:, off:off + l_out_p],
                    preferred_element_type=jnp.float32)
        acc = d if acc is None else acc + d
    t_mid = jnp.maximum(acc + b3_ref[...], 0.0)        # (Crh, L_out_p)
    y = jnp.dot(w1_ref[...], t_mid, preferred_element_type=jnp.float32) + b1_ref[...]
    y = y + x[:, w2 + 1: w2 + 1 + l_out_p]             # residual add (un-ReLU'd h)
    if final_relu:
        y = jnp.maximum(y, 0.0)
    o_ref[...] = y.astype(o_ref.dtype)


def _convt4x4_kernel(x_ref, w_ref, b_ref, o_ref, *, w2, l_out_p, relu_out):
    """ConvTranspose2d(k=4,s=2,p=1) via 4 sub-pixel phases x 4 taps each."""
    x = x_ref[...]                                     # (C, L_in_p)
    for p in range(4):
        ry, rx = p // 2, p % 2
        acc = None
        for a in range(2):
            for b in range(2):
                off = (ry + a) * w2 + (rx + b)
                d = jnp.dot(w_ref[p * 4 + a * 2 + b], x[:, off:off + l_out_p],
                            preferred_element_type=jnp.float32)
                acc = d if acc is None else acc + d
        y = acc + b_ref[...]
        if relu_out:
            y = jnp.maximum(y, 0.0)
        o_ref[p, :, :] = y.astype(o_ref.dtype)


# -----------------------------------------------------------------------------
# Layer wrappers (XLA glue = pad/flatten/slice/phase-interleave only, 1x bytes)
# -----------------------------------------------------------------------------
def _conv2d_3x3(x_cnhw, w_oihw, bias, *, relu_in=False, relu_out=False):
    c, n, h, w = x_cnhw.shape
    co, ci, kh, kw = w_oihw.shape
    assert (ci, kh, kw) == (c, 3, 3)
    _, w2, l_out, l_out_p, l_in_p = _flat_geometry(h, w)

    xf = _pad_flatten(x_cnhw, l_in_p)                            # (C, N*L_in_p)
    wt = jnp.transpose(w_oihw, (2, 3, 0, 1)).reshape(9, co, c)   # tap-major
    b2 = bias.reshape(co, 1).astype(xf.dtype)

    blk_bytes = 4 * (c * l_in_p + co * l_out_p + 9 * co * c + co)
    out2d = pl.pallas_call(
        partial(_conv3x3_kernel, w2=w2, l_out_p=l_out_p,
                relu_in=relu_in, relu_out=relu_out),
        out_shape=jax.ShapeDtypeStruct((co, n * l_out_p), xf.dtype),
        grid=(n,),
        in_specs=[
            pl.BlockSpec((c, l_in_p), lambda i: (0, i)),
            pl.BlockSpec((9, co, c), lambda i: (0, 0, 0)),
            pl.BlockSpec((co, 1), lambda i: (0, 0)),
        ],
        out_specs=pl.BlockSpec((co, l_out_p), lambda i: (0, i)),
        compiler_params=_compiler_params(blk_bytes),
        cost_estimate=_cost(2 * 9 * co * c * n * l_out, n * blk_bytes),
    )(xf, wt, b2)
    return _unflatten(out2d, co, n, h, w, l_out_p)


def _residual_block(h_cnhw, w3, b3, w1, b1, *, final_relu):
    ch, n, h, w = h_cnhw.shape
    crh = w3.shape[0]
    _, w2, l_out, l_out_p, l_in_p = _flat_geometry(h, w)

    xf = _pad_flatten(h_cnhw, l_in_p)
    w3t = jnp.transpose(w3, (2, 3, 0, 1)).reshape(9, crh, ch)
    b3t = b3.reshape(crh, 1).astype(xf.dtype)
    w1t = w1.reshape(ch, crh)
    b1t = b1.reshape(ch, 1).astype(xf.dtype)

    blk_bytes = 4 * (ch * l_in_p + ch * l_out_p + crh * l_out_p
                     + 9 * crh * ch + ch * crh + crh + ch)
    out2d = pl.pallas_call(
        partial(_resblock_kernel, w2=w2, l_out_p=l_out_p, final_relu=final_relu),
        out_shape=jax.ShapeDtypeStruct((ch, n * l_out_p), xf.dtype),
        grid=(n,),
        in_specs=[
            pl.BlockSpec((ch, l_in_p), lambda i: (0, i)),
            pl.BlockSpec((9, crh, ch), lambda i: (0, 0, 0)),
            pl.BlockSpec((crh, 1), lambda i: (0, 0)),
            pl.BlockSpec((ch, crh), lambda i: (0, 0)),
            pl.BlockSpec((ch, 1), lambda i: (0, 0)),
        ],
        out_specs=pl.BlockSpec((ch, l_out_p), lambda i: (0, i)),
        compiler_params=_compiler_params(blk_bytes),
        cost_estimate=_cost(2 * n * l_out * (9 * crh * ch + ch * crh), n * blk_bytes),
    )(xf, w3t, b3t, w1t, b1t)
    return _unflatten(out2d, ch, n, h, w, l_out_p)


def _conv_transpose_4x4(x_cnhw, w_iohw, bias, *, relu_out):
    c, n, h, w = x_cnhw.shape
    ci, co, kh, kw = w_iohw.shape
    assert (ci, kh, kw) == (c, 4, 4)
    co_p = _round_up(co, _SUBLANE)                      # pad Co=3 -> 8 (unmasked stores)
    _, w2, l_out, l_out_p, l_in_p = _flat_geometry(h, w)

    xf = _pad_flatten(x_cnhw, l_in_p)
    wt = jnp.transpose(w_iohw, (1, 0, 2, 3))            # (Co, Ci, 4, 4)
    if co_p != co:
        wt = jnp.pad(wt, ((0, co_p - co), (0, 0), (0, 0), (0, 0)))
        bias = jnp.pad(bias, (0, co_p - co))
    # Phase (ry, rx), tap (a, b): input offset (ry+a, rx+b), weight (3-2a-ry, 3-2b-rx).
    w_list = []
    for ry in (0, 1):
        for rx in (0, 1):
            for a in (0, 1):
                for b in (0, 1):
                    w_list.append(wt[:, :, 3 - 2 * a - ry, 3 - 2 * b - rx])
    w_eff = jnp.stack(w_list, axis=0)                   # (16, Co_p, C)
    b2 = bias.reshape(co_p, 1).astype(xf.dtype)

    blk_bytes = 4 * (c * l_in_p + 4 * co_p * l_out_p + 16 * co_p * c + co_p)
    out = pl.pallas_call(
        partial(_convt4x4_kernel, w2=w2, l_out_p=l_out_p, relu_out=relu_out),
        out_shape=jax.ShapeDtypeStruct((4, co_p, n * l_out_p), xf.dtype),
        grid=(n,),
        in_specs=[
            pl.BlockSpec((c, l_in_p), lambda i: (0, i)),
            pl.BlockSpec((16, co_p, c), lambda i: (0, 0, 0)),
            pl.BlockSpec((co_p, 1), lambda i: (0, 0)),
        ],
        out_specs=pl.BlockSpec((4, co_p, l_out_p), lambda i: (0, 0, i)),
        compiler_params=_compiler_params(blk_bytes),
        cost_estimate=_cost(2 * 16 * co_p * c * n * l_out, n * blk_bytes),
    )(xf, w_eff, b2)

    # Interleave the 4 phases: (ry, rx, Co, N, H, W) -> (Co, N, 2H, 2W). XLA glue.
    o = out.reshape(2, 2, co_p, n, l_out_p)[..., :l_out]
    o = o.reshape(2, 2, co_p, n, h, w2)[..., :w]
    o = jnp.transpose(o, (2, 3, 4, 0, 5, 1)).reshape(co_p, n, 2 * h, 2 * w)
    return o[:co]


# -----------------------------------------------------------------------------
# Decoder forward (Pallas path)
# -----------------------------------------------------------------------------
def decoder_forward(x_nchw, params):
    h = jnp.transpose(x_nchw, (1, 0, 2, 3))             # -> (C, N, H, W)

    # self.conv : Conv2d(embedding_dim -> num_hiddens, 3x3, padding=1)
    h = _conv2d_3x3(h, params["conv_w"], params["conv_b"])

    # self.residual_stack : h = h + conv1x1(relu(conv3x3(relu(h)))); trailing ReLU.
    res = params["res"]
    if len(res) == 0:
        h = jnp.maximum(h, 0.0)                         # degenerate: stack is just ReLU
    for idx, (w3, b3, w1, b1) in enumerate(res):
        h = _residual_block(h, w3, b3, w1, b1, final_relu=(idx == len(res) - 1))

    # self.upconv : ConvTranspose2d(k=4, s=2, p=1) xN, ReLU between all but the last.
    up = params["up"]
    for j, (w, b) in enumerate(up):
        h = _conv_transpose_4x4(h, w, b, relu_out=(j < len(up) - 1))

    return jnp.transpose(h, (1, 0, 2, 3))               # -> (N, 3, H_out, W_out)


# -----------------------------------------------------------------------------
# Pure-JAX (XLA) reference of the same Decoder, for correctness checking
# -----------------------------------------------------------------------------
_HIGH = lax.Precision.HIGHEST


def _ref_conv2d(x_nchw, w_oihw, b, pad):
    out = lax.conv_general_dilated(
        x_nchw, w_oihw, window_strides=(1, 1),
        padding=((pad, pad), (pad, pad)),
        dimension_numbers=("NCHW", "OIHW", "NCHW"), precision=_HIGH)
    return out + b[None, :, None, None]


def _ref_conv_transpose2d(x_nchw, w_iohw, b, stride=2, pad=1):
    k = w_iohw.shape[2]
    w_eff = jnp.transpose(w_iohw[:, :, ::-1, ::-1], (1, 0, 2, 3))   # (Co, Ci, k, k)
    out = lax.conv_general_dilated(
        x_nchw, w_eff, window_strides=(1, 1),
        padding=((k - 1 - pad, k - 1 - pad), (k - 1 - pad, k - 1 - pad)),
        lhs_dilation=(stride, stride),
        dimension_numbers=("NCHW", "OIHW", "NCHW"), precision=_HIGH)
    return out + b[None, :, None, None]


def decoder_reference(x, params):
    h = _ref_conv2d(x, params["conv_w"], params["conv_b"], 1)
    for (w3, b3, w1, b1) in params["res"]:
        t = jnp.maximum(h, 0.0)
        t = _ref_conv2d(t, w3, b3, 1)
        t = jnp.maximum(t, 0.0)
        t = _ref_conv2d(t, w1, b1, 0)
        h = h + t
    h = jnp.maximum(h, 0.0)
    nu = len(params["up"])
    for j, (w, b) in enumerate(params["up"]):
        h = _ref_conv_transpose2d(h, w, b)
        if j < nu - 1:
            h = jnp.maximum(h, 0.0)
    return h


# -----------------------------------------------------------------------------
# Deterministic synthetic parameters (PyTorch weight layouts)
# -----------------------------------------------------------------------------
def init_decoder_params(key, embedding_dim, num_hiddens, num_upsampling_layers,
                        num_residual_layers, num_residual_hiddens):
    n_keys = 2 * (1 + 2 * num_residual_layers + num_upsampling_layers)
    kit = iter(jax.random.split(key, n_keys))

    def _w(shape, fan_in):
        return jax.random.normal(next(kit), shape, jnp.float32) / math.sqrt(fan_in)

    def _b(n):
        return 0.1 * jax.random.normal(next(kit), (n,), jnp.float32)

    params = {
        "conv_w": _w((num_hiddens, embedding_dim, 3, 3), 9 * embedding_dim),  # OIHW
        "conv_b": _b(num_hiddens),
        "res": [],
        "up": [],
    }
    for _ in range(num_residual_layers):
        w3 = _w((num_residual_hiddens, num_hiddens, 3, 3), 9 * num_hiddens)
        b3 = _b(num_residual_hiddens)
        w1 = _w((num_hiddens, num_residual_hiddens, 1, 1), num_residual_hiddens)
        b1 = _b(num_hiddens)
        params["res"].append((w3, b3, w1, b1))
    for i in range(num_upsampling_layers):
        if i < num_upsampling_layers - 2:
            cin, cout = num_hiddens, num_hiddens
        elif i == num_upsampling_layers - 2:
            cin, cout = num_hiddens, num_hiddens // 2
        else:
            cin, cout = num_hiddens // 2, 3
        # PyTorch ConvTranspose2d weight layout: (in_channels, out_channels, kH, kW)
        params["up"].append((_w((cin, cout, 4, 4), 16 * cin), _b(cout)))
    return params


if __name__ == "__main__":
    embedding_dim = 8
    num_hiddens = 32
    num_upsampling_layers = 2
    num_residual_layers = 2
    num_residual_hiddens = 16
    N, H, W = 2, 8, 8

    key = jax.random.PRNGKey(0)
    k_params, k_x = jax.random.split(key)
    params = init_decoder_params(k_params, embedding_dim, num_hiddens,
                                 num_upsampling_layers, num_residual_layers,
                                 num_residual_hiddens)
    x = jax.random.normal(k_x, (N, embedding_dim, H, W), jnp.float32)

    out = jax.block_until_ready(jax.jit(decoder_forward)(x, params))
    ref = jax.block_until_ready(jax.jit(decoder_reference)(x, params))

    scale = 2 ** num_upsampling_layers
    assert out.shape == (N, 3, H * scale, W * scale), out.shape
    max_err = float(jnp.max(jnp.abs(out - ref)))
    assert jnp.allclose(out, ref, atol=2e-3, rtol=2e-3), f"mismatch vs reference: {max_err}"
    print("KERNEL_OK")
</pallas_src>

<mosaic_0001>
module attributes {stable_mosaic.version = 11 : i64} {
  func.func @_conv3x3_kernel(%arg0: i32, %arg1: memref<8x256xf32, #tpu.memory_space<vmem>>, %arg2: memref<9x32x8xf32, #tpu.memory_space<vmem>>, %arg3: memref<32x1xf32, #tpu.memory_space<vmem>>, %arg4: memref<32x128xf32, #tpu.memory_space<vmem>>) attributes {dimension_semantics = [#tpu.dimension_semantics<parallel>], iteration_bounds = array<i64: 2>, scalar_prefetch = 0 : i64, scratch_operands = 0 : i64, tpu.core_type = #tpu.core_type<tc>, window_params = [{transform_indices = @transform_0, window_bounds = array<i64: 8, 256>}, {pipeline_mode = #tpu.pipeline_mode<synchronous>, transform_indices = @transform_1, window_bounds = array<i64: 9, 32, 8>}, {pipeline_mode = #tpu.pipeline_mode<synchronous>, transform_indices = @transform_2, window_bounds = array<i64: 32, 1>}, {transform_indices = @transform_3, window_bounds = array<i64: 32, 128>}]} {
    %c0 = arith.constant 0 : index
    %c0_0 = arith.constant 0 : index
    %0 = vector.load %arg1[%c0, %c0_0] : memref<8x256xf32, #tpu.memory_space<vmem>>, vector<8x256xf32>
    %c0_1 = arith.constant 0 : index
    %c0_2 = arith.constant 0 : index
    %c0_3 = arith.constant 0 : index
    %1 = vector.load %arg2[%c0_1, %c0_2, %c0_3] : memref<9x32x8xf32, #tpu.memory_space<vmem>>, vector<1x32x8xf32>
    %2 = vector.shape_cast %1 : vector<1x32x8xf32> to vector<32x8xf32>
    %3 = vector.extract_strided_slice %0 {offsets = [0, 0], sizes = [8, 128], strides = [1, 1]} : vector<8x256xf32> to vector<8x128xf32>
    %cst = arith.constant dense<0.000000e+00> : vector<32x128xf32>
    %4 = tpu.matmul %2, %3, %cst {dimension_numbers = #tpu.dot_dimension_numbers<[1], [0], [0], [1], [0, 0, 1, 1], [], []>} : vector<32x8xf32>, vector<8x128xf32>, vector<32x128xf32> -> vector<32x128xf32>
    %c1 = arith.constant 1 : index
    %c0_4 = arith.constant 0 : index
    %c0_5 = arith.constant 0 : index
    %5 = vector.load %arg2[%c1, %c0_4, %c0_5] : memref<9x32x8xf32, #tpu.memory_space<vmem>>, vector<1x32x8xf32>
    %6 = vector.shape_cast %5 : vector<1x32x8xf32> to vector<32x8xf32>
    %7 = vector.extract_strided_slice %0 {offsets = [0, 1], sizes = [8, 128], strides = [1, 1]} : vector<8x256xf32> to vector<8x128xf32>
    %cst_6 = arith.constant dense<0.000000e+00> : vector<32x128xf32>
    %8 = tpu.matmul %6, %7, %cst_6 {dimension_numbers = #tpu.dot_dimension_numbers<[1], [0], [0], [1], [0, 0, 1, 1], [], []>} : vector<32x8xf32>, vector<8x128xf32>, vector<32x128xf32> -> vector<32x128xf32>
    %9 = arith.addf %4, %8 : vector<32x128xf32>
    %c2 = arith.constant 2 : index
    %c0_7 = arith.constant 0 : index
    %c0_8 = arith.constant 0 : index
    %10 = vector.load %arg2[%c2, %c0_7, %c0_8] : memref<9x32x8xf32, #tpu.memory_space<vmem>>, vector<1x32x8xf32>
    %11 = vector.shape_cast %10 : vector<1x32x8xf32> to vector<32x8xf32>
    %12 = vector.extract_strided_slice %0 {offsets = [0, 2], sizes = [8, 128], strides = [1, 1]} : vector<8x256xf32> to vector<8x128xf32>
    %cst_9 = arith.constant dense<0.000000e+00> : vector<32x128xf32>
    %13 = tpu.matmul %11, %12, %cst_9 {dimension_numbers = #tpu.dot_dimension_numbers<[1], [0], [0], [1], [0, 0, 1, 1], [], []>} : vector<32x8xf32>, vector<8x128xf32>, vector<32x128xf32> -> vector<32x128xf32>
    %14 = arith.addf %9, %13 : vector<32x128xf32>
    %c3 = arith.constant 3 : index
    %c0_10 = arith.constant 0 : index
    %c0_11 = arith.constant 0 : index
    %15 = vector.load %arg2[%c3, %c0_10, %c0_11] : memref<9x32x8xf32, #tpu.memory_space<vmem>>, vector<1x32x8xf32>
    %16 = vector.shape_cast %15 : vector<1x32x8xf32> to vector<32x8xf32>
    %17 = vector.extract_strided_slice %0 {offsets = [0, 10], sizes = [8, 128], strides = [1, 1]} : vector<8x256xf32> to vector<8x128xf32>
    %cst_12 = arith.constant dense<0.000000e+00> : vector<32x128xf32>
    %18 = tpu.matmul %16, %17, %cst_12 {dimension_numbers = #tpu.dot_dimension_numbers<[1], [0], [0], [1], [0, 0, 1, 1], [], []>} : vector<32x8xf32>, vector<8x128xf32>, vector<32x128xf32> -> vector<32x128xf32>
    %19 = arith.addf %14, %18 : vector<32x128xf32>
    %c4 = arith.constant 4 : index
    %c0_13 = arith.constant 0 : index
    %c0_14 = arith.constant 0 : index
    %20 = vector.load %arg2[%c4, %c0_13, %c0_14] : memref<9x32x8xf32, #tpu.memory_space<vmem>>, vector<1x32x8xf32>
    %21 = vector.shape_cast %20 : vector<1x32x8xf32> to vector<32x8xf32>
    %22 = vector.extract_strided_slice %0 {offsets = [0, 11], sizes = [8, 128], strides = [1, 1]} : vector<8x256xf32> to vector<8x128xf32>
    %cst_15 = arith.constant dense<0.000000e+00> : vector<32x128xf32>
    %23 = tpu.matmul %21, %22, %cst_15 {dimension_numbers = #tpu.dot_dimension_numbers<[1], [0], [0], [1], [0, 0, 1, 1], [], []>} : vector<32x8xf32>, vector<8x128xf32>, vector<32x128xf32> -> vector<32x128xf32>
    %24 = arith.addf %19, %23 : vector<32x128xf32>
    %c5 = arith.constant 5 : index
    %c0_16 = arith.constant 0 : index
    %c0_17 = arith.constant 0 : index
    %25 = vector.load %arg2[%c5, %c0_16, %c0_17] : memref<9x32x8xf32, #tpu.memory_space<vmem>>, vector<1x32x8xf32>
    %26 = vector.shape_cast %25 : vector<1x32x8xf32> to vector<32x8xf32>
    %27 = vector.extract_strided_slice %0 {offsets = [0, 12], sizes = [8, 128], strides = [1, 1]} : vector<8x256xf32> to vector<8x128xf32>
    %cst_18 = arith.constant dense<0.000000e+00> : vector<32x128xf32>
    %28 = tpu.matmul %26, %27, %cst_18 {dimension_numbers = #tpu.dot_dimension_numbers<[1], [0], [0], [1], [0, 0, 1, 1], [], []>} : vector<32x8xf32>, vector<8x128xf32>, vector<32x128xf32> -> vector<32x128xf32>
    %29 = arith.addf %24, %28 : vector<32x128xf32>
    %c6 = arith.constant 6 : index
    %c0_19 = arith.constant 0 : index
    %c0_20 = arith.constant 0 : index
    %30 = vector.load %arg2[%c6, %c0_19, %c0_20] : memref<9x32x8xf32, #tpu.memory_space<vmem>>, vector<1x32x8xf32>
    %31 = vector.shape_cast %30 : vector<1x32x8xf32> to vector<32x8xf32>
    %32 = vector.extract_strided_slice %0 {offsets = [0, 20], sizes = [8, 128], strides = [1, 1]} : vector<8x256xf32> to vector<8x128xf32>
    %cst_21 = arith.constant dense<0.000000e+00> : vector<32x128xf32>
    %33 = tpu.matmul %31, %32, %cst_21 {dimension_numbers = #tpu.dot_dimension_numbers<[1], [0], [0], [1], [0, 0, 1, 1], [], []>} : vector<32x8xf32>, vector<8x128xf32>, vector<32x128xf32> -> vector<32x128xf32>
    %34 = arith.addf %29, %33 : vector<32x128xf32>
    %c7 = arith.constant 7 : index
    %c0_22 = arith.constant 0 : index
    %c0_23 = arith.constant 0 : index
    %35 = vector.load %arg2[%c7, %c0_22, %c0_23] : memref<9x32x8xf32, #tpu.memory_space<vmem>>, vector<1x32x8xf32>
    %36 = vector.shape_cast %35 : vector<1x32x8xf32> to vector<32x8xf32>
    %37 = vector.extract_strided_slice %0 {offsets = [0, 21], sizes = [8, 128], strides = [1, 1]} : vector<8x256xf32> to vector<8x128xf32>
    %cst_24 = arith.constant dense<0.000000e+00> : vector<32x128xf32>
    %38 = tpu.matmul %36, %37, %cst_24 {dimension_numbers = #tpu.dot_dimension_numbers<[1], [0], [0], [1], [0, 0, 1, 1], [], []>} : vector<32x8xf32>, vector<8x128xf32>, vector<32x128xf32> -> vector<32x128xf32>
    %39 = arith.addf %34, %38 : vector<32x128xf32>
    %c8 = arith.constant 8 : index
    %c0_25 = arith.constant 0 : index
    %c0_26 = arith.constant 0 : index
    %40 = vector.load %arg2[%c8, %c0_25, %c0_26] : memref<9x32x8xf32, #tpu.memory_space<vmem>>, vector<1x32x8xf32>
    %41 = vector.shape_cast %40 : vector<1x32x8xf32> to vector<32x8xf32>
    %42 = vector.extract_strided_slice %0 {offsets = [0, 22], sizes = [8, 128], strides = [1, 1]} : vector<8x256xf32> to vector<8x128xf32>
    %cst_27 = arith.constant dense<0.000000e+00> : vector<32x128xf32>
    %43 = tpu.matmul %41, %42, %cst_27 {dimension_numbers = #tpu.dot_dimension_numbers<[1], [0], [0], [1], [0, 0, 1, 1], [], []>} : vector<32x8xf32>, vector<8x128xf32>, vector<32x128xf32> -> vector<32x128xf32>
    %44 = arith.addf %39, %43 : vector<32x128xf32>
    %c0_28 = arith.constant 0 : index
    %c0_29 = arith.constant 0 : index
    %45 = vector.load %arg3[%c0_28, %c0_29] : memref<32x1xf32, #tpu.memory_space<vmem>>, vector<32x1xf32>
    %46 = vector.broadcast %45 : vector<32x1xf32> to vector<32x128xf32>
    %47 = arith.addf %44, %46 : vector<32x128xf32>
    %c0_30 = arith.constant 0 : index
    %c0_31 = arith.constant 0 : index
    %48 = vector.load %arg4[%c0_30, %c0_31] : memref<32x128xf32, #tpu.memory_space<vmem>>, vector<32x128xf32>
    tpu.vector_store %arg4[%c0_30, %c0_31], %47 {strides = array<i32>} : memref<32x128xf32, #tpu.memory_space<vmem>>, vector<32x128xf32>,
    return
  }
  func.func @transform_0(%arg0: i32) -> (i32, i32) {
    %c0_i32 = arith.constant 0 : i32
    %c0_i32_0 = arith.constant 0 : i32
    return %c0_i32, %arg0 : i32, i32
  }
  func.func @transform_1(%arg0: i32) -> (i32, i32, i32) {
    %c0_i32 = arith.constant 0 : i32
    %c0_i32_0 = arith.constant 0 : i32
    %c0_i32_1 = arith.constant 0 : i32
    %c0_i32_2 = arith.constant 0 : i32
    return %c0_i32, %c0_i32_0, %c0_i32_1 : i32, i32, i32
  }
  func.func @transform_2(%arg0: i32) -> (i32, i32) {
    %c0_i32 = arith.constant 0 : i32
    %c0_i32_0 = arith.constant 0 : i32
    %c0_i32_1 = arith.constant 0 : i32
    return %c0_i32, %c0_i32_0 : i32, i32
  }
  func.func @transform_3(%arg0: i32) -> (i32, i32) {
    %c0_i32 = arith.constant 0 : i32
    %c0_i32_0 = arith.constant 0 : i32
    return %c0_i32, %arg0 : i32, i32
  }
}

module attributes {stable_mosaic.version = 11 : i64} {
  func.func @_resblock_kernel(%arg0: i32, %arg1: memref<32x256xf32, #tpu.memory_space<vmem>>, %arg2: memref<9x16x32xf32, #tpu.memory_space<vmem>>, %arg3: memref<16x1xf32, #tpu.memory_space<vmem>>, %arg4: memref<32x16xf32, #tpu.memory_space<vmem>>, %arg5: memref<32x1xf32, #tpu.memory_space<vmem>>, %arg6: memref<32x128xf32, #tpu.memory_space<vmem>>) attributes {dimension_semantics = [#tpu.dimension_semantics<parallel>], iteration_bounds = array<i64: 2>, scalar_prefetch = 0 : i64, scratch_operands = 0 : i64, tpu.core_type = #tpu.core_type<tc>, window_params = [{transform_indices = @transform_0, window_bounds = array<i64: 32, 256>}, {pipeline_mode = #tpu.pipeline_mode<synchronous>, transform_indices = @transform_1, window_bounds = array<i64: 9, 16, 32>}, {pipeline_mode = #tpu.pipeline_mode<synchronous>, transform_indices = @transform_2, window_bounds = array<i64: 16, 1>}, {pipeline_mode = #tpu.pipeline_mode<synchronous>, transform_indices = @transform_3, window_bounds = array<i64: 32, 16>}, {pipeline_mode = #tpu.pipeline_mode<synchronous>, transform_indices = @transform_4, window_bounds = array<i64: 32, 1>}, {transform_indices = @transform_5, window_bounds = array<i64: 32, 128>}]} {
    %c0 = arith.constant 0 : index
    %c0_0 = arith.constant 0 : index
    %0 = vector.load %arg1[%c0, %c0_0] : memref<32x256xf32, #tpu.memory_space<vmem>>, vector<32x256xf32>
    %cst = arith.constant 0.000000e+00 : f32
    %1 = vector.broadcast %cst : f32 to vector<32x256xf32>
    %2 = arith.maximumf %0, %1 : vector<32x256xf32>
    %c0_1 = arith.constant 0 : index
    %c0_2 = arith.constant 0 : index
    %c0_3 = arith.constant 0 : index
    %3 = vector.load %arg2[%c0_1, %c0_2, %c0_3] : memref<9x16x32xf32, #tpu.memory_space<vmem>>, vector<1x16x32xf32>
    %4 = vector.shape_cast %3 : vector<1x16x32xf32> to vector<16x32xf32>
    %5 = vector.extract_strided_slice %2 {offsets = [0, 0], sizes = [32, 128], strides = [1, 1]} : vector<32x256xf32> to vector<32x128xf32>
    %cst_4 = arith.constant dense<0.000000e+00> : vector<16x128xf32>
    %6 = tpu.matmul %4, %5, %cst_4 {dimension_numbers = #tpu.dot_dimension_numbers<[1], [0], [0], [1], [0, 0, 1, 1], [], []>} : vector<16x32xf32>, vector<32x128xf32>, vector<16x128xf32> -> vector<16x128xf32>
    %c1 = arith.constant 1 : index
    %c0_5 = arith.constant 0 : index
    %c0_6 = arith.constant 0 : index
    %7 = vector.load %arg2[%c1, %c0_5, %c0_6] : memref<9x16x32xf32, #tpu.memory_space<vmem>>, vector<1x16x32xf32>
    %8 = vector.shape_cast %7 : vector<1x16x32xf32> to vector<16x32xf32>
    %9 = vector.extract_strided_slice %2 {offsets = [0, 1], sizes = [32, 128], strides = [1, 1]} : vector<32x256xf32> to vector<32x128xf32>
    %cst_7 = arith.constant dense<0.000000e+00> : vector<16x128xf32>
    %10 = tpu.matmul %8, %9, %cst_7 {dimension_numbers = #tpu.dot_dimension_numbers<[1], [0], [0], [1], [0, 0, 1, 1], [], []>} : vector<16x32xf32>, vector<32x128xf32>, vector<16x128xf32> -> vector<16x128xf32>
    %11 = arith.addf %6, %10 : vector<16x128xf32>
    %c2 = arith.constant 2 : index
    %c0_8 = arith.constant 0 : index
    %c0_9 = arith.constant 0 : index
    %12 = vector.load %arg2[%c2, %c0_8, %c0_9] : memref<9x16x32xf32, #tpu.memory_space<vmem>>, vector<1x16x32xf32>
    %13 = vector.shape_cast %12 : vector<1x16x32xf32> to vector<16x32xf32>
    %14 = vector.extract_strided_slice %2 {offsets = [0, 2], sizes = [32, 128], strides = [1, 1]} : vector<32x256xf32> to vector<32x128xf32>
    %cst_10 = arith.constant dense<0.000000e+00> : vector<16x128xf32>
    %15 = tpu.matmul %13, %14, %cst_10 {dimension_numbers = #tpu.dot_dimension_numbers<[1], [0], [0], [1], [0, 0, 1, 1], [], []>} : vector<16x32xf32>, vector<32x128xf32>, vector<16x128xf32> -> vector<16x128xf32>
    %16 = arith.addf %11, %15 : vector<16x128xf32>
    %c3 = arith.constant 3 : index
    %c0_11 = arith.constant 0 : index
    %c0_12 = arith.constant 0 : index
    %17 = vector.load %arg2[%c3, %c0_11, %c0_12] : memref<9x16x32xf32, #tpu.memory_space<vmem>>, vector<1x16x32xf32>
    %18 = vector.shape_cast %17 : vector<1x16x32xf32> to vector<16x32xf32>
    %19 = vector.extract_strided_slice %2 {offsets = [0, 10], sizes = [32, 128], strides = [1, 1]} : vector<32x256xf32> to vector<32x128xf32>
    %cst_13 = arith.constant dense<0.000000e+00> : vector<16x128xf32>
    %20 = tpu.matmul %18, %19, %cst_13 {dimension_numbers = #tpu.dot_dimension_numbers<[1], [0], [0], [1], [0, 0, 1, 1], [], []>} : vector<16x32xf32>, vector<32x128xf32>, vector<16x128xf32> -> vector<16x128xf32>
    %21 = arith.addf %16, %20 : vector<16x128xf32>
    %c4 = arith.constant 4 : index
    %c0_14 = arith.constant 0 : index
    %c0_15 = arith.constant 0 : index
    %22 = vector.load %arg2[%c4, %c0_14, %c0_15] : memref<9x16x32xf32, #tpu.memory_space<vmem>>, vector<1x16x32xf32>
    %23 = vector.shape_cast %22 : vector<1x16x32xf32> to vector<16x32xf32>
    %24 = vector.extract_strided_slice %2 {offsets = [0, 11], sizes = [32, 128], strides = [1, 1]} : vector<32x256xf32> to vector<32x128xf32>
    %cst_16 = arith.constant dense<0.000000e+00> : vector<16x128xf32>
    %25 = tpu.matmul %23, %24, %cst_16 {dimension_numbers = #tpu.dot_dimension_numbers<[1], [0], [0], [1], [0, 0, 1, 1], [], []>} : vector<16x32xf32>, vector<32x128xf32>, vector<16x128xf32> -> vector<16x128xf32>
    %26 = arith.addf %21, %25 : vector<16x128xf32>
    %c5 = arith.constant 5 : index
    %c0_17 = arith.constant 0 : index
    %c0_18 = arith.constant 0 : index
    %27 = vector.load %arg2[%c5, %c0_17, %c0_18] : memref<9x16x32xf32, #tpu.memory_space<vmem>>, vector<1x16x32xf32>
    %28 = vector.shape_cast %27 : vector<1x16x32xf32> to vector<16x32xf32>
    %29 = vector.extract_strided_slice %2 {offsets = [0, 12], sizes = [32, 128], strides = [1, 1]} : vector<32x256xf32> to vector<32x128xf32>
    %cst_19 = arith.constant dense<0.000000e+00> : vector<16x128xf32>
    %30 = tpu.matmul %28, %29, %cst_19 {dimension_numbers = #tpu.dot_dimension_numbers<[1], [0], [0], [1], [0, 0, 1, 1], [], []>} : vector<16x32xf32>, vector<32x128xf32>, vector<16x128xf32> -> vector<16x128xf32>
    %31 = arith.addf %26, %30 : vector<16x128xf32>
    %c6 = arith.constant 6 : index
    %c0_20 = arith.constant 0 : index
    %c0_21 = arith.constant 0 : index
    %32 = vector.load %arg2[%c6, %c0_20, %c0_21] : memref<9x16x32xf32, #tpu.memory_space<vmem>>, vector<1x16x32xf32>
    %33 = vector.shape_cast %32 : vector<1x16x32xf32> to vector<16x32xf32>
    %34 = vector.extract_strided_slice %2 {offsets = [0, 20], sizes = [32, 128], strides = [1, 1]} : vector<32x256xf32> to vector<32x128xf32>
    %cst_22 = arith.constant dense<0.000000e+00> : vector<16x128xf32>
    %35 = tpu.matmul %33, %34, %cst_22 {dimension_numbers = #tpu.dot_dimension_numbers<[1], [0], [0], [1], [0, 0, 1, 1], [], []>} : vector<16x32xf32>, vector<32x128xf32>, vector<16x128xf32> -> vector<16x128xf32>
    %36 = arith.addf %31, %35 : vector<16x128xf32>
    %c7 = arith.constant 7 : index
    %c0_23 = arith.constant 0 : index
    %c0_24 = arith.constant 0 : index
    %37 = vector.load %arg2[%c7, %c0_23, %c0_24] : memref<9x16x32xf32, #tpu.memory_space<vmem>>, vector<1x16x32xf32>
    %38 = vector.shape_cast %37 : vector<1x16x32xf32> to vector<16x32xf32>
    %39 = vector.extract_strided_slice %2 {offsets = [0, 21], sizes = [32, 128], strides = [1, 1]} : vector<32x256xf32> to vector<32x128xf32>
    %cst_25 = arith.constant dense<0.000000e+00> : vector<16x128xf32>
    %40 = tpu.matmul %38, %39, %cst_25 {dimension_numbers = #tpu.dot_dimension_numbers<[1], [0], [0], [1], [0, 0, 1, 1], [], []>} : vector<16x32xf32>, vector<32x128xf32>, vector<16x128xf32> -> vector<16x128xf32>
    %41 = arith.addf %36, %40 : vector<16x128xf32>
    %c8 = arith.constant 8 : index
    %c0_26 = arith.constant 0 : index
    %c0_27 = arith.constant 0 : index
    %42 = vector.load %arg2[%c8, %c0_26, %c0_27] : memref<9x16x32xf32, #tpu.memory_space<vmem>>, vector<1x16x32xf32>
    %43 = vector.shape_cast %42 : vector<1x16x32xf32> to vector<16x32xf32>
    %44 = vector.extract_strided_slice %2 {offsets = [0, 22], sizes = [32, 128], strides = [1, 1]} : vector<32x256xf32> to vector<32x128xf32>
    %cst_28 = arith.constant dense<0.000000e+00> : vector<16x128xf32>
    %45 = tpu.matmul %43, %44, %cst_28 {dimension_numbers = #tpu.dot_dimension_numbers<[1], [0], [0], [1], [0, 0, 1, 1], [], []>} : vector<16x32xf32>, vector<32x128xf32>, vector<16x128xf32> -> vector<16x128xf32>
    %46 = arith.addf %41, %45 : vector<16x128xf32>
    %c0_29 = arith.constant 0 : index
    %c0_30 = arith.constant 0 : index
    %47 = vector.load %arg3[%c0_29, %c0_30] : memref<16x1xf32, #tpu.memory_space<vmem>>, vector<16x1xf32>
    %48 = vector.broadcast %47 : vector<16x1xf32> to vector<16x128xf32>
    %49 = arith.addf %46, %48 : vector<16x128xf32>
    %cst_31 = arith.constant 0.000000e+00 : f32
    %50 = vector.broadcast %cst_31 : f32 to vector<16x128xf32>
    %51 = arith.maximumf %49, %50 : vector<16x128xf32>
    %c0_32 = arith.constant 0 : index
    %c0_33 = arith.constant 0 : index
    %52 = vector.load %arg4[%c0_32, %c0_33] : memref<32x16xf32, #tpu.memory_space<vmem>>, vector<32x16xf32>
    %cst_34 = arith.constant dense<0.000000e+00> : vector<32x128xf32>
    %53 = tpu.matmul %52, %51, %cst_34 {dimension_numbers = #tpu.dot_dimension_numbers<[1], [0], [0], [1], [0, 0, 1, 1], [], []>} : vector<32x16xf32>, vector<16x128xf32>, vector<32x128xf32> -> vector<32x128xf32>
    %c0_35 = arith.constant 0 : index
    %c0_36 = arith.constant 0 : index
    %54 = vector.load %arg5[%c0_35, %c0_36] : memref<32x1xf32, #tpu.memory_space<vmem>>, vector<32x1xf32>
    %55 = vector.broadcast %54 : vector<32x1xf32> to vector<32x128xf32>
    %56 = arith.addf %53, %55 : vector<32x128xf32>
    %57 = vector.extract_strided_slice %0 {offsets = [0, 11], sizes = [32, 128], strides = [1, 1]} : vector<32x256xf32> to vector<32x128xf32>
    %58 = arith.addf %56, %57 : vector<32x128xf32>
    %c0_37 = arith.constant 0 : index
    %c0_38 = arith.constant 0 : index
    %59 = vector.load %arg6[%c0_37, %c0_38] : memref<32x128xf32, #tpu.memory_space<vmem>>, vector<32x128xf32>
    tpu.vector_store %arg6[%c0_37, %c0_38], %58 {strides = array<i32>} : memref<32x128xf32, #tpu.memory_space<vmem>>, vector<32x128xf32>,
    return
  }
  func.func @transform_0(%arg0: i32) -> (i32, i32) {
    %c0_i32 = arith.constant 0 : i32
    %c0_i32_0 = arith.constant 0 : i32
    return %c0_i32, %arg0 : i32, i32
  }
  func.func @transform_1(%arg0: i32) -> (i32, i32, i32) {
    %c0_i32 = arith.constant 0 : i32
    %c0_i32_0 = arith.constant 0 : i32
    %c0_i32_1 = arith.constant 0 : i32
    %c0_i32_2 = arith.constant 0 : i32
    return %c0_i32, %c0_i32_0, %c0_i32_1 : i32, i32, i32
  }
  func.func @transform_2(%arg0: i32) -> (i32, i32) {
    %c0_i32 = arith.constant 0 : i32
    %c0_i32_0 = arith.constant 0 : i32
    %c0_i32_1 = arith.constant 0 : i32
    return %c0_i32, %c0_i32_0 : i32, i32
  }
  func.func @transform_3(%arg0: i32) -> (i32, i32) {
    %c0_i32 = arith.constant 0 : i32
    %c0_i32_0 = arith.constant 0 : i32
    %c0_i32_1 = arith.constant 0 : i32
    return %c0_i32, %c0_i32_0 : i32, i32
  }
  func.func @transform_4(%arg0: i32) -> (i32, i32) {
    %c0_i32 = arith.constant 0 : i32
    %c0_i32_0 = arith.constant 0 : i32
    %c0_i32_1 = arith.constant 0 : i32
    return %c0_i32, %c0_i32_0 : i32, i32
  }
  func.func @transform_5(%arg0: i32) -> (i32, i32) {
    %c0_i32 = arith.constant 0 : i32
    %c0_i32_0 = arith.constant 0 : i32
    return %c0_i32, %arg0 : i32, i32
  }
}

module attributes {stable_mosaic.version = 11 : i64} {
  func.func @_resblock_kernel(%arg0: i32, %arg1: memref<32x256xf32, #tpu.memory_space<vmem>>, %arg2: memref<9x16x32xf32, #tpu.memory_space<vmem>>, %arg3: memref<16x1xf32, #tpu.memory_space<vmem>>, %arg4: memref<32x16xf32, #tpu.memory_space<vmem>>, %arg5: memref<32x1xf32, #tpu.memory_space<vmem>>, %arg6: memref<32x128xf32, #tpu.memory_space<vmem>>) attributes {dimension_semantics = [#tpu.dimension_semantics<parallel>], iteration_bounds = array<i64: 2>, scalar_prefetch = 0 : i64, scratch_operands = 0 : i64, tpu.core_type = #tpu.core_type<tc>, window_params = [{transform_indices = @transform_0, window_bounds = array<i64: 32, 256>}, {pipeline_mode = #tpu.pipeline_mode<synchronous>, transform_indices = @transform_1, window_bounds = array<i64: 9, 16, 32>}, {pipeline_mode = #tpu.pipeline_mode<synchronous>, transform_indices = @transform_2, window_bounds = array<i64: 16, 1>}, {pipeline_mode = #tpu.pipeline_mode<synchronous>, transform_indices = @transform_3, window_bounds = array<i64: 32, 16>}, {pipeline_mode = #tpu.pipeline_mode<synchronous>, transform_indices = @transform_4, window_bounds = array<i64: 32, 1>}, {transform_indices = @transform_5, window_bounds = array<i64: 32, 128>}]} {
    %c0 = arith.constant 0 : index
    %c0_0 = arith.constant 0 : index
    %0 = vector.load %arg1[%c0, %c0_0] : memref<32x256xf32, #tpu.memory_space<vmem>>, vector<32x256xf32>
    %cst = arith.constant 0.000000e+00 : f32
    %1 = vector.broadcast %cst : f32 to vector<32x256xf32>
    %2 = arith.maximumf %0, %1 : vector<32x256xf32>
    %c0_1 = arith.constant 0 : index
    %c0_2 = arith.constant 0 : index
    %c0_3 = arith.constant 0 : index
    %3 = vector.load %arg2[%c0_1, %c0_2, %c0_3] : memref<9x16x32xf32, #tpu.memory_space<vmem>>, vector<1x16x32xf32>
    %4 = vector.shape_cast %3 : vector<1x16x32xf32> to vector<16x32xf32>
    %5 = vector.extract_strided_slice %2 {offsets = [0, 0], sizes = [32, 128], strides = [1, 1]} : vector<32x256xf32> to vector<32x128xf32>
    %cst_4 = arith.constant dense<0.000000e+00> : vector<16x128xf32>
    %6 = tpu.matmul %4, %5, %cst_4 {dimension_numbers = #tpu.dot_dimension_numbers<[1], [0], [0], [1], [0, 0, 1, 1], [], []>} : vector<16x32xf32>, vector<32x128xf32>, vector<16x128xf32> -> vector<16x128xf32>
    %c1 = arith.constant 1 : index
    %c0_5 = arith.constant 0 : index
    %c0_6 = arith.constant 0 : index
    %7 = vector.load %arg2[%c1, %c0_5, %c0_6] : memref<9x16x32xf32, #tpu.memory_space<vmem>>, vector<1x16x32xf32>
    %8 = vector.shape_cast %7 : vector<1x16x32xf32> to vector<16x32xf32>
    %9 = vector.extract_strided_slice %2 {offsets = [0, 1], sizes = [32, 128], strides = [1, 1]} : vector<32x256xf32> to vector<32x128xf32>
    %cst_7 = arith.constant dense<0.000000e+00> : vector<16x128xf32>
    %10 = tpu.matmul %8, %9, %cst_7 {dimension_numbers = #tpu.dot_dimension_numbers<[1], [0], [0], [1], [0, 0, 1, 1], [], []>} : vector<16x32xf32>, vector<32x128xf32>, vector<16x128xf32> -> vector<16x128xf32>
    %11 = arith.addf %6, %10 : vector<16x128xf32>
    %c2 = arith.constant 2 : index
    %c0_8 = arith.constant 0 : index
    %c0_9 = arith.constant 0 : index
    %12 = vector.load %arg2[%c2, %c0_8, %c0_9] : memref<9x16x32xf32, #tpu.memory_space<vmem>>, vector<1x16x32xf32>
    %13 = vector.shape_cast %12 : vector<1x16x32xf32> to vector<16x32xf32>
    %14 = vector.extract_strided_slice %2 {offsets = [0, 2], sizes = [32, 128], strides = [1, 1]} : vector<32x256xf32> to vector<32x128xf32>
    %cst_10 = arith.constant dense<0.000000e+00> : vector<16x128xf32>
    %15 = tpu.matmul %13, %14, %cst_10 {dimension_numbers = #tpu.dot_dimension_numbers<[1], [0], [0], [1], [0, 0, 1, 1], [], []>} : vector<16x32xf32>, vector<32x128xf32>, vector<16x128xf32> -> vector<16x128xf32>
    %16 = arith.addf %11, %15 : vector<16x128xf32>
    %c3 = arith.constant 3 : index
    %c0_11 = arith.constant 0 : index
    %c0_12 = arith.constant 0 : index
    %17 = vector.load %arg2[%c3, %c0_11, %c0_12] : memref<9x16x32xf32, #tpu.memory_space<vmem>>, vector<1x16x32xf32>
    %18 = vector.shape_cast %17 : vector<1x16x32xf32> to vector<16x32xf32>
    %19 = vector.extract_strided_slice %2 {offsets = [0, 10], sizes = [32, 128], strides = [1, 1]} : vector<32x256xf32> to vector<32x128xf32>
    %cst_13 = arith.constant dense<0.000000e+00> : vector<16x128xf32>
    %20 = tpu.matmul %18, %19, %cst_13 {dimension_numbers = #tpu.dot_dimension_numbers<[1], [0], [0], [1], [0, 0, 1, 1], [], []>} : vector<16x32xf32>, vector<32x128xf32>, vector<16x128xf32> -> vector<16x128xf32>
    %21 = arith.addf %16, %20 : vector<16x128xf32>
    %c4 = arith.constant 4 : index
    %c0_14 = arith.constant 0 : index
    %c0_15 = arith.constant 0 : index
    %22 = vector.load %arg2[%c4, %c0_14, %c0_15] : memref<9x16x32xf32, #tpu.memory_space<vmem>>, vector<1x16x32xf32>
    %23 = vector.shape_cast %22 : vector<1x16x32xf32> to vector<16x32xf32>
    %24 = vector.extract_strided_slice %2 {offsets = [0, 11], sizes = [32, 128], strides = [1, 1]} : vector<32x256xf32> to vector<32x128xf32>
    %cst_16 = arith.constant dense<0.000000e+00> : vector<16x128xf32>
    %25 = tpu.matmul %23, %24, %cst_16 {dimension_numbers = #tpu.dot_dimension_numbers<[1], [0], [0], [1], [0, 0, 1, 1], [], []>} : vector<16x32xf32>, vector<32x128xf32>, vector<16x128xf32> -> vector<16x128xf32>
    %26 = arith.addf %21, %25 : vector<16x128xf32>
    %c5 = arith.constant 5 : index
    %c0_17 = arith.constant 0 : index
    %c0_18 = arith.constant 0 : index
    %27 = vector.load %arg2[%c5, %c0_17, %c0_18] : memref<9x16x32xf32, #tpu.memory_space<vmem>>, vector<1x16x32xf32>
    %28 = vector.shape_cast %27 : vector<1x16x32xf32> to vector<16x32xf32>
    %29 = vector.extract_strided_slice %2 {offsets = [0, 12], sizes = [32, 128], strides = [1, 1]} : vector<32x256xf32> to vector<32x128xf32>
    %cst_19 = arith.constant dense<0.000000e+00> : vector<16x128xf32>
    %30 = tpu.matmul %28, %29, %cst_19 {dimension_numbers = #tpu.dot_dimension_numbers<[1], [0], [0], [1], [0, 0, 1, 1], [], []>} : vector<16x32xf32>, vector<32x128xf32>, vector<16x128xf32> -> vector<16x128xf32>
    %31 = arith.addf %26, %30 : vector<16x128xf32>
    %c6 = arith.constant 6 : index
    %c0_20 = arith.constant 0 : index
    %c0_21 = arith.constant 0 : index
    %32 = vector.load %arg2[%c6, %c0_20, %c0_21] : memref<9x16x32xf32, #tpu.memory_space<vmem>>, vector<1x16x32xf32>
    %33 = vector.shape_cast %32 : vector<1x16x32xf32> to vector<16x32xf32>
    %34 = vector.extract_strided_slice %2 {offsets = [0, 20], sizes = [32, 128], strides = [1, 1]} : vector<32x256xf32> to vector<32x128xf32>
    %cst_22 = arith.constant dense<0.000000e+00> : vector<16x128xf32>
    %35 = tpu.matmul %33, %34, %cst_22 {dimension_numbers = #tpu.dot_dimension_numbers<[1], [0], [0], [1], [0, 0, 1, 1], [], []>} : vector<16x32xf32>, vector<32x128xf32>, vector<16x128xf32> -> vector<16x128xf32>
    %36 = arith.addf %31, %35 : vector<16x128xf32>
    %c7 = arith.constant 7 : index
    %c0_23 = arith.constant 0 : index
    %c0_24 = arith.constant 0 : index
    %37 = vector.load %arg2[%c7, %c0_23, %c0_24] : memref<9x16x32xf32, #tpu.memory_space<vmem>>, vector<1x16x32xf32>
    %38 = vector.shape_cast %37 : vector<1x16x32xf32> to vector<16x32xf32>
    %39 = vector.extract_strided_slice %2 {offsets = [0, 21], sizes = [32, 128], strides = [1, 1]} : vector<32x256xf32> to vector<32x128xf32>
    %cst_25 = arith.constant dense<0.000000e+00> : vector<16x128xf32>
    %40 = tpu.matmul %38, %39, %cst_25 {dimension_numbers = #tpu.dot_dimension_numbers<[1], [0], [0], [1], [0, 0, 1, 1], [], []>} : vector<16x32xf32>, vector<32x128xf32>, vector<16x128xf32> -> vector<16x128xf32>
    %41 = arith.addf %36, %40 : vector<16x128xf32>
    %c8 = arith.constant 8 : index
    %c0_26 = arith.constant 0 : index
    %c0_27 = arith.constant 0 : index
    %42 = vector.load %arg2[%c8, %c0_26, %c0_27] : memref<9x16x32xf32, #tpu.memory_space<vmem>>, vector<1x16x32xf32>
    %43 = vector.shape_cast %42 : vector<1x16x32xf32> to vector<16x32xf32>
    %44 = vector.extract_strided_slice %2 {offsets = [0, 22], sizes = [32, 128], strides = [1, 1]} : vector<32x256xf32> to vector<32x128xf32>
    %cst_28 = arith.constant dense<0.000000e+00> : vector<16x128xf32>
    %45 = tpu.matmul %43, %44, %cst_28 {dimension_numbers = #tpu.dot_dimension_numbers<[1], [0], [0], [1], [0, 0, 1, 1], [], []>} : vector<16x32xf32>, vector<32x128xf32>, vector<16x128xf32> -> vector<16x128xf32>
    %46 = arith.addf %41, %45 : vector<16x128xf32>
    %c0_29 = arith.constant 0 : index
    %c0_30 = arith.constant 0 : index
    %47 = vector.load %arg3[%c0_29, %c0_30] : memref<16x1xf32, #tpu.memory_space<vmem>>, vector<16x1xf32>
    %48 = vector.broadcast %47 : vector<16x1xf32> to vector<16x128xf32>
    %49 = arith.addf %46, %48 : vector<16x128xf32>
    %cst_31 = arith.constant 0.000000e+00 : f32
    %50 = vector.broadcast %cst_31 : f32 to vector<16x128xf32>
    %51 = arith.maximumf %49, %50 : vector<16x128xf32>
    %c0_32 = arith.constant 0 : index
    %c0_33 = arith.constant 0 : index
    %52 = vector.load %arg4[%c0_32, %c0_33] : memref<32x16xf32, #tpu.memory_space<vmem>>, vector<32x16xf32>
    %cst_34 = arith.constant dense<0.000000e+00> : vector<32x128xf32>
    %53 = tpu.matmul %52, %51, %cst_34 {dimension_numbers = #tpu.dot_dimension_numbers<[1], [0], [0], [1], [0, 0, 1, 1], [], []>} : vector<32x16xf32>, vector<16x128xf32>, vector<32x128xf32> -> vector<32x128xf32>
    %c0_35 = arith.constant 0 : index
    %c0_36 = arith.constant 0 : index
    %54 = vector.load %arg5[%c0_35, %c0_36] : memref<32x1xf32, #tpu.memory_space<vmem>>, vector<32x1xf32>
    %55 = vector.broadcast %54 : vector<32x1xf32> to vector<32x128xf32>
    %56 = arith.addf %53, %55 : vector<32x128xf32>
    %57 = vector.extract_strided_slice %0 {offsets = [0, 11], sizes = [32, 128], strides = [1, 1]} : vector<32x256xf32> to vector<32x128xf32>
    %58 = arith.addf %56, %57 : vector<32x128xf32>
    %cst_37 = arith.constant 0.000000e+00 : f32
    %59 = vector.broadcast %cst_37 : f32 to vector<32x128xf32>
    %60 = arith.maximumf %58, %59 : vector<32x128xf32>
    %c0_38 = arith.constant 0 : index
    %c0_39 = arith.constant 0 : index
    %61 = vector.load %arg6[%c0_38, %c0_39] : memref<32x128xf32, #tpu.memory_space<vmem>>, vector<32x128xf32>
    tpu.vector_store %arg6[%c0_38, %c0_39], %60 {strides = array<i32>} : memref<32x128xf32, #tpu.memory_space<vmem>>, vector<32x128xf32>,
    return
  }
  func.func @transform_0(%arg0: i32) -> (i32, i32) {
    %c0_i32 = arith.constant 0 : i32
    %c0_i32_0 = arith.constant 0 : i32
    return %c0_i32, %arg0 : i32, i32
  }
  func.func @transform_1(%arg0: i32) -> (i32, i32, i32) {
    %c0_i32 = arith.constant 0 : i32
    %c0_i32_0 = arith.constant 0 : i32
    %c0_i32_1 = arith.constant 0 : i32
    %c0_i32_2 = arith.constant 0 : i32
    return %c0_i32, %c0_i32_0, %c0_i32_1 : i32, i32, i32
  }
  func.func @transform_2(%arg0: i32) -> (i32, i32) {
    %c0_i32 = arith.constant 0 : i32
    %c0_i32_0 = arith.constant 0 : i32
    %c0_i32_1 = arith.constant 0 : i32
    return %c0_i32, %c0_i32_0 : i32, i32
  }
  func.func @transform_3(%arg0: i32) -> (i32, i32) {
    %c0_i32 = arith.constant 0 : i32
    %c0_i32_0 = arith.constant 0 : i32
    %c0_i32_1 = arith.constant 0 : i32
    return %c0_i32, %c0_i32_0 : i32, i32
  }
  func.func @transform_4(%arg0: i32) -> (i32, i32) {
    %c0_i32 = arith.constant 0 : i32
    %c0_i32_0 = arith.constant 0 : i32
    %c0_i32_1 = arith.constant 0 : i32
    return %c0_i32, %c0_i32_0 : i32, i32
  }
  func.func @transform_5(%arg0: i32) -> (i32, i32) {
    %c0_i32 = arith.constant 0 : i32
    %c0_i32_0 = arith.constant 0 : i32
    return %c0_i32, %arg0 : i32, i32
  }
}

module attributes {stable_mosaic.version = 11 : i64} {
  func.func @_convt4x4_kernel(%arg0: i32, %arg1: memref<32x256xf32, #tpu.memory_space<vmem>>, %arg2: memref<16x16x32xf32, #tpu.memory_space<vmem>>, %arg3: memref<16x1xf32, #tpu.memory_space<vmem>>, %arg4: memref<4x16x128xf32, #tpu.memory_space<vmem>>) attributes {dimension_semantics = [#tpu.dimension_semantics<parallel>], iteration_bounds = array<i64: 2>, scalar_prefetch = 0 : i64, scratch_operands = 0 : i64, tpu.core_type = #tpu.core_type<tc>, window_params = [{transform_indices = @transform_0, window_bounds = array<i64: 32, 256>}, {pipeline_mode = #tpu.pipeline_mode<synchronous>, transform_indices = @transform_1, window_bounds = array<i64: 16, 16, 32>}, {pipeline_mode = #tpu.pipeline_mode<synchronous>, transform_indices = @transform_2, window_bounds = array<i64: 16, 1>}, {transform_indices = @transform_3, window_bounds = array<i64: 4, 16, 128>}]} {
    %c0 = arith.constant 0 : index
    %c0_0 = arith.constant 0 : index
    %0 = vector.load %arg1[%c0, %c0_0] : memref<32x256xf32, #tpu.memory_space<vmem>>, vector<32x256xf32>
    %c0_1 = arith.constant 0 : index
    %c0_2 = arith.constant 0 : index
    %c0_3 = arith.constant 0 : index
    %1 = vector.load %arg2[%c0_1, %c0_2, %c0_3] : memref<16x16x32xf32, #tpu.memory_space<vmem>>, vector<1x16x32xf32>
    %2 = vector.shape_cast %1 : vector<1x16x32xf32> to vector<16x32xf32>
    %3 = vector.extract_strided_slice %0 {offsets = [0, 0], sizes = [32, 128], strides = [1, 1]} : vector<32x256xf32> to vector<32x128xf32>
    %cst = arith.constant dense<0.000000e+00> : vector<16x128xf32>
    %4 = tpu.matmul %2, %3, %cst {dimension_numbers = #tpu.dot_dimension_numbers<[1], [0], [0], [1], [0, 0, 1, 1], [], []>} : vector<16x32xf32>, vector<32x128xf32>, vector<16x128xf32> -> vector<16x128xf32>
    %c1 = arith.constant 1 : index
    %c0_4 = arith.constant 0 : index
    %c0_5 = arith.constant 0 : index
    %5 = vector.load %arg2[%c1, %c0_4, %c0_5] : memref<16x16x32xf32, #tpu.memory_space<vmem>>, vector<1x16x32xf32>
    %6 = vector.shape_cast %5 : vector<1x16x32xf32> to vector<16x32xf32>
    %7 = vector.extract_strided_slice %0 {offsets = [0, 1], sizes = [32, 128], strides = [1, 1]} : vector<32x256xf32> to vector<32x128xf32>
    %cst_6 = arith.constant dense<0.000000e+00> : vector<16x128xf32>
    %8 = tpu.matmul %6, %7, %cst_6 {dimension_numbers = #tpu.dot_dimension_numbers<[1], [0], [0], [1], [0, 0, 1, 1], [], []>} : vector<16x32xf32>, vector<32x128xf32>, vector<16x128xf32> -> vector<16x128xf32>
    %9 = arith.addf %4, %8 : vector<16x128xf32>
    %c2 = arith.constant 2 : index
    %c0_7 = arith.constant 0 : index
    %c0_8 = arith.constant 0 : index
    %10 = vector.load %arg2[%c2, %c0_7, %c0_8] : memref<16x16x32xf32, #tpu.memory_space<vmem>>, vector<1x16x32xf32>
    %11 = vector.shape_cast %10 : vector<1x16x32xf32> to vector<16x32xf32>
    %12 = vector.extract_strided_slice %0 {offsets = [0, 10], sizes = [32, 128], strides = [1, 1]} : vector<32x256xf32> to vector<32x128xf32>
    %cst_9 = arith.constant dense<0.000000e+00> : vector<16x128xf32>
    %13 = tpu.matmul %11, %12, %cst_9 {dimension_numbers = #tpu.dot_dimension_numbers<[1], [0], [0], [1], [0, 0, 1, 1], [], []>} : vector<16x32xf32>, vector<32x128xf32>, vector<16x128xf32> -> vector<16x128xf32>
    %14 = arith.addf %9, %13 : vector<16x128xf32>
    %c3 = arith.constant 3 : index
    %c0_10 = arith.constant 0 : index
    %c0_11 = arith.constant 0 : index
    %15 = vector.load %arg2[%c3, %c0_10, %c0_11] : memref<16x16x32xf32, #tpu.memory_space<vmem>>, vector<1x16x32xf32>
    %16 = vector.shape_cast %15 : vector<1x16x32xf32> to vector<16x32xf32>
    %17 = vector.extract_strided_slice %0 {offsets = [0, 11], sizes = [32, 128], strides = [1, 1]} : vector<32x256xf32> to vector<32x128xf32>
    %cst_12 = arith.constant dense<0.000000e+00> : vector<16x128xf32>
    %18 = tpu.matmul %16, %17, %cst_12 {dimension_numbers = #tpu.dot_dimension_numbers<[1], [0], [0], [1], [0, 0, 1, 1], [], []>} : vector<16x32xf32>, vector<32x128xf32>, vector<16x128xf32> -> vector<16x128xf32>
    %19 = arith.addf %14, %18 : vector<16x128xf32>
    %c0_13 = arith.constant 0 : index
    %c0_14 = arith.constant 0 : index
    %20 = vector.load %arg3[%c0_13, %c0_14] : memref<16x1xf32, #tpu.memory_space<vmem>>, vector<16x1xf32>
    %21 = vector.broadcast %20 : vector<16x1xf32> to vector<16x128xf32>
    %22 = arith.addf %19, %21 : vector<16x128xf32>
    %cst_15 = arith.constant 0.000000e+00 : f32
    %23 = vector.broadcast %cst_15 : f32 to vector<16x128xf32>
    %24 = arith.maximumf %22, %23 : vector<16x128xf32>
    %c0_16 = arith.constant 0 : index
    %c0_17 = arith.constant 0 : index
    %c0_18 = arith.constant 0 : index
    %25 = vector.load %arg4[%c0_16, %c0_17, %c0_18] : memref<4x16x128xf32, #tpu.memory_space<vmem>>, vector<1x16x128xf32>
    %26 = vector.shape_cast %25 : vector<1x16x128xf32> to vector<16x128xf32>
    %27 = vector.shape_cast %24 : vector<16x128xf32> to vector<1x16x128xf32>
    tpu.vector_store %arg4[%c0_16, %c0_17, %c0_18], %27 {strides = array<i32>} : memref<4x16x128xf32, #tpu.memory_space<vmem>>, vector<1x16x128xf32>,
    %c4 = arith.constant 4 : index
    %c0_19 = arith.constant 0 : index
    %c0_20 = arith.constant 0 : index
    %28 = vector.load %arg2[%c4, %c0_19, %c0_20] : memref<16x16x32xf32, #tpu.memory_space<vmem>>, vector<1x16x32xf32>
    %29 = vector.shape_cast %28 : vector<1x16x32xf32> to vector<16x32xf32>
    %30 = vector.extract_strided_slice %0 {offsets = [0, 1], sizes = [32, 128], strides = [1, 1]} : vector<32x256xf32> to vector<32x128xf32>
    %cst_21 = arith.constant dense<0.000000e+00> : vector<16x128xf32>
    %31 = tpu.matmul %29, %30, %cst_21 {dimension_numbers = #tpu.dot_dimension_numbers<[1], [0], [0], [1], [0, 0, 1, 1], [], []>} : vector<16x32xf32>, vector<32x128xf32>, vector<16x128xf32> -> vector<16x128xf32>
    %c5 = arith.constant 5 : index
    %c0_22 = arith.constant 0 : index
    %c0_23 = arith.constant 0 : index
    %32 = vector.load %arg2[%c5, %c0_22, %c0_23] : memref<16x16x32xf32, #tpu.memory_space<vmem>>, vector<1x16x32xf32>
    %33 = vector.shape_cast %32 : vector<1x16x32xf32> to vector<16x32xf32>
    %34 = vector.extract_strided_slice %0 {offsets = [0, 2], sizes = [32, 128], strides = [1, 1]} : vector<32x256xf32> to vector<32x128xf32>
    %cst_24 = arith.constant dense<0.000000e+00> : vector<16x128xf32>
    %35 = tpu.matmul %33, %34, %cst_24 {dimension_numbers = #tpu.dot_dimension_numbers<[1], [0], [0], [1], [0, 0, 1, 1], [], []>} : vector<16x32xf32>, vector<32x128xf32>, vector<16x128xf32> -> vector<16x128xf32>
    %36 = arith.addf %31, %35 : vector<16x128xf32>
    %c6 = arith.constant 6 : index
    %c0_25 = arith.constant 0 : index
    %c0_26 = arith.constant 0 : index
    %37 = vector.load %arg2[%c6, %c0_25, %c0_26] : memref<16x16x32xf32, #tpu.memory_space<vmem>>, vector<1x16x32xf32>
    %38 = vector.shape_cast %37 : vector<1x16x32xf32> to vector<16x32xf32>
    %39 = vector.extract_strided_slice %0 {offsets = [0, 11], sizes = [32, 128], strides = [1, 1]} : vector<32x256xf32> to vector<32x128xf32>
    %cst_27 = arith.constant dense<0.000000e+00> : vector<16x128xf32>
    %40 = tpu.matmul %38, %39, %cst_27 {dimension_numbers = #tpu.dot_dimension_numbers<[1], [0], [0], [1], [0, 0, 1, 1], [], []>} : vector<16x32xf32>, vector<32x128xf32>, vector<16x128xf32> -> vector<16x128xf32>
    %41 = arith.addf %36, %40 : vector<16x128xf32>
    %c7 = arith.constant 7 : index
    %c0_28 = arith.constant 0 : index
    %c0_29 = arith.constant 0 : index
    %42 = vector.load %arg2[%c7, %c0_28, %c0_29] : memref<16x16x32xf32, #tpu.memory_space<vmem>>, vector<1x16x32xf32>
    %43 = vector.shape_cast %42 : vector<1x16x32xf32> to vector<16x32xf32>
    %44 = vector.extract_strided_slice %0 {offsets = [0, 12], sizes = [32, 128], strides = [1, 1]} : vector<32x256xf32> to vector<32x128xf32>
    %cst_30 = arith.constant dense<0.000000e+00> : vector<16x128xf32>
    %45 = tpu.matmul %43, %44, %cst_30 {dimension_numbers = #tpu.dot_dimension_numbers<[1], [0], [0], [1], [0, 0, 1, 1], [], []>} : vector<16x32xf32>, vector<32x128xf32>, vector<16x128xf32> -> vector<16x128xf32>
    %46 = arith.addf %41, %45 : vector<16x128xf32>
    %c0_31 = arith.constant 0 : index
    %c0_32 = arith.constant 0 : index
    %47 = vector.load %arg3[%c0_31, %c0_32] : memref<16x1xf32, #tpu.memory_space<vmem>>, vector<16x1xf32>
    %48 = vector.broadcast %47 : vector<16x1xf32> to vector<16x128xf32>
    %49 = arith.addf %46, %48 : vector<16x128xf32>
    %cst_33 = arith.constant 0.000000e+00 : f32
    %50 = vector.broadcast %cst_33 : f32 to vector<16x128xf32>
    %51 = arith.maximumf %49, %50 : vector<16x128xf32>
    %c1_34 = arith.constant 1 : index
    %c0_35 = arith.constant 0 : index
    %c0_36 = arith.constant 0 : index
    %52 = vector.load %arg4[%c1_34, %c0_35, %c0_36] : memref<4x16x128xf32, #tpu.memory_space<vmem>>, vector<1x16x128xf32>
    %53 = vector.shape_cast %52 : vector<1x16x128xf32> to vector<16x128xf32>
    %54 = vector.shape_cast %51 : vector<16x128xf32> to vector<1x16x128xf32>
    tpu.vector_store %arg4[%c1_34, %c0_35, %c0_36], %54 {strides = array<i32>} : memref<4x16x128xf32, #tpu.memory_space<vmem>>, vector<1x16x128xf32>,
    %c8 = arith.constant 8 : index
    %c0_37 = arith.constant 0 : index
    %c0_38 = arith.constant 0 : index
    %55 = vector.load %arg2[%c8, %c0_37, %c0_38] : memref<16x16x32xf32, #tpu.memory_space<vmem>>, vector<1x16x32xf32>
    %56 = vector.shape_cast %55 : vector<1x16x32xf32> to vector<16x32xf32>
    %57 = vector.extract_strided_slice %0 {offsets = [0, 10], sizes = [32, 128], strides = [1, 1]} : vector<32x256xf32> to vector<32x128xf32>
    %cst_39 = arith.constant dense<0.000000e+00> : vector<16x128xf32>
    %58 = tpu.matmul %56, %57, %cst_39 {dimension_numbers = #tpu.dot_dimension_numbers<[1], [0], [0], [1], [0, 0, 1, 1], [], []>} : vector<16x32xf32>, vector<32x128xf32>, vector<16x128xf32> -> vector<16x128xf32>
    %c9 = arith.constant 9 : index
    %c0_40 = arith.constant 0 : index
    %c0_41 = arith.constant 0 : index
    %59 = vector.load %arg2[%c9, %c0_40, %c0_41] : memref<16x16x32xf32, #tpu.memory_space<vmem>>, vector<1x16x32xf32>
    %60 = vector.shape_cast %59 : vector<1x16x32xf32> to vector<16x32xf32>
    %61 = vector.extract_strided_slice %0 {offsets = [0, 11], sizes = [32, 128], strides = [1, 1]} : vector<32x256xf32> to vector<32x128xf32>
    %cst_42 = arith.constant dense<0.000000e+00> : vector<16x128xf32>
    %62 = tpu.matmul %60, %61, %cst_42 {dimension_numbers = #tpu.dot_dimension_numbers<[1], [0], [0], [1], [0, 0, 1, 1], [], []>} : vector<16x32xf32>, vector<32x128xf32>, vector<16x128xf32> -> vector<16x128xf32>
    %63 = arith.addf %58, %62 : vector<16x128xf32>
    %c10 = arith.constant 10 : index
    %c0_43 = arith.constant 0 : index
    %c0_44 = arith.constant 0 : index
    %64 = vector.load %arg2[%c10, %c0_43, %c0_44] : memref<16x16x32xf32, #tpu.memory_space<vmem>>, vector<1x16x32xf32>
    %65 = vector.shape_cast %64 : vector<1x16x32xf32> to vector<16x32xf32>
    %66 = vector.extract_strided_slice %0 {offsets = [0, 20], sizes = [32, 128], strides = [1, 1]} : vector<32x256xf32> to vector<32x128xf32>
    %cst_45 = arith.constant dense<0.000000e+00> : vector<16x128xf32>
    %67 = tpu.matmul %65, %66, %cst_45 {dimension_numbers = #tpu.dot_dimension_numbers<[1], [0], [0], [1], [0, 0, 1, 1], [], []>} : vector<16x32xf32>, vector<32x128xf32>, vector<16x128xf32> -> vector<16x128xf32>
    %68 = arith.addf %63, %67 : vector<16x128xf32>
    %c11 = arith.constant 11 : index
    %c0_46 = arith.constant 0 : index
    %c0_47 = arith.constant 0 : index
    %69 = vector.load %arg2[%c11, %c0_46, %c0_47] : memref<16x16x32xf32, #tpu.memory_space<vmem>>, vector<1x16x32xf32>
    %70 = vector.shape_cast %69 : vector<1x16x32xf32> to vector<16x32xf32>
    %71 = vector.extract_strided_slice %0 {offsets = [0, 21], sizes = [32, 128], strides = [1, 1]} : vector<32x256xf32> to vector<32x128xf32>
    %cst_48 = arith.constant dense<0.000000e+00> : vector<16x128xf32>
    %72 = tpu.matmul %70, %71, %cst_48 {dimension_numbers = #tpu.dot_dimension_numbers<[1], [0], [0], [1], [0, 0, 1, 1], [], []>} : vector<16x32xf32>, vector<32x128xf32>, vector<16x128xf32> -> vector<16x128xf32>
    %73 = arith.addf %68, %72 : vector<16x128xf32>
    %c0_49 = arith.constant 0 : index
    %c0_50 = arith.constant 0 : index
    %74 = vector.load %arg3[%c0_49, %c0_50] : memref<16x1xf32, #tpu.memory_space<vmem>>, vector<16x1xf32>
    %75 = vector.broadcast %74 : vector<16x1xf32> to vector<16x128xf32>
    %76 = arith.addf %73, %75 : vector<16x128xf32>
    %cst_51 = arith.constant 0.000000e+00 : f32
    %77 = vector.broadcast %cst_51 : f32 to vector<16x128xf32>
    %78 = arith.maximumf %76, %77 : vector<16x128xf32>
    %c2_52 = arith.constant 2 : index
    %c0_53 = arith.constant 0 : index
    %c0_54 = arith.constant 0 : index
    %79 = vector.load %arg4[%c2_52, %c0_53, %c0_54] : memref<4x16x128xf32, #tpu.memory_space<vmem>>, vector<1x16x128xf32>
    %80 = vector.shape_cast %79 : vector<1x16x128xf32> to vector<16x128xf32>
    %81 = vector.shape_cast %78 : vector<16x128xf32> to vector<1x16x128xf32>
    tpu.vector_store %arg4[%c2_52, %c0_53, %c0_54], %81 {strides = array<i32>} : memref<4x16x128xf32, #tpu.memory_space<vmem>>, vector<1x16x128xf32>,
    %c12 = arith.constant 12 : index
    %c0_55 = arith.constant 0 : index
    %c0_56 = arith.constant 0 : index
    %82 = vector.load %arg2[%c12, %c0_55, %c0_56] : memref<16x16x32xf32, #tpu.memory_space<vmem>>, vector<1x16x32xf32>
    %83 = vector.shape_cast %82 : vector<1x16x32xf32> to vector<16x32xf32>
    %84 = vector.extract_strided_slice %0 {offsets = [0, 11], sizes = [32, 128], strides = [1, 1]} : vector<32x256xf32> to vector<32x128xf32>
    %cst_57 = arith.constant dense<0.000000e+00> : vector<16x128xf32>
    %85 = tpu.matmul %83, %84, %cst_57 {dimension_numbers = #tpu.dot_dimension_numbers<[1], [0], [0], [1], [0, 0, 1, 1], [], []>} : vector<16x32xf32>, vector<32x128xf32>, vector<16x128xf32> -> vector<16x128xf32>
    %c13 = arith.constant 13 : index
    %c0_58 = arith.constant 0 : index
    %c0_59 = arith.constant 0 : index
    %86 = vector.load %arg2[%c13, %c0_58, %c0_59] : memref<16x16x32xf32, #tpu.memory_space<vmem>>, vector<1x16x32xf32>
    %87 = vector.shape_cast %86 : vector<1x16x32xf32> to vector<16x32xf32>
    %88 = vector.extract_strided_slice %0 {offsets = [0, 12], sizes = [32, 128], strides = [1, 1]} : vector<32x256xf32> to vector<32x128xf32>
    %cst_60 = arith.constant dense<0.000000e+00> : vector<16x128xf32>
    %89 = tpu.matmul %87, %88, %cst_60 {dimension_numbers = #tpu.dot_dimension_numbers<[1], [0], [0], [1], [0, 0, 1, 1], [], []>} : vector<16x32xf32>, vector<32x128xf32>, vector<16x128xf32> -> vector<16x128xf32>
    %90 = arith.addf %85, %89 : vector<16x128xf32>
    %c14 = arith.constant 14 : index
    %c0_61 = arith.constant 0 : index
    %c0_62 = arith.constant 0 : index
    %91 = vector.load %arg2[%c14, %c0_61, %c0_62] : memref<16x16x32xf32, #tpu.memory_space<vmem>>, vector<1x16x32xf32>
    %92 = vector.shape_cast %91 : vector<1x16x32xf32> to vector<16x32xf32>
    %93 = vector.extract_strided_slice %0 {offsets = [0, 21], sizes = [32, 128], strides = [1, 1]} : vector<32x256xf32> to vector<32x128xf32>
    %cst_63 = arith.constant dense<0.000000e+00> : vector<16x128xf32>
    %94 = tpu.matmul %92, %93, %cst_63 {dimension_numbers = #tpu.dot_dimension_numbers<[1], [0], [0], [1], [0, 0, 1, 1], [], []>} : vector<16x32xf32>, vector<32x128xf32>, vector<16x128xf32> -> vector<16x128xf32>
    %95 = arith.addf %90, %94 : vector<16x128xf32>
    %c15 = arith.constant 15 : index
    %c0_64 = arith.constant 0 : index
    %c0_65 = arith.constant 0 : index
    %96 = vector.load %arg2[%c15, %c0_64, %c0_65] : memref<16x16x32xf32, #tpu.memory_space<vmem>>, vector<1x16x32xf32>
    %97 = vector.shape_cast %96 : vector<1x16x32xf32> to vector<16x32xf32>
    %98 = vector.extract_strided_slice %0 {offsets = [0, 22], sizes = [32, 128], strides = [1, 1]} : vector<32x256xf32> to vector<32x128xf32>
    %cst_66 = arith.constant dense<0.000000e+00> : vector<16x128xf32>
    %99 = tpu.matmul %97, %98, %cst_66 {dimension_numbers = #tpu.dot_dimension_numbers<[1], [0], [0], [1], [0, 0, 1, 1], [], []>} : vector<16x32xf32>, vector<32x128xf32>, vector<16x128xf32> -> vector<16x128xf32>
    %100 = arith.addf %95, %99 : vector<16x128xf32>
    %c0_67 = arith.constant 0 : index
    %c0_68 = arith.constant 0 : index
    %101 = vector.load %arg3[%c0_67, %c0_68] : memref<16x1xf32, #tpu.memory_space<vmem>>, vector<16x1xf32>
    %102 = vector.broadcast %101 : vector<16x1xf32> to vector<16x128xf32>
    %103 = arith.addf %100, %102 : vector<16x128xf32>
    %cst_69 = arith.constant 0.000000e+00 : f32
    %104 = vector.broadcast %cst_69 : f32 to vector<16x128xf32>
    %105 = arith.maximumf %103, %104 : vector<16x128xf32>
    %c3_70 = arith.constant 3 : index
    %c0_71 = arith.constant 0 : index
    %c0_72 = arith.constant 0 : index
    %106 = vector.load %arg4[%c3_70, %c0_71, %c0_72] : memref<4x16x128xf32, #tpu.memory_space<vmem>>, vector<1x16x128xf32>
    %107 = vector.shape_cast %106 : vector<1x16x128xf32> to vector<16x128xf32>
    %108 = vector.shape_cast %105 : vector<16x128xf32> to vector<1x16x128xf32>
    tpu.vector_store %arg4[%c3_70, %c0_71, %c0_72], %108 {strides = array<i32>} : memref<4x16x128xf32, #tpu.memory_space<vmem>>, vector<1x16x128xf32>,
    return
  }
  func.func @transform_0(%arg0: i32) -> (i32, i32) {
    %c0_i32 = arith.constant 0 : i32
    %c0_i32_0 = arith.constant 0 : i32
    return %c0_i32, %arg0 : i32, i32
  }
  func.func @transform_1(%arg0: i32) -> (i32, i32, i32) {
    %c0_i32 = arith.constant 0 : i32
    %c0_i32_0 = arith.constant 0 : i32
    %c0_i32_1 = arith.constant 0 : i32
    %c0_i32_2 = arith.constant 0 : i32
    return %c0_i32, %c0_i32_0, %c0_i32_1 : i32, i32, i32
  }
  func.func @transform_2(%arg0: i32) -> (i32, i32) {
    %c0_i32 = arith.constant 0 : i32
    %c0_i32_0 = arith.constant 0 : i32
    %c0_i32_1 = arith.constant 0 : i32
    return %c0_i32, %c0_i32_0 : i32, i32
  }
  func.func @transform_3(%arg0: i32) -> (i32, i32, i32) {
    %c0_i32 = arith.constant 0 : i32
    %c0_i32_0 = arith.constant 0 : i32
    %c0_i32_1 = arith.constant 0 : i32
    return %c0_i32, %c0_i32_0, %arg0 : i32, i32, i32
  }
}

module attributes {stable_mosaic.version = 11 : i64} {
  func.func @_convt4x4_kernel(%arg0: i32, %arg1: memref<16x512xf32, #tpu.memory_space<vmem>>, %arg2: memref<16x8x16xf32, #tpu.memory_space<vmem>>, %arg3: memref<8x1xf32, #tpu.memory_space<vmem>>, %arg4: memref<4x8x384xf32, #tpu.memory_space<vmem>>) attributes {dimension_semantics = [#tpu.dimension_semantics<parallel>], iteration_bounds = array<i64: 2>, scalar_prefetch = 0 : i64, scratch_operands = 0 : i64, tpu.core_type = #tpu.core_type<tc>, window_params = [{transform_indices = @transform_0, window_bounds = array<i64: 16, 512>}, {pipeline_mode = #tpu.pipeline_mode<synchronous>, transform_indices = @transform_1, window_bounds = array<i64: 16, 8, 16>}, {pipeline_mode = #tpu.pipeline_mode<synchronous>, transform_indices = @transform_2, window_bounds = array<i64: 8, 1>}, {transform_indices = @transform_3, window_bounds = array<i64: 4, 8, 384>}]} {
    %c0 = arith.constant 0 : index
    %c0_0 = arith.constant 0 : index
    %0 = vector.load %arg1[%c0, %c0_0] : memref<16x512xf32, #tpu.memory_space<vmem>>, vector<16x512xf32>
    %c0_1 = arith.constant 0 : index
    %c0_2 = arith.constant 0 : index
    %c0_3 = arith.constant 0 : index
    %1 = vector.load %arg2[%c0_1, %c0_2, %c0_3] : memref<16x8x16xf32, #tpu.memory_space<vmem>>, vector<1x8x16xf32>
    %2 = vector.shape_cast %1 : vector<1x8x16xf32> to vector<8x16xf32>
    %3 = vector.extract_strided_slice %0 {offsets = [0, 0], sizes = [16, 384], strides = [1, 1]} : vector<16x512xf32> to vector<16x384xf32>
    %cst = arith.constant dense<0.000000e+00> : vector<8x384xf32>
    %4 = tpu.matmul %2, %3, %cst {dimension_numbers = #tpu.dot_dimension_numbers<[1], [0], [0], [1], [0, 0, 1, 1], [], []>} : vector<8x16xf32>, vector<16x384xf32>, vector<8x384xf32> -> vector<8x384xf32>
    %c1 = arith.constant 1 : index
    %c0_4 = arith.constant 0 : index
    %c0_5 = arith.constant 0 : index
    %5 = vector.load %arg2[%c1, %c0_4, %c0_5] : memref<16x8x16xf32, #tpu.memory_space<vmem>>, vector<1x8x16xf32>
    %6 = vector.shape_cast %5 : vector<1x8x16xf32> to vector<8x16xf32>
    %7 = vector.extract_strided_slice %0 {offsets = [0, 1], sizes = [16, 384], strides = [1, 1]} : vector<16x512xf32> to vector<16x384xf32>
    %cst_6 = arith.constant dense<0.000000e+00> : vector<8x384xf32>
    %8 = tpu.matmul %6, %7, %cst_6 {dimension_numbers = #tpu.dot_dimension_numbers<[1], [0], [0], [1], [0, 0, 1, 1], [], []>} : vector<8x16xf32>, vector<16x384xf32>, vector<8x384xf32> -> vector<8x384xf32>
    %9 = arith.addf %4, %8 : vector<8x384xf32>
    %c2 = arith.constant 2 : index
    %c0_7 = arith.constant 0 : index
    %c0_8 = arith.constant 0 : index
    %10 = vector.load %arg2[%c2, %c0_7, %c0_8] : memref<16x8x16xf32, #tpu.memory_space<vmem>>, vector<1x8x16xf32>
    %11 = vector.shape_cast %10 : vector<1x8x16xf32> to vector<8x16xf32>
    %12 = vector.extract_strided_slice %0 {offsets = [0, 18], sizes = [16, 384], strides = [1, 1]} : vector<16x512xf32> to vector<16x384xf32>
    %cst_9 = arith.constant dense<0.000000e+00> : vector<8x384xf32>
    %13 = tpu.matmul %11, %12, %cst_9 {dimension_numbers = #tpu.dot_dimension_numbers<[1], [0], [0], [1], [0, 0, 1, 1], [], []>} : vector<8x16xf32>, vector<16x384xf32>, vector<8x384xf32> -> vector<8x384xf32>
    %14 = arith.addf %9, %13 : vector<8x384xf32>
    %c3 = arith.constant 3 : index
    %c0_10 = arith.constant 0 : index
    %c0_11 = arith.constant 0 : index
    %15 = vector.load %arg2[%c3, %c0_10, %c0_11] : memref<16x8x16xf32, #tpu.memory_space<vmem>>, vector<1x8x16xf32>
    %16 = vector.shape_cast %15 : vector<1x8x16xf32> to vector<8x16xf32>
    %17 = vector.extract_strided_slice %0 {offsets = [0, 19], sizes = [16, 384], strides = [1, 1]} : vector<16x512xf32> to vector<16x384xf32>
    %cst_12 = arith.constant dense<0.000000e+00> : vector<8x384xf32>
    %18 = tpu.matmul %16, %17, %cst_12 {dimension_numbers = #tpu.dot_dimension_numbers<[1], [0], [0], [1], [0, 0, 1, 1], [], []>} : vector<8x16xf32>, vector<16x384xf32>, vector<8x384xf32> -> vector<8x384xf32>
    %19 = arith.addf %14, %18 : vector<8x384xf32>
    %c0_13 = arith.constant 0 : index
    %c0_14 = arith.constant 0 : index
    %20 = vector.load %arg3[%c0_13, %c0_14] : memref<8x1xf32, #tpu.memory_space<vmem>>, vector<8x1xf32>
    %21 = vector.broadcast %20 : vector<8x1xf32> to vector<8x384xf32>
    %22 = arith.addf %19, %21 : vector<8x384xf32>
    %c0_15 = arith.constant 0 : index
    %c0_16 = arith.constant 0 : index
    %c0_17 = arith.constant 0 : index
    %23 = vector.load %arg4[%c0_15, %c0_16, %c0_17] : memref<4x8x384xf32, #tpu.memory_space<vmem>>, vector<1x8x384xf32>
    %24 = vector.shape_cast %23 : vector<1x8x384xf32> to vector<8x384xf32>
    %25 = vector.shape_cast %22 : vector<8x384xf32> to vector<1x8x384xf32>
    tpu.vector_store %arg4[%c0_15, %c0_16, %c0_17], %25 {strides = array<i32>} : memref<4x8x384xf32, #tpu.memory_space<vmem>>, vector<1x8x384xf32>,
    %c4 = arith.constant 4 : index
    %c0_18 = arith.constant 0 : index
    %c0_19 = arith.constant 0 : index
    %26 = vector.load %arg2[%c4, %c0_18, %c0_19] : memref<16x8x16xf32, #tpu.memory_space<vmem>>, vector<1x8x16xf32>
    %27 = vector.shape_cast %26 : vector<1x8x16xf32> to vector<8x16xf32>
    %28 = vector.extract_strided_slice %0 {offsets = [0, 1], sizes = [16, 384], strides = [1, 1]} : vector<16x512xf32> to vector<16x384xf32>
    %cst_20 = arith.constant dense<0.000000e+00> : vector<8x384xf32>
    %29 = tpu.matmul %27, %28, %cst_20 {dimension_numbers = #tpu.dot_dimension_numbers<[1], [0], [0], [1], [0, 0, 1, 1], [], []>} : vector<8x16xf32>, vector<16x384xf32>, vector<8x384xf32> -> vector<8x384xf32>
    %c5 = arith.constant 5 : index
    %c0_21 = arith.constant 0 : index
    %c0_22 = arith.constant 0 : index
    %30 = vector.load %arg2[%c5, %c0_21, %c0_22] : memref<16x8x16xf32, #tpu.memory_space<vmem>>, vector<1x8x16xf32>
    %31 = vector.shape_cast %30 : vector<1x8x16xf32> to vector<8x16xf32>
    %32 = vector.extract_strided_slice %0 {offsets = [0, 2], sizes = [16, 384], strides = [1, 1]} : vector<16x512xf32> to vector<16x384xf32>
    %cst_23 = arith.constant dense<0.000000e+00> : vector<8x384xf32>
    %33 = tpu.matmul %31, %32, %cst_23 {dimension_numbers = #tpu.dot_dimension_numbers<[1], [0], [0], [1], [0, 0, 1, 1], [], []>} : vector<8x16xf32>, vector<16x384xf32>, vector<8x384xf32> -> vector<8x384xf32>
    %34 = arith.addf %29, %33 : vector<8x384xf32>
    %c6 = arith.constant 6 : index
    %c0_24 = arith.constant 0 : index
    %c0_25 = arith.constant 0 : index
    %35 = vector.load %arg2[%c6, %c0_24, %c0_25] : memref<16x8x16xf32, #tpu.memory_space<vmem>>, vector<1x8x16xf32>
    %36 = vector.shape_cast %35 : vector<1x8x16xf32> to vector<8x16xf32>
    %37 = vector.extract_strided_slice %0 {offsets = [0, 19], sizes = [16, 384], strides = [1, 1]} : vector<16x512xf32> to vector<16x384xf32>
    %cst_26 = arith.constant dense<0.000000e+00> : vector<8x384xf32>
    %38 = tpu.matmul %36, %37, %cst_26 {dimension_numbers = #tpu.dot_dimension_numbers<[1], [0], [0], [1], [0, 0, 1, 1], [], []>} : vector<8x16xf32>, vector<16x384xf32>, vector<8x384xf32> -> vector<8x384xf32>
    %39 = arith.addf %34, %38 : vector<8x384xf32>
    %c7 = arith.constant 7 : index
    %c0_27 = arith.constant 0 : index
    %c0_28 = arith.constant 0 : index
    %40 = vector.load %arg2[%c7, %c0_27, %c0_28] : memref<16x8x16xf32, #tpu.memory_space<vmem>>, vector<1x8x16xf32>
    %41 = vector.shape_cast %40 : vector<1x8x16xf32> to vector<8x16xf32>
    %42 = vector.extract_strided_slice %0 {offsets = [0, 20], sizes = [16, 384], strides = [1, 1]} : vector<16x512xf32> to vector<16x384xf32>
    %cst_29 = arith.constant dense<0.000000e+00> : vector<8x384xf32>
    %43 = tpu.matmul %41, %42, %cst_29 {dimension_numbers = #tpu.dot_dimension_numbers<[1], [0], [0], [1], [0, 0, 1, 1], [], []>} : vector<8x16xf32>, vector<16x384xf32>, vector<8x384xf32> -> vector<8x384xf32>
    %44 = arith.addf %39, %43 : vector<8x384xf32>
    %c0_30 = arith.constant 0 : index
    %c0_31 = arith.constant 0 : index
    %45 = vector.load %arg3[%c0_30, %c0_31] : memref<8x1xf32, #tpu.memory_space<vmem>>, vector<8x1xf32>
    %46 = vector.broadcast %45 : vector<8x1xf32> to vector<8x384xf32>
    %47 = arith.addf %44, %46 : vector<8x384xf32>
    %c1_32 = arith.constant 1 : index
    %c0_33 = arith.constant 0 : index
    %c0_34 = arith.constant 0 : index
    %48 = vector.load %arg4[%c1_32, %c0_33, %c0_34] : memref<4x8x384xf32, #tpu.memory_space<vmem>>, vector<1x8x384xf32>
    %49 = vector.shape_cast %48 : vector<1x8x384xf32> to vector<8x384xf32>
    %50 = vector.shape_cast %47 : vector<8x384xf32> to vector<1x8x384xf32>
    tpu.vector_store %arg4[%c1_32, %c0_33, %c0_34], %50 {strides = array<i32>} : memref<4x8x384xf32, #tpu.memory_space<vmem>>, vector<1x8x384xf32>,
    %c8 = arith.constant 8 : index
    %c0_35 = arith.constant 0 : index
    %c0_36 = arith.constant 0 : index
    %51 = vector.load %arg2[%c8, %c0_35, %c0_36] : memref<16x8x16xf32, #tpu.memory_space<vmem>>, vector<1x8x16xf32>
    %52 = vector.shape_cast %51 : vector<1x8x16xf32> to vector<8x16xf32>
    %53 = vector.extract_strided_slice %0 {offsets = [0, 18], sizes = [16, 384], strides = [1, 1]} : vector<16x512xf32> to vector<16x384xf32>
    %cst_37 = arith.constant dense<0.000000e+00> : vector<8x384xf32>
    %54 = tpu.matmul %52, %53, %cst_37 {dimension_numbers = #tpu.dot_dimension_numbers<[1], [0], [0], [1], [0, 0, 1, 1], [], []>} : vector<8x16xf32>, vector<16x384xf32>, vector<8x384xf32> -> vector<8x384xf32>
    %c9 = arith.constant 9 : index
    %c0_38 = arith.constant 0 : index
    %c0_39 = arith.constant 0 : index
    %55 = vector.load %arg2[%c9, %c0_38, %c0_39] : memref<16x8x16xf32, #tpu.memory_space<vmem>>, vector<1x8x16xf32>
    %56 = vector.shape_cast %55 : vector<1x8x16xf32> to vector<8x16xf32>
    %57 = vector.extract_strided_slice %0 {offsets = [0, 19], sizes = [16, 384], strides = [1, 1]} : vector<16x512xf32> to vector<16x384xf32>
    %cst_40 = arith.constant dense<0.000000e+00> : vector<8x384xf32>
    %58 = tpu.matmul %56, %57, %cst_40 {dimension_numbers = #tpu.dot_dimension_numbers<[1], [0], [0], [1], [0, 0, 1, 1], [], []>} : vector<8x16xf32>, vector<16x384xf32>, vector<8x384xf32> -> vector<8x384xf32>
    %59 = arith.addf %54, %58 : vector<8x384xf32>
    %c10 = arith.constant 10 : index
    %c0_41 = arith.constant 0 : index
    %c0_42 = arith.constant 0 : index
    %60 = vector.load %arg2[%c10, %c0_41, %c0_42] : memref<16x8x16xf32, #tpu.memory_space<vmem>>, vector<1x8x16xf32>
    %61 = vector.shape_cast %60 : vector<1x8x16xf32> to vector<8x16xf32>
    %62 = vector.extract_strided_slice %0 {offsets = [0, 36], sizes = [16, 384], strides = [1, 1]} : vector<16x512xf32> to vector<16x384xf32>
    %cst_43 = arith.constant dense<0.000000e+00> : vector<8x384xf32>
    %63 = tpu.matmul %61, %62, %cst_43 {dimension_numbers = #tpu.dot_dimension_numbers<[1], [0], [0], [1], [0, 0, 1, 1], [], []>} : vector<8x16xf32>, vector<16x384xf32>, vector<8x384xf32> -> vector<8x384xf32>
    %64 = arith.addf %59, %63 : vector<8x384xf32>
    %c11 = arith.constant 11 : index
    %c0_44 = arith.constant 0 : index
    %c0_45 = arith.constant 0 : index
    %65 = vector.load %arg2[%c11, %c0_44, %c0_45] : memref<16x8x16xf32, #tpu.memory_space<vmem>>, vector<1x8x16xf32>
    %66 = vector.shape_cast %65 : vector<1x8x16xf32> to vector<8x16xf32>
    %67 = vector.extract_strided_slice %0 {offsets = [0, 37], sizes = [16, 384], strides = [1, 1]} : vector<16x512xf32> to vector<16x384xf32>
    %cst_46 = arith.constant dense<0.000000e+00> : vector<8x384xf32>
    %68 = tpu.matmul %66, %67, %cst_46 {dimension_numbers = #tpu.dot_dimension_numbers<[1], [0], [0], [1], [0, 0, 1, 1], [], []>} : vector<8x16xf32>, vector<16x384xf32>, vector<8x384xf32> -> vector<8x384xf32>
    %69 = arith.addf %64, %68 : vector<8x384xf32>
    %c0_47 = arith.constant 0 : index
    %c0_48 = arith.constant 0 : index
    %70 = vector.load %arg3[%c0_47, %c0_48] : memref<8x1xf32, #tpu.memory_space<vmem>>, vector<8x1xf32>
    %71 = vector.broadcast %70 : vector<8x1xf32> to vector<8x384xf32>
    %72 = arith.addf %69, %71 : vector<8x384xf32>
    %c2_49 = arith.constant 2 : index
    %c0_50 = arith.constant 0 : index
    %c0_51 = arith.constant 0 : index
    %73 = vector.load %arg4[%c2_49, %c0_50, %c0_51] : memref<4x8x384xf32, #tpu.memory_space<vmem>>, vector<1x8x384xf32>
    %74 = vector.shape_cast %73 : vector<1x8x384xf32> to vector<8x384xf32>
    %75 = vector.shape_cast %72 : vector<8x384xf32> to vector<1x8x384xf32>
    tpu.vector_store %arg4[%c2_49, %c0_50, %c0_51], %75 {strides = array<i32>} : memref<4x8x384xf32, #tpu.memory_space<vmem>>, vector<1x8x384xf32>,
    %c12 = arith.constant 12 : index
    %c0_52 = arith.constant 0 : index
    %c0_53 = arith.constant 0 : index
    %76 = vector.load %arg2[%c12, %c0_52, %c0_53] : memref<16x8x16xf32, #tpu.memory_space<vmem>>, vector<1x8x16xf32>
    %77 = vector.shape_cast %76 : vector<1x8x16xf32> to vector<8x16xf32>
    %78 = vector.extract_strided_slice %0 {offsets = [0, 19], sizes = [16, 384], strides = [1, 1]} : vector<16x512xf32> to vector<16x384xf32>
    %cst_54 = arith.constant dense<0.000000e+00> : vector<8x384xf32>
    %79 = tpu.matmul %77, %78, %cst_54 {dimension_numbers = #tpu.dot_dimension_numbers<[1], [0], [0], [1], [0, 0, 1, 1], [], []>} : vector<8x16xf32>, vector<16x384xf32>, vector<8x384xf32> -> vector<8x384xf32>
    %c13 = arith.constant 13 : index
    %c0_55 = arith.constant 0 : index
    %c0_56 = arith.constant 0 : index
    %80 = vector.load %arg2[%c13, %c0_55, %c0_56] : memref<16x8x16xf32, #tpu.memory_space<vmem>>, vector<1x8x16xf32>
    %81 = vector.shape_cast %80 : vector<1x8x16xf32> to vector<8x16xf32>
    %82 = vector.extract_strided_slice %0 {offsets = [0, 20], sizes = [16, 384], strides = [1, 1]} : vector<16x512xf32> to vector<16x384xf32>
    %cst_57 = arith.constant dense<0.000000e+00> : vector<8x384xf32>
    %83 = tpu.matmul %81, %82, %cst_57 {dimension_numbers = #tpu.dot_dimension_numbers<[1], [0], [0], [1], [0, 0, 1, 1], [], []>} : vector<8x16xf32>, vector<16x384xf32>, vector<8x384xf32> -> vector<8x384xf32>
    %84 = arith.addf %79, %83 : vector<8x384xf32>
    %c14 = arith.constant 14 : index
    %c0_58 = arith.constant 0 : index
    %c0_59 = arith.constant 0 : index
    %85 = vector.load %arg2[%c14, %c0_58, %c0_59] : memref<16x8x16xf32, #tpu.memory_space<vmem>>, vector<1x8x16xf32>
    %86 = vector.shape_cast %85 : vector<1x8x16xf32> to vector<8x16xf32>
    %87 = vector.extract_strided_slice %0 {offsets = [0, 37], sizes = [16, 384], strides = [1, 1]} : vector<16x512xf32> to vector<16x384xf32>
    %cst_60 = arith.constant dense<0.000000e+00> : vector<8x384xf32>
    %88 = tpu.matmul %86, %87, %cst_60 {dimension_numbers = #tpu.dot_dimension_numbers<[1], [0], [0], [1], [0, 0, 1, 1], [], []>} : vector<8x16xf32>, vector<16x384xf32>, vector<8x384xf32> -> vector<8x384xf32>
    %89 = arith.addf %84, %88 : vector<8x384xf32>
    %c15 = arith.constant 15 : index
    %c0_61 = arith.constant 0 : index
    %c0_62 = arith.constant 0 : index
    %90 = vector.load %arg2[%c15, %c0_61, %c0_62] : memref<16x8x16xf32, #tpu.memory_space<vmem>>, vector<1x8x16xf32>
    %91 = vector.shape_cast %90 : vector<1x8x16xf32> to vector<8x16xf32>
    %92 = vector.extract_strided_slice %0 {offsets = [0, 38], sizes = [16, 384], strides = [1, 1]} : vector<16x512xf32> to vector<16x384xf32>
    %cst_63 = arith.constant dense<0.000000e+00> : vector<8x384xf32>
    %93 = tpu.matmul %91, %92, %cst_63 {dimension_numbers = #tpu.dot_dimension_numbers<[1], [0], [0], [1], [0, 0, 1, 1], [], []>} : vector<8x16xf32>, vector<16x384xf32>, vector<8x384xf32> -> vector<8x384xf32>
    %94 = arith.addf %89, %93 : vector<8x384xf32>
    %c0_64 = arith.constant 0 : index
    %c0_65 = arith.constant 0 : index
    %95 = vector.load %arg3[%c0_64, %c0_65] : memref<8x1xf32, #tpu.memory_space<vmem>>, vector<8x1xf32>
    %96 = vector.broadcast %95 : vector<8x1xf32> to vector<8x384xf32>
    %97 = arith.addf %94, %96 : vector<8x384xf32>
    %c3_66 = arith.constant 3 : index
    %c0_67 = arith.constant 0 : index
    %c0_68 = arith.constant 0 : index
    %98 = vector.load %arg4[%c3_66, %c0_67, %c0_68] : memref<4x8x384xf32, #tpu.memory_space<vmem>>, vector<1x8x384xf32>
    %99 = vector.shape_cast %98 : vector<1x8x384xf32> to vector<8x384xf32>
    %100 = vector.shape_cast %97 : vector<8x384xf32> to vector<1x8x384xf32>
    tpu.vector_store %arg4[%c3_66, %c0_67, %c0_68], %100 {strides = array<i32>} : memref<4x8x384xf32, #tpu.memory_space<vmem>>, vector<1x8x384xf32>,
    return
  }
  func.func @transform_0(%arg0: i32) -> (i32, i32) {
    %c0_i32 = arith.constant 0 : i32
    %c0_i32_0 = arith.constant 0 : i32
    return %c0_i32, %arg0 : i32, i32
  }
  func.func @transform_1(%arg0: i32) -> (i32, i32, i32) {
    %c0_i32 = arith.constant 0 : i32
    %c0_i32_0 = arith.constant 0 : i32
    %c0_i32_1 = arith.constant 0 : i32
    %c0_i32_2 = arith.constant 0 : i32
    return %c0_i32, %c0_i32_0, %c0_i32_1 : i32, i32, i32
  }
  func.func @transform_2(%arg0: i32) -> (i32, i32) {
    %c0_i32 = arith.constant 0 : i32
    %c0_i32_0 = arith.constant 0 : i32
    %c0_i32_1 = arith.constant 0 : i32
    return %c0_i32, %c0_i32_0 : i32, i32
  }
  func.func @transform_3(%arg0: i32) -> (i32, i32, i32) {
    %c0_i32 = arith.constant 0 : i32
    %c0_i32_0 = arith.constant 0 : i32
    %c0_i32_1 = arith.constant 0 : i32
    return %c0_i32, %c0_i32_0, %arg0 : i32, i32, i32
  }
}

</mosaic_0001>

<bundles_post_ra>
// kernel: decoder_forward.5
= control target key start
LH: loop header
LB: loop body
LE: loop exit
PB: predicated region body
PF: predicated region fallthrough
CT: control target
= control target key end

     0   :  { %s1017_s12 = smov 0   ;;  %s1019_s13 = smov 0   ;;  %s1233_s0 = inlined_call_operand.vmem [shape: f32[8,512], index: 0, kind: input, shape index: {}]   ;;  %s1234_s1 = inlined_call_operand.vmem [shape: f32[9,32,8], index: 1, kind: input, shape index: {}]   ;;  %s1235_s2 = inlined_call_operand.vmem [shape: f32[32,1], index: 2, kind: input, shape index: {}]   ;;  %s1236_s3 = inlined_call_operand.vmem [shape: f32[32,256], index: 3, kind: output, shape index: {}]  }
   0x1   :  { %s1021_s14 = smov 0  }
   0x2 LB: > { %s1030_s15 = sadd.s32 4294967295, %s986_s14   ;;  %s1032_s16 = sadd.s32 1, %s986_s14   ;;  %s986_s14 = sphi %s1021_s14, %s1240_s14   ;;  %s982_s13 = sphi %s1019_s13, %s1239_s13   ;;  %s978_s12 = sphi %s1017_s12, %s1238_s12  }
   0x3   : > { %s85_s17 = ssub.s32 %s986_s14, %s1032_s16  ;;  %s88_s18 = sadd.s32 1, %s982_s13 }
   0x4   : > { %p86_p0 = scmp.eq.s32.totalorder %s85_s17, 0  ;;  %p98_p1 = scmp.ne.s32.totalorder %s982_s13, %s978_s12 }
   0x5   : > { %p99_p2 = scmp.eq.s32.totalorder %s1030_s15, 1  ;;  %p809_p3 = scmp.ge.s32.totalorder %s986_s14, 1 }
   0x6   : > { %s1040_s19 = scalar_select %p86_p0, %s982_s13, %s88_s18  }
   0x7   : > { %p1042_p4 = por %p99_p2, %p98_p1  ;;  %p138_p5 = scmp.lt.s32.totalorder %s986_s14, 3 }
   0x9   : > { %p139_p6 = pnand %p809_p3, %p138_p5 }
   0xa   : > { %s811_s21 = sshll.u32 (!%p139_p6), %s1030_s15, 1  ;;  %s988_s26 = smov (!%p139_p6), 127  }
   0xb   : > { %142 = sbr.rel (%p139_p6) target bundleno = 356 (0x164), region = 32  ;;  %p162_p7 = scmp.lt.s32.totalorder (!%p139_p6), %s811_s21, 3 }
   0xc   : > { %s989_s27 = smov (!%p139_p6), 118   ;;  %s990_s28 = smov (!%p139_p6), 108  }
   0xd   : > { %s991_s29 = smov (!%p139_p6), 126   ;;  %s992_s30 = smov (!%p139_p6), 117  }
   0xe   : > { %s993_s4 = smov (!%p139_p6), 107   ;;  %s994_s5 = smov (!%p139_p6), 116  }
   0xf   : > { %s995_s6 = smov (!%p139_p6), 106  }
  0x10   : > { %s1242_s21 = smov (!%p162_p7, %s811_s21), 3  ;;  %vm184_vm0 = vcmask 1039360   ;;  %vm336_vm1 = vcmask 965632   ;;  %v814_v14 = vld [vmem:[%s1234_s1 + $0x28] sm:$0xff]  ;;  %vm187_vm2 = vcmask 64512   ;;  %v815_v15 = vld [vmem:[%s1234_s1 + $0x30] sm:$0xff] }
  0x11   : > { %s812_s22 = sshll.u32 %s1242_s21, 3  ;;  %vm564_vm3 = vcmask 875520   ;;  %v816_v16 = vld [vmem:[%s1234_s1 + $0x38] sm:$0xff]  ;;  %v813_v18 = vld [vmem:[%s1234_s1 + $0x20] sm:$0xff]  ;;  %vm507_vm4 = vcmask 883712   ;;  %vm279_vm5 = vcmask 1031168  }
  0x12   : > { %s165_s25 = scalar_lea.vmem %s1233_s0, %s812_s22  ;;  %vm393_vm6 = vcmask 957440   ;;  %v169_v30 = vld [vmem:[%s1234_s1] sm:$0xff]  ;;  %vm450_vm7 = vcmask 949248   ;;  %vm621_vm8 = vcmask 867328   ;;  %v170_v41 = vld [vmem:[%s1234_s1 + $0x8] sm:$0xff]  ;;  %v171_v47 = vld [vmem:[%s1234_s1 + $0x10] sm:$0xff] }
  0x13   : > { %v167_v0 = vld [vmem:[%s165_s25] sm:$0xff]  ;;  %v168_v1 = vld [vmem:[%s165_s25 + $0x8] sm:$0xff]  ;;  %v827_v48 = vld [vmem:[%s1234_s1 + $0x50] sm:$0xff]  ;;  %v996_v56 = vmov 0  }
  0x14   : > { %v921_v2 = vpack.i.bf16 %v168_v1, %v167_v0  ;;  %v825_v31 = vld [vmem:[%s1234_s1 + $0x40] sm:$0xff]  ;;  %v826_v42 = vld [vmem:[%s1234_s1 + $0x48] sm:$0xff]  ;;  %v835_v49 = vld [vmem:[%s1234_s1 + $0x70] sm:$0xff]  ;;  %962 = vset.pattern.permute.xlu0 %v996_v56  ;;  %963 = vset.pattern.permute.xlu1 %v996_v56 }
  0x15   : > { %v833_v33 = vld [vmem:[%s1234_s1 + $0x60] sm:$0xff]  ;;  %v834_v45 = vld [vmem:[%s1234_s1 + $0x68] sm:$0xff]  ;;  %v843_v50 = vld [vmem:[%s1234_s1 + $0x90] sm:$0xff]  ;;  %961 = vset.pattern.permute.xlu2 %v996_v56 }
  0x16   : > { %922 = vrot.lane.b32.xlu0 %v921_v2, %s988_s26  ;;  %932 = vrot.lane.b32.xlu1 %v921_v2, %s989_s27  ;;  %v841_v34 = vld [vmem:[%s1234_s1 + $0x80] sm:$0xff]  ;;  %v842_v46 = vld [vmem:[%s1234_s1 + $0x88] sm:$0xff] }
  0x17   : > { %942 = vrot.lane.b32.xlu2 %v921_v2, %s990_s28  ;;  %v172_v51 = vld [vmem:[%s1234_s1 + $0x18] sm:$0xff]  ;;  %v670_v55 = vld [vmem:[%s1235_s2 + $0x8] sm:$0xff]  ;;  %v671_v57 = vld [vmem:[%s1235_s2 + $0x10] sm:$0xff] }
  0x18   : > { %v828_v52 = vld [vmem:[%s1234_s1 + $0x58] sm:$0xff]  ;;  %v669_v58 = vld [vmem:[%s1235_s2] sm:$0xff]  ;;  %v858_v1 = vld [vmem:[%s1234_s1 + $0xc8] sm:$0xff] }
  0x19   : > { %v836_v53 = vld [vmem:[%s1234_s1 + $0x78] sm:$0xff]  ;;  %v849_v59 = vld [vmem:[%s1234_s1 + $0xa0] sm:$0xff] }
  0x1a   : > { %v844_v54 = vld [vmem:[%s1234_s1 + $0x98] sm:$0xff]  ;;  %v857_v60 = vld [vmem:[%s1234_s1 + $0xc0] sm:$0xff] }
  0x1b   : > { %v865_v61 = vld [vmem:[%s1234_s1 + $0xe0] sm:$0xff]  ;;  %v672_v63 = vld [vmem:[%s1235_s2 + $0x18] sm:$0xff] }
  0x1c   : > { %v873_v62 = vld [vmem:[%s1234_s1 + $0x100] sm:$0xff] }
  0x1e   : > { %927 = vrot.lane.b32.xlu0 %v921_v2, %s991_s29  ;;  %937 = vrot.lane.b32.xlu1 %v921_v2, %s992_s30  ;;  %s158_s30 = sand.u32 1, %s978_s12   ;;  %s882_s12 = sshll.u32 (%p1042_p4), %s1030_s15, 3 }
  0x1f   : > { %947 = vrot.lane.b32.xlu2 %v921_v2, %s993_s4  ;;  %s810_s4 = sshll.u32 %s158_s30, 5  ;;  %s709_s8 = scalar_lea.vmem (%p1042_p4), %s1236_s3, %s882_s12 }
  0x26   : > { %952 = vrot.lane.b32.xlu0 %v921_v2, %s994_s5  ;;  %957 = vrot.lane.b32.xlu1 %v921_v2, %s995_s6  ;;  %v866_v2 = vld [vmem:[%s1234_s1 + $0xe8] sm:$0xff]  ;;  %s1207_s5 = scalar_lea.vmem [#allocation2], %s810_s4 }
  0x27   : > { %675 = vperm.xlu2 %961, %v669_v58  }
  0x2e   : > { %680 = vperm.xlu0 %962, %v670_v55   ;;  %685 = vperm.xlu1 %963, %v671_v57  }
  0x2f   : > { %690 = vperm.xlu2 %961, %v672_v63  }
  0x71   : > { %v943_v3 = vpop.permute.xlu2 %942 }
  0x72   : > { %v945_v19 = vunpack.i.h.bf16 %v943_v3  ;;  %v944_v20 = vunpack.i.l.bf16 %v943_v3  ;;  %v874_v3 = vld [vmem:[%s1234_s1 + $0x108] sm:$0xff] }
  0x74   : > { %v508_v28 = vsel %vm507_vm4, %v944_v20, %v945_v19 }
  0x79   : > { %v948_v4 = vpop.permute.xlu2 %947 }
  0x7a   : > { %v950_v11 = vunpack.i.h.bf16 %v948_v4  ;;  %v949_v12 = vunpack.i.l.bf16 %v948_v4  ;;  %v851_v4 = vld [vmem:[%s1234_s1 + $0xb0] sm:$0xff] }
  0x7c   : > { %v565_v21 = vsel %vm564_vm3, %v949_v12, %v950_v11  ;;  %v876_v11 = vld [vmem:[%s1234_s1 + $0x118] sm:$0xff] }
  0x88   : > { %v923_v5 = vpop.permute.xlu0 %922  ;;  %v933_v6 = vpop.permute.xlu1 %932 }
  0x89   : > { %v925_v7 = vunpack.i.h.bf16 %v923_v5  ;;  %v924_v8 = vunpack.i.l.bf16 %v923_v5  ;;  %v935_v9 = vunpack.i.h.bf16 %v933_v6  ;;  %v934_v10 = vunpack.i.l.bf16 %v933_v6  ;;  %v859_v5 = vld [vmem:[%s1234_s1 + $0xd0] sm:$0xff] }
  0x8a   : > { %v867_v6 = vld [vmem:[%s1234_s1 + $0xf0] sm:$0xff] }
  0x8b   : > { %v185_v13 = vsel %vm184_vm0, %v924_v8, %v925_v7  ;;  %v337_v17 = vsel %vm336_vm1, %v934_v10, %v935_v9  ;;  %v875_v7 = vld [vmem:[%s1234_s1 + $0x110] sm:$0xff]  ;;  %v852_v8 = vld [vmem:[%s1234_s1 + $0xb8] sm:$0xff] }
  0x8c   : > { %215 = vmatpush.msra.mxu0 %v185_v13  ;;  %885 = vmatpush.msra.mxu1 %v185_v13  ;;  %v860_v9 = vld [vmem:[%s1234_s1 + $0xd8] sm:$0xff] }
  0x8d   : > { %886 = vmatpush.msra.mxu2 %v185_v13  ;;  %887 = vmatpush.msra.mxu3 %v185_v13  ;;  %v868_v10 = vld [vmem:[%s1234_s1 + $0xf8] sm:$0xff] }
  0x8e   : > { %818 = vmatmul.msk.f32.vlgmr.msra.gmra.mxu1 %vm187_vm2, %v814_v14  ;;  %819 = vmatmul.msk.f32.vlgmr.msra.gmra.mxu2 %vm187_vm2, %v815_v15 }
  0x8f   : > { %820 = vmatmul.msk.f32.vlgmr.msra.gmra.mxu3 %vm187_vm2, %v816_v16  ;;  %256 = vmatpush.msrb.mxu1 %v167_v0  ;;  %v850_v0 = vld [vmem:[%s1234_s1 + $0xa8] sm:$0xff] }
  0x90   : > { %v928_v22 = vpop.permute.xlu0 %927  ;;  %366 = vmatpush.msrb.mxu3 %v337_v17  ;;  %817 = vmatmul.msk.f32.vlgmr.msra.gmra.mxu0 %vm187_vm2, %v813_v18  ;;  %v938_v23 = vpop.permute.xlu1 %937 }
  0x91   : > { %v930_v24 = vunpack.i.h.bf16 %v928_v22  ;;  %v929_v25 = vunpack.i.l.bf16 %v928_v22  ;;  %v940_v26 = vunpack.i.h.bf16 %v938_v23  ;;  %v939_v27 = vunpack.i.l.bf16 %v938_v23 }
  0x92   : > { %594 = vmatpush.msra.mxu3 %v565_v21 }
  0x93   : > { %v280_v29 = vsel %vm279_vm5, %v929_v25, %v930_v24  ;;  %v394_v32 = vsel %vm393_vm6, %v939_v27, %v940_v26 }
  0x94   : > { %309 = vmatpush.msrb.mxu2 %v280_v29  ;;  %423 = vmatpush.msrb.mxu0 %v394_v32 }
  0x96   : > { %537 = vmatpush.msra.mxu2 %v508_v28  ;;  %821 = vmatmul.msk.f32.vlgmr.msrb.gmra.mxu1 %vm187_vm2, %v169_v30 }
  0x97   : > { %829 = vmatmul.msk.f32.vlgmr.msrb.gmra.mxu2 %vm187_vm2, %v825_v31  ;;  %837 = vmatmul.msk.f32.vlgmr.msrb.gmra.mxu3 %vm187_vm2, %v833_v33 }
  0x98   : > { %v953_v35 = vpop.permute.xlu0 %952  ;;  %845 = vmatmul.msk.f32.vlgmr.msrb.gmra.mxu0 %vm187_vm2, %v841_v34  ;;  %v958_v36 = vpop.permute.xlu1 %957 }
  0x99   : > { %v955_v37 = vunpack.i.h.bf16 %v953_v35  ;;  %v954_v38 = vunpack.i.l.bf16 %v953_v35  ;;  %v960_v39 = vunpack.i.h.bf16 %v958_v36  ;;  %v959_v40 = vunpack.i.l.bf16 %v958_v36 }
  0x9b   : > { %v451_v43 = vsel %vm450_vm7, %v954_v38, %v955_v37  ;;  %v622_v44 = vsel %vm621_vm8, %v959_v40, %v960_v39 }
  0x9c   : > { %480 = vmatpush.msra.mxu1 %v451_v43  ;;  %651 = vmatpush.msra.mxu0 %v622_v44 }
  0x9e   : > { %822 = vmatmul.msk.f32.gmra.mxu1 %vm187_vm2, %v170_v41 }
  0x9f   : > { %830 = vmatmul.msk.f32.gmra.mxu2 %vm187_vm2, %v826_v42  ;;  %838 = vmatmul.msk.f32.gmra.mxu3 %vm187_vm2, %v834_v45 }
  0xa0   : > { %846 = vmatmul.msk.f32.gmra.mxu0 %vm187_vm2, %v842_v46 }
  0xa6   : > { %823 = vmatmul.msk.f32.gmra.mxu1 %vm187_vm2, %v171_v47 }
  0xa7   : > { %831 = vmatmul.msk.f32.gmra.mxu2 %vm187_vm2, %v827_v48  ;;  %839 = vmatmul.msk.f32.gmra.mxu3 %vm187_vm2, %v835_v49  ;;  %v676_v48 = vpop.permute.xlu2 %675 }
  0xa8   : > { %847 = vmatmul.msk.f32.gmra.mxu0 %vm187_vm2, %v843_v50 }
  0xae   : > { %824 = vmatmul.msk.f32.gmra.mxu1 %vm187_vm2, %v172_v51 }
  0xaf   : > { %832 = vmatmul.msk.f32.gmra.mxu2 %vm187_vm2, %v828_v52  ;;  %840 = vmatmul.msk.f32.gmra.mxu3 %vm187_vm2, %v836_v53 }
  0xb0   : > { %848 = vmatmul.msk.f32.gmra.mxu0 %vm187_vm2, %v844_v54 }
  0xb6   : > { %853 = vmatmul.msk.f32.vlgmr.msra.gmra.mxu1 %vm187_vm2, %v849_v59 }
  0xb7   : > { %861 = vmatmul.msk.f32.vlgmr.msra.gmra.mxu2 %vm187_vm2, %v857_v60  ;;  %869 = vmatmul.msk.f32.vlgmr.msra.gmra.mxu3 %vm187_vm2, %v865_v61 }
  0xb8   : > { %877 = vmatmul.msk.f32.vlgmr.msra.gmra.mxu0 %vm187_vm2, %v873_v62  ;;  %v681_v62 = vpop.permute.xlu0 %680 }
  0xbe   : > { %854 = vmatmul.msk.f32.gmra.mxu1 %vm187_vm2, %v850_v0 }
  0xbf   : > { %862 = vmatmul.msk.f32.gmra.mxu2 %vm187_vm2, %v858_v1  ;;  %870 = vmatmul.msk.f32.gmra.mxu3 %vm187_vm2, %v866_v2 }
  0xc0   : > { %878 = vmatmul.msk.f32.gmra.mxu0 %vm187_vm2, %v874_v3 }
  0xc6   : > { %855 = vmatmul.msk.f32.gmra.mxu1 %vm187_vm2, %v851_v4 }
  0xc7   : > { %863 = vmatmul.msk.f32.gmra.mxu2 %vm187_vm2, %v859_v5  ;;  %871 = vmatmul.msk.f32.gmra.mxu3 %vm187_vm2, %v867_v6 }
  0xc8   : > { %879 = vmatmul.msk.f32.gmra.mxu0 %vm187_vm2, %v875_v7 }
  0xce   : > { %856 = vmatmul.msk.f32.gmra.mxu1 %vm187_vm2, %v852_v8 }
  0xcf   : > { %864 = vmatmul.msk.f32.gmra.mxu2 %vm187_vm2, %v860_v9  ;;  %872 = vmatmul.msk.f32.gmra.mxu3 %vm187_vm2, %v868_v10 }
  0xd0   : > { %880 = vmatmul.msk.f32.gmra.mxu0 %vm187_vm2, %v876_v11  ;;  %v686_v11 = vpop.permute.xlu1 %685 }
 0x10b   : > { %v220_v12 = vpop.f32.mrf.mxu1 }
 0x10d   : > { %v217_v13 = vpop.f32.mrf.mxu0 }
 0x111   : > { %v223_v14 = vpop.f32.mrf.mxu2 }
 0x112   : > { %v226_v15 = vpop.f32.mrf.mxu3 }
 0x113   : > { %v258_v16 = vpop.f32.mrf.mxu1 }
 0x114   : > { %v259_v29 = vadd.f32 %v258_v16, %v217_v13 }
 0x115   : > { %v425_v17 = vpop.f32.mrf.mxu0 }
 0x11a   : > { %v311_v18 = vpop.f32.mrf.mxu2  ;;  %v368_v19 = vpop.f32.mrf.mxu3 }
 0x11b   : > { %v261_v20 = vpop.f32.mrf.mxu1  ;;  %v323_v31 = vadd.f32 %v311_v18, %v259_v29 }
 0x11c   : > { %v262_v36 = vadd.f32 %v261_v20, %v220_v12 }
 0x11d   : > { %v428_v21 = vpop.f32.mrf.mxu0  ;;  %v380_v33 = vadd.f32 %v368_v19, %v323_v31 }
 0x11f   : > { %v437_v38 = vadd.f32 %v425_v17, %v380_v33 }
 0x122   : > { %v314_v22 = vpop.f32.mrf.mxu2  ;;  %v371_v23 = vpop.f32.mrf.mxu3 }
 0x123   : > { %v264_v24 = vpop.f32.mrf.mxu1  ;;  %v324_v39 = vadd.f32 %v314_v22, %v262_v36  ;;  %v691_v22 = vpop.permute.xlu2 %690 }
 0x124   : > { %v265_v46 = vadd.f32 %v264_v24, %v223_v14 }
 0x125   : > { %v431_v25 = vpop.f32.mrf.mxu0  ;;  %v381_v42 = vadd.f32 %v371_v23, %v324_v39 }
 0x127   : > { %v438_v49 = vadd.f32 %v428_v21, %v381_v42 }
 0x12a   : > { %v317_v26 = vpop.f32.mrf.mxu2  ;;  %v374_v27 = vpop.f32.mrf.mxu3 }
 0x12b   : > { %v267_v28 = vpop.f32.mrf.mxu1  ;;  %v325_v50 = vadd.f32 %v317_v26, %v265_v46 }
 0x12c   : > { %v268_v60 = vadd.f32 %v267_v28, %v226_v15 }
 0x12d   : > { %v434_v30 = vpop.f32.mrf.mxu0  ;;  %v382_v56 = vadd.f32 %v374_v27, %v325_v50 }
 0x12f   : > { %v439_v63 = vadd.f32 %v431_v25, %v382_v56 }
 0x132   : > { %v320_v32 = vpop.f32.mrf.mxu2  ;;  %v377_v34 = vpop.f32.mrf.mxu3 }
 0x133   : > { %v482_v35 = vpop.f32.mrf.mxu1  ;;  %v326_v0 = vadd.f32 %v320_v32, %v268_v60 }
 0x134   : > { %v494_v40 = vadd.f32 %v482_v35, %v437_v38 }
 0x135   : > { %v653_v37 = vpop.f32.mrf.mxu0  ;;  %v383_v6 = vadd.f32 %v377_v34, %v326_v0 }
 0x137   : > { %v440_v12 = vadd.f32 %v434_v30, %v383_v6 }
 0x13a   : > { %v539_v41 = vpop.f32.mrf.mxu2  ;;  %v596_v44 = vpop.f32.mrf.mxu3 }
 0x13b   : > { %v551_v43 = vadd.f32 %v539_v41, %v494_v40  ;;  %v485_v45 = vpop.f32.mrf.mxu1 }
 0x13c   : > { %v495_v53 = vadd.f32 %v485_v45, %v438_v49 }
 0x13d   : > { %v608_v47 = vadd.f32 %v596_v44, %v551_v43  ;;  %v656_v52 = vpop.f32.mrf.mxu0 }
 0x13f   : > { %v665_v51 = vadd.f32 %v653_v37, %v608_v47 }
 0x141   : > { %v693_v54 = vadd.f32 %v676_v48, %v665_v51 }
 0x142   : > { %v542_v55 = vpop.f32.mrf.mxu2  ;;  %v599_v58 = vpop.f32.mrf.mxu3 }
 0x143   : > { %697 = vst [vmem:[%s1207_s5] sm:$0xff] %v693_v54  ;;  %v552_v57 = vadd.f32 %v542_v55, %v495_v53  ;;  %v488_v59 = vpop.f32.mrf.mxu1 }
 0x144   : > { %v496_v2 = vadd.f32 %v488_v59, %v439_v63 }
 0x145   : > { %v609_v61 = vadd.f32 %v599_v58, %v552_v57  ;;  %v659_v5 = vpop.f32.mrf.mxu0 }
 0x147   : > { %v666_v1 = vadd.f32 %v656_v52, %v609_v61 }
 0x149   : > { %v694_v3 = vadd.f32 %v681_v62, %v666_v1 }
 0x14a   : > { %v545_v4 = vpop.f32.mrf.mxu2  ;;  %v602_v8 = vpop.f32.mrf.mxu3  ;;  %v744_v24 = vld [vmem:[%s1207_s5] sm:$0xff] (%p1042_p4) }
 0x14b   : > { %698 = vst [vmem:[%s1207_s5 + $0x8] sm:$0xff] %v694_v3  ;;  %v553_v7 = vadd.f32 %v545_v4, %v496_v2  ;;  %v491_v10 = vpop.f32.mrf.mxu1 }
 0x14c   : > { %v497_v14 = vadd.f32 %v491_v10, %v440_v12  ;;  %745 = vst [vmem:[%s709_s8] sm:$0xff] (%p1042_p4), %v744_v24 }
 0x14d   : > { %v610_v9 = vadd.f32 %v602_v8, %v553_v7  ;;  %v662_v19 = vpop.f32.mrf.mxu0 }
 0x14f   : > { %v667_v13 = vadd.f32 %v659_v5, %v610_v9 }
 0x151   : > { %v695_v15 = vadd.f32 %v686_v11, %v667_v13 }
 0x152   : > { %v548_v16 = vpop.f32.mrf.mxu2  ;;  %v605_v18 = vpop.f32.mrf.mxu3  ;;  %v746_v25 = vld [vmem:[%s1207_s5 + $0x8] sm:$0xff] (%p1042_p4) }
 0x153   : > { %699 = vst [vmem:[%s1207_s5 + $0x10] sm:$0xff] %v695_v15  ;;  %v554_v17 = vadd.f32 %v548_v16, %v497_v14 }
 0x154   : > { %747 = vst [vmem:[%s709_s8 + $0x10] sm:$0xff] (%p1042_p4), %v746_v25 }
 0x155   : > { %v611_v20 = vadd.f32 %v605_v18, %v554_v17 }
 0x157   : > { %v668_v21 = vadd.f32 %v662_v19, %v611_v20  ;;  %707 = sbr.rel (!%p1042_p4) target bundleno = 356 (0x164), region = 36 }
 0x159   : > { %v696_v23 = vadd.f32 %v691_v22, %v668_v21 }
 0x15a   : > { %v748_v26 = vld [vmem:[%s1207_s5 + $0x10] sm:$0xff] (%p1042_p4) }
 0x15b   : > { %700 = vst [vmem:[%s1207_s5 + $0x18] sm:$0xff] %v696_v23 }
 0x15c   : > { %749 = vst [vmem:[%s709_s8 + $0x20] sm:$0xff] %v748_v26 }
 0x162   : > { %v750_v27 = vld [vmem:[%s1207_s5 + $0x18] sm:$0xff] }
 0x163   : > { %751 = vst [vmem:[%s709_s8 + $0x30] sm:$0xff] %v750_v27 }
 0x164 PF: > { %p10_p8 = scmp.ge.s32.totalorder %s1032_s16, 4   ;;  %s1238_s12 = smov %s982_s13 }
 0x165   : > { %s1239_s13 = smov %s1040_s19  ;;  %s1240_s14 = smov %s1032_s16 }
 0x166   :  { %12 = sbr.rel (!%p10_p8) target bundleno = 2 (0x2), region = 108 }

// kernel: decoder_forward.7
= control target key start
LH: loop header
LB: loop body
LE: loop exit
PB: predicated region body
PF: predicated region fallthrough
CT: control target
= control target key end

     0   :  { %s1336_s18 = smov 0   ;;  %s1338_s19 = smov 0   ;;  %s1596_s0 = inlined_call_operand.vmem [shape: f32[32,512], index: 0, kind: input, shape index: {}]   ;;  %s1597_s1 = inlined_call_operand.vmem [shape: f32[9,16,32], index: 1, kind: input, shape index: {}]   ;;  %s1598_s2 = inlined_call_operand.vmem [shape: f32[16,1], index: 2, kind: input, shape index: {}]   ;;  %s1599_s3 = inlined_call_operand.vmem [shape: f32[32,16], index: 3, kind: input, shape index: {}]   ;;  %s1600_s4 = inlined_call_operand.vmem [shape: f32[32,1], index: 4, kind: input, shape index: {}]   ;;  %s1601_s5 = inlined_call_operand.vmem [shape: f32[32,256], index: 5, kind: output, shape index: {}]  }
   0x1   :  { %s1340_s20 = smov 0  }
   0x2 LB: > { %s1020_s21 = sadd.s32 4294967295, %s1295_s20   ;;  %s1353_s22 = sadd.s32 1, %s1295_s20   ;;  %s1295_s20 = sphi %s1340_s20, %s1605_s20   ;;  %s1291_s19 = sphi %s1338_s19, %s1604_s19   ;;  %s1287_s18 = sphi %s1336_s18, %s1603_s18  }
   0x3   : > { %s19_s23 = ssub.s32 %s1295_s20, %s1353_s22  ;;  %s22_s24 = sadd.s32 1, %s1291_s19 }
   0x4   : > { %p20_p0 = scmp.eq.s32.totalorder %s19_s23, 0  ;;  %p29_p1 = scmp.ne.s32.totalorder %s1291_s19, %s1287_s18 }
   0x5   : > { %p30_p2 = scmp.eq.s32.totalorder %s1295_s20, 0  ;;  %p143_p3 = scmp.eq.s32.totalorder %s1020_s21, 1 }
   0x6   : > { %s1364_s25 = scalar_select %p20_p0, %s1291_s19, %s22_s24  }
   0x7   : > { %p31_p4 = por %p30_p2, %p29_p1  ;;  %p1366_p5 = por %p143_p3, %p29_p1 }
   0x8   : > { %p1023_p6 = scmp.ge.s32.totalorder %s1295_s20, 2 }
   0xa   : > { %177 = sbr.rel (%p1023_p6) target bundleno = 27 (0x1b), region = 32 }
   0xf   : > { %180 = sbr.rel (!%p31_p4) target bundleno = 27 (0x1b), region = 36  ;;  %s182_s27 = sand.u32 (%p31_p4), 1, %s1291_s19  }
  0x10   : > { %s1072_s28 = sshll.u32 (%p31_p4), %s1295_s20, 4  ;;  %s1024_s29 = sshll.u32 (%p31_p4), %s182_s27, 6 }
  0x11   : > { %s187_s7 = scalar_lea.vmem (%p31_p4), %s1596_s0, %s1072_s28  ;;  %s184_s8 = scalar_lea.vmem (%p31_p4), [#allocation2], %s1024_s29 }
  0x12   : > { %v200_v0 = vld [vmem:[%s187_s7] sm:$0xff] (%p31_p4)  ;;  %v202_v1 = vld [vmem:[%s187_s7 + $0x8] sm:$0xff] (%p31_p4) }
  0x13   : > { %v204_v2 = vld [vmem:[%s187_s7 + $0x20] sm:$0xff] (%p31_p4)  ;;  %201 = vst [vmem:[%s184_s8] sm:$0xff] (%p31_p4), %v200_v0  ;;  %v206_v3 = vld [vmem:[%s187_s7 + $0x28] sm:$0xff] (%p31_p4) }
  0x14   : > { %203 = vst [vmem:[%s184_s8 + $0x8] sm:$0xff] %v202_v1  ;;  %v208_v4 = vld [vmem:[%s187_s7 + $0x40] sm:$0xff]  ;;  %v210_v5 = vld [vmem:[%s187_s7 + $0x48] sm:$0xff] }
  0x15   : > { %205 = vst [vmem:[%s184_s8 + $0x10] sm:$0xff] %v204_v2  ;;  %v212_v6 = vld [vmem:[%s187_s7 + $0x60] sm:$0xff]  ;;  %v214_v7 = vld [vmem:[%s187_s7 + $0x68] sm:$0xff] }
  0x16   : > { %207 = vst [vmem:[%s184_s8 + $0x18] sm:$0xff] %v206_v3 }
  0x17   : > { %209 = vst [vmem:[%s184_s8 + $0x20] sm:$0xff] %v208_v4 }
  0x18   : > { %211 = vst [vmem:[%s184_s8 + $0x28] sm:$0xff] %v210_v5 }
  0x19   : > { %213 = vst [vmem:[%s184_s8 + $0x30] sm:$0xff] %v212_v6 }
  0x1a   : > { %215 = vst [vmem:[%s184_s8 + $0x38] sm:$0xff] %v214_v7 }
  0x1b PF: > { %p1027_p7 = scmp.ge.s32.totalorder %s1295_s20, 1  ;;  %p220_p8 = scmp.lt.s32.totalorder %s1295_s20, 3 }
  0x1d   : > { %p221_p9 = pnand %p1027_p7, %p220_p8 }
  0x1e   : > { %s227_s9 = sand.u32 (!%p221_p9), 1, %s1287_s18   ;;  %s1297_s12 = smov (!%p221_p9), 127  }
  0x1f   : > { %224 = sbr.rel (%p221_p9) target bundleno = 550 (0x226), region = 59  ;;  %s1028_s10 = sshll.u32 (!%p221_p9), %s227_s9, 6 }
  0x20   : > { %s229_s11 = scalar_lea.vmem (!%p221_p9), [#allocation2], %s1028_s10  ;;  %s1298_s13 = smov (!%p221_p9), 126  }
  0x21   : > { %s1299_s14 = smov (!%p221_p9), 118   ;;  %s1300_s15 = smov (!%p221_p9), 117  }
  0x22   : > { %s1301_s16 = smov (!%p221_p9), 108   ;;  %s1302_s17 = smov (!%p221_p9), 107  }
  0x23   : > { %s1303_s23 = smov (!%p221_p9), 116   ;;  %s1304_s24 = smov (!%p221_p9), 106  }
  0x24   : > { %v1381_v8 = vld [vmem:[%s229_s11 + $0x30] sm:$0xff]  ;;  %v1383_v9 = vld [vmem:[%s229_s11 + $0x38] sm:$0xff]  ;;  %v1392_v15 = vld [vmem:[%s229_s11 + $0x20] sm:$0xff]  ;;  %vm386_vm0 = vcmask 1031168   ;;  %vm308_vm1 = vcmask 261120   ;;  %vm299_vm2 = vcmask 1039360  }
  0x25   : > { %v1385_v10 = vld [vmem:[%s229_s11 + $0x10] sm:$0xff]  ;;  %v268_v11 = vmax.f32 %v1381_v8, 0.0  ;;  %v269_v12 = vmax.f32 %v1383_v9, 0.0  ;;  %v1389_v13 = vld [vmem:[%s229_s11 + $0x18] sm:$0xff]  ;;  %v1395_v17 = vld [vmem:[%s229_s11 + $0x28] sm:$0xff]  ;;  %v266_v22 = vmax.f32 %v1392_v15, 0.0 }
  0x26   : > { %v264_v14 = vmax.f32 %v1385_v10, 0.0  ;;  %v265_v16 = vmax.f32 %v1389_v13, 0.0  ;;  %v1397_v19 = vld [vmem:[%s229_s11] sm:$0xff]  ;;  %v1399_v20 = vld [vmem:[%s229_s11 + $0x8] sm:$0xff]  ;;  %v267_v23 = vmax.f32 %v1395_v17, 0.0  ;;  %v1031_v56 = vld [vmem:[%s1597_s1 + $0x18] sm:$0xff] }
  0x27   : > { %v1110_v18 = vpack.i.bf16 %v269_v12, %v268_v11  ;;  %356 = vmatpush.msra.mxu2 %v268_v11  ;;  %v262_v24 = vmax.f32 %v1397_v19, 0.0  ;;  %v263_v25 = vmax.f32 %v1399_v20, 0.0  ;;  %v270_v37 = vld [vmem:[%s1597_s1] sm:$0xff]  ;;  %v271_v44 = vld [vmem:[%s1597_s1 + $0x8] sm:$0xff]  ;;  %vm445_vm3 = vcmask 965632   ;;  %v1030_v61 = vld [vmem:[%s1597_s1 + $0x10] sm:$0xff] }
  0x28   : > { %v1120_v21 = vpack.i.bf16 %v265_v16, %v264_v14  ;;  %v1115_v26 = vpack.i.bf16 %v267_v23, %v266_v22  ;;  %v1036_v23 = vld [vmem:[%s1597_s1 + $0x20] sm:$0xff]  ;;  %vm504_vm4 = vcmask 957440   ;;  %vm622_vm5 = vcmask 883712   ;;  %s1029_s10 = sshll.u32 %s227_s9, 5  ;;  %s1069_s18 = sshll.u32 (%p1366_p5), %s1020_s21, 3 }
  0x29   : > { %1111 = vrot.lane.b32.xlu0 %v1110_v18, %s1297_s12  ;;  %357 = vmatpush.msra.mxu2 %v266_v22  ;;  %v1125_v27 = vpack.i.bf16 %v263_v25, %v262_v24  ;;  %vm681_vm6 = vcmask 875520   ;;  %vm563_vm7 = vcmask 949248   ;;  %vm740_vm8 = vcmask 867328   ;;  %s1566_s11 = scalar_lea.vmem [#allocation3], %s1029_s10 }
  0x2a   : > { %1121 = vrot.lane.b32.xlu1 %v1120_v21, %s1297_s12  ;;  %1131 = vrot.lane.b32.xlu2 %v1110_v18, %s1298_s13  ;;  %vm824_vm9 = vcmask 130048  }
  0x2b   : > { %358 = vmatpush.msra.mxu2 %v264_v14 }
  0x2d   : > { %359 = vmatpush.msra.mxu2 %v262_v24 }
  0x2e   : > { %1034 = vmatmul.msk.f32.vlgmr.msra.gmra.mxu2 %vm308_vm1, %v270_v37  ;;  %v1037_v37 = vld [vmem:[%s1597_s1 + $0x28] sm:$0xff] }
  0x31   : > { %1116 = vrot.lane.b32.xlu0 %v1115_v26, %s1297_s12 }
  0x32   : > { %1126 = vrot.lane.b32.xlu1 %v1125_v27, %s1297_s12  ;;  %1136 = vrot.lane.b32.xlu2 %v1115_v26, %s1298_s13 }
  0x36   : > { %1035 = vmatmul.msk.f32.gmra.mxu2 %vm308_vm1, %v271_v44 }
  0x39   : > { %1141 = vrot.lane.b32.xlu0 %v1110_v18, %s1299_s14 }
  0x3a   : > { %1146 = vrot.lane.b32.xlu1 %v1120_v21, %s1298_s13  ;;  %1151 = vrot.lane.b32.xlu2 %v1115_v26, %s1299_s14 }
  0x41   : > { %1156 = vrot.lane.b32.xlu0 %v1125_v27, %s1298_s13  ;;  %s918_s13 = scalar_lea.vmem (%p1366_p5), %s1601_s5, %s1069_s18 }
  0x42   : > { %1161 = vrot.lane.b32.xlu1 %v1120_v21, %s1299_s14  ;;  %1166 = vrot.lane.b32.xlu2 %v1125_v27, %s1299_s14 }
  0x49   : > { %1171 = vrot.lane.b32.xlu0 %v1110_v18, %s1300_s15 }
  0x4a   : > { %1176 = vrot.lane.b32.xlu1 %v1115_v26, %s1300_s15  ;;  %1181 = vrot.lane.b32.xlu2 %v1120_v21, %s1300_s15 }
  0x51   : > { %1186 = vrot.lane.b32.xlu0 %v1125_v27, %s1300_s15 }
  0x52   : > { %1191 = vrot.lane.b32.xlu1 %v1110_v18, %s1301_s16  ;;  %1196 = vrot.lane.b32.xlu2 %v1115_v26, %s1301_s16 }
  0x59   : > { %1201 = vrot.lane.b32.xlu0 %v1110_v18, %s1302_s17 }
  0x5a   : > { %1206 = vrot.lane.b32.xlu1 %v1110_v18, %s1303_s23  ;;  %1211 = vrot.lane.b32.xlu2 %v1120_v21, %s1301_s16 }
  0x61   : > { %1216 = vrot.lane.b32.xlu0 %v1115_v26, %s1302_s17 }
  0x62   : > { %1221 = vrot.lane.b32.xlu1 %v1115_v26, %s1303_s23  ;;  %1226 = vrot.lane.b32.xlu2 %v1125_v27, %s1301_s16 }
  0x69   : > { %1231 = vrot.lane.b32.xlu0 %v1120_v21, %s1302_s17 }
  0x6a   : > { %1236 = vrot.lane.b32.xlu1 %v1120_v21, %s1303_s23  ;;  %1241 = vrot.lane.b32.xlu2 %v1125_v27, %s1302_s17 }
  0x71   : > { %1246 = vrot.lane.b32.xlu0 %v1125_v27, %s1303_s23 }
  0x72   : > { %1251 = vrot.lane.b32.xlu1 %v1110_v18, %s1304_s24  ;;  %1256 = vrot.lane.b32.xlu2 %v1115_v26, %s1304_s24 }
  0x79   : > { %1261 = vrot.lane.b32.xlu0 %v1120_v21, %s1304_s24 }
  0x7a   : > { %1266 = vrot.lane.b32.xlu1 %v1125_v27, %s1304_s24  ;;  %v1040_v27 = vld [vmem:[%s1597_s1 + $0x30] sm:$0xff] }
  0x84   : > { %v1132_v28 = vpop.permute.xlu2 %1131 }
  0x85   : > { %v1134_v29 = vunpack.i.h.bf16 %v1132_v28  ;;  %v1133_v30 = vunpack.i.l.bf16 %v1132_v28 }
  0x87   : > { %v390_v31 = vsel %vm386_vm0, %v1133_v30, %v1134_v29 }
  0x88   : > { %413 = vmatpush.msrb.mxu2 %v390_v31 }
  0x8c   : > { %v1137_v32 = vpop.permute.xlu2 %1136 }
  0x8d   : > { %v1139_v33 = vunpack.i.h.bf16 %v1137_v32  ;;  %v1138_v34 = vunpack.i.l.bf16 %v1137_v32 }
  0x8f   : > { %v389_v35 = vsel %vm386_vm0, %v1138_v34, %v1139_v33 }
  0x90   : > { %414 = vmatpush.msrb.mxu2 %v389_v35 }
  0x94   : > { %v1152_v36 = vpop.permute.xlu2 %1151 }
  0x95   : > { %v1154_v58 = vunpack.i.h.bf16 %v1152_v36  ;;  %v1153_v59 = vunpack.i.l.bf16 %v1152_v36 }
  0x97   : > { %v448_v4 = vsel %vm445_vm3, %v1153_v59, %v1154_v58 }
  0x9b   : > { %v1112_v38 = vpop.permute.xlu0 %1111 }
  0x9c   : > { %v1114_v39 = vunpack.i.h.bf16 %v1112_v38  ;;  %v1113_v40 = vunpack.i.l.bf16 %v1112_v38  ;;  %v1122_v41 = vpop.permute.xlu1 %1121  ;;  %v1167_v42 = vpop.permute.xlu2 %1166 }
  0x9d   : > { %v1124_v46 = vunpack.i.h.bf16 %v1122_v41  ;;  %v1123_v47 = vunpack.i.l.bf16 %v1122_v41  ;;  %v1169_v11 = vunpack.i.h.bf16 %v1167_v42  ;;  %v1168_v12 = vunpack.i.l.bf16 %v1167_v42  ;;  %v1041_v41 = vld [vmem:[%s1597_s1 + $0x38] sm:$0xff] }
  0x9e   : > { %v303_v43 = vsel %vm299_vm2, %v1113_v40, %v1114_v39 }
  0x9f   : > { %327 = vmatpush.msra.mxu0 %v303_v43  ;;  %1073 = vmatpush.msra.mxu3 %v303_v43  ;;  %v301_v55 = vsel %vm299_vm2, %v1123_v47, %v1124_v46  ;;  %v446_v26 = vsel %vm445_vm3, %v1168_v12, %v1169_v11 }
  0xa3   : > { %v1117_v45 = vpop.permute.xlu0 %1116 }
  0xa4   : > { %v1119_v48 = vunpack.i.h.bf16 %v1117_v45  ;;  %v1118_v49 = vunpack.i.l.bf16 %v1117_v45  ;;  %v1127_v50 = vpop.permute.xlu1 %1126  ;;  %v1421_v54 = vpop.permute.xlu2 %1181 }
  0xa5   : > { %v1129_v51 = vunpack.i.h.bf16 %v1127_v50  ;;  %v1128_v52 = vunpack.i.l.bf16 %v1127_v50  ;;  %v1184_v33 = vunpack.i.h.bf16 %v1421_v54  ;;  %v1183_v34 = vunpack.i.l.bf16 %v1421_v54 }
  0xa6   : > { %v302_v53 = vsel %vm299_vm2, %v1118_v49, %v1119_v48 }
  0xa7   : > { %328 = vmatpush.msra.mxu0 %v302_v53  ;;  %1074 = vmatpush.msra.mxu3 %v302_v53  ;;  %v300_v57 = vsel %vm299_vm2, %v1128_v52, %v1129_v51  ;;  %v506_v40 = vsel %vm504_vm4, %v1183_v34, %v1184_v33  ;;  %v1044_v53 = vld [vmem:[%s1597_s1 + $0x40] sm:$0xff] }
  0xa9   : > { %329 = vmatpush.msra.mxu0 %v301_v55  ;;  %1075 = vmatpush.msra.mxu3 %v301_v55 }
  0xab   : > { %v1142_v60 = vpop.permute.xlu0 %1141  ;;  %330 = vmatpush.msra.mxu0 %v300_v57  ;;  %1076 = vmatpush.msra.mxu3 %v300_v57 }
  0xac   : > { %v1144_v62 = vunpack.i.h.bf16 %v1142_v60  ;;  %v1143_v63 = vunpack.i.l.bf16 %v1142_v60  ;;  %v1147_v0 = vpop.permute.xlu1 %1146  ;;  %1033 = vmatmul.msk.f32.vlgmr.msra.gmra.mxu3 %vm308_vm1, %v1031_v56  ;;  %1032 = vmatmul.msk.f32.vlgmr.msra.gmra.mxu0 %vm308_vm1, %v1030_v61  ;;  %v1197_v6 = vpop.permute.xlu2 %1196 }
  0xad   : > { %v1149_v1 = vunpack.i.h.bf16 %v1147_v0  ;;  %v1148_v2 = vunpack.i.l.bf16 %v1147_v0  ;;  %v1199_v43 = vunpack.i.h.bf16 %v1197_v6  ;;  %v1198_v44 = vunpack.i.l.bf16 %v1197_v6 }
  0xae   : > { %v449_v3 = vsel %vm445_vm3, %v1143_v63, %v1144_v62 }
  0xaf   : > { %472 = vmatpush.msrb.mxu3 %v449_v3  ;;  %v388_v5 = vsel %vm386_vm0, %v1148_v2, %v1149_v1  ;;  %v625_v56 = vsel %vm622_vm5, %v1198_v44, %v1199_v43  ;;  %v1052_v1 = vld [vmem:[%s1597_s1 + $0x60] sm:$0xff] }
  0xb0   : > { %415 = vmatpush.msrb.mxu2 %v388_v5 }
  0xb1   : > { %473 = vmatpush.msrb.mxu3 %v448_v4  ;;  %v1045_v4 = vld [vmem:[%s1597_s1 + $0x48] sm:$0xff] }
  0xb3   : > { %v1157_v7 = vpop.permute.xlu0 %1156 }
  0xb4   : > { %v1159_v14 = vunpack.i.h.bf16 %v1157_v7  ;;  %v1158_v16 = vunpack.i.l.bf16 %v1157_v7  ;;  %v1162_v18 = vpop.permute.xlu1 %1161  ;;  %v1212_v28 = vpop.permute.xlu2 %1211 }
  0xb5   : > { %v1164_v21 = vunpack.i.h.bf16 %v1162_v18  ;;  %v1163_v22 = vunpack.i.l.bf16 %v1162_v18  ;;  %v1214_v51 = vunpack.i.h.bf16 %v1212_v28  ;;  %v1213_v52 = vunpack.i.l.bf16 %v1212_v28  ;;  %v781_v28 = vld [vmem:[%s1598_s2 + $0x8] sm:$0xff] }
  0xb6   : > { %v387_v24 = vsel %vm386_vm0, %v1158_v16, %v1159_v14  ;;  %v1053_v16 = vld [vmem:[%s1597_s1 + $0x68] sm:$0xff] }
  0xb7   : > { %416 = vmatpush.msrb.mxu2 %v387_v24  ;;  %v447_v25 = vsel %vm445_vm3, %v1163_v22, %v1164_v21  ;;  %v624_v59 = vsel %vm622_vm5, %v1213_v52, %v1214_v51 }
  0xb8   : > { %474 = vmatpush.msrb.mxu3 %v447_v25  ;;  %1038 = vmatmul.msk.f32.vlgmr.msrb.gmra.mxu2 %vm308_vm1, %v1036_v23 }
  0xba   : > { %475 = vmatpush.msrb.mxu3 %v446_v26 }
  0xbb   : > { %v1172_v29 = vpop.permute.xlu0 %1171  ;;  %1042 = vmatmul.msk.f32.vlgmr.msrb.gmra.mxu3 %vm308_vm1, %v1040_v27  ;;  %v780_v27 = vld [vmem:[%s1598_s2] sm:$0xff] }
  0xbc   : > { %v1174_v30 = vunpack.i.h.bf16 %v1172_v29  ;;  %v1173_v31 = vunpack.i.l.bf16 %v1172_v29  ;;  %v1177_v32 = vpop.permute.xlu1 %1176  ;;  %v1227_v48 = vpop.permute.xlu2 %1226 }
  0xbd   : > { %v1179_v35 = vunpack.i.h.bf16 %v1177_v32  ;;  %v1178_v36 = vunpack.i.l.bf16 %v1177_v32  ;;  %v1229_v57 = vunpack.i.h.bf16 %v1227_v48  ;;  %v1228_v58 = vunpack.i.l.bf16 %v1227_v48 }
  0xbe   : > { %v508_v38 = vsel %vm504_vm4, %v1173_v31, %v1174_v30  ;;  %v1305_v30 = vmov 0  }
  0xbf   : > { %531 = vmatpush.msrb.mxu0 %v508_v38  ;;  %v507_v39 = vsel %vm504_vm4, %v1178_v36, %v1179_v35  ;;  %v623_v61 = vsel %vm622_vm5, %v1228_v58, %v1229_v57  ;;  %1271 = vset.pattern.permute.xlu0 %v1305_v30 }
  0xc0   : > { %1039 = vmatmul.msk.f32.gmra.mxu2 %vm308_vm1, %v1037_v37  ;;  %1270 = vset.pattern.permute.xlu2 %v1305_v30 }
  0xc1   : > { %532 = vmatpush.msrb.mxu0 %v507_v39  ;;  %784 = vperm.xlu0 %1271, %v780_v27   ;;  %v1056_v39 = vld [vmem:[%s1597_s1 + $0x70] sm:$0xff] }
  0xc2   : > { %789 = vperm.xlu2 %1270, %v781_v28   ;;  %1272 = vset.pattern.permute.xlu1 %v1305_v30 }
  0xc3   : > { %v1187_v42 = vpop.permute.xlu0 %1186  ;;  %533 = vmatpush.msrb.mxu0 %v506_v40  ;;  %1043 = vmatmul.msk.f32.gmra.mxu3 %vm308_vm1, %v1041_v41  ;;  %v801_v41 = vld [vmem:[%s1600_s4 + $0x8] sm:$0xff] }
  0xc4   : > { %v1189_v45 = vunpack.i.h.bf16 %v1187_v42  ;;  %v1188_v46 = vunpack.i.l.bf16 %v1187_v42  ;;  %v1192_v47 = vpop.permute.xlu1 %1191  ;;  %v1242_v23 = vpop.permute.xlu2 %1241 }
  0xc5   : > { %v1194_v49 = vunpack.i.h.bf16 %v1192_v47  ;;  %v1193_v50 = vunpack.i.l.bf16 %v1192_v47  ;;  %v1244_v25 = vunpack.i.h.bf16 %v1242_v23  ;;  %v1243_v26 = vunpack.i.l.bf16 %v1242_v23 }
  0xc6   : > { %v505_v54 = vsel %vm504_vm4, %v1188_v46, %v1189_v45 }
  0xc7   : > { %534 = vmatpush.msrb.mxu0 %v505_v54  ;;  %v626_v55 = vsel %vm622_vm5, %v1193_v50, %v1194_v49  ;;  %v682_v37 = vsel %vm681_vm6, %v1243_v26, %v1244_v25  ;;  %v1048_v50 = vld [vmem:[%s1597_s1 + $0x50] sm:$0xff]  ;;  %v1057_v54 = vld [vmem:[%s1597_s1 + $0x78] sm:$0xff] }
  0xc8   : > { %649 = vmatpush.msra.mxu2 %v626_v55  ;;  %1046 = vmatmul.msk.f32.vlgmr.msrb.gmra.mxu0 %vm308_vm1, %v1044_v53 }
  0xc9   : > { %874 = vrot.lane.b32.xlu0 %v1397_v19, %s1300_s15  ;;  %v803_v19 = vld [vmem:[%s1600_s4 + $0x18] sm:$0xff] }
  0xca   : > { %650 = vmatpush.msra.mxu2 %v625_v56  ;;  %811 = vperm.xlu2 %1270, %v801_v41  }
  0xcb   : > { %v1202_v60 = vpop.permute.xlu0 %1201 }
  0xcc   : > { %v1204_v62 = vunpack.i.h.bf16 %v1202_v60  ;;  %v1203_v63 = vunpack.i.l.bf16 %v1202_v60  ;;  %v1207_v0 = vpop.permute.xlu1 %1206  ;;  %651 = vmatpush.msra.mxu2 %v624_v59  ;;  %v1257_v40 = vpop.permute.xlu2 %1256 }
  0xcd   : > { %v1209_v2 = vunpack.i.h.bf16 %v1207_v0  ;;  %v1208_v3 = vunpack.i.l.bf16 %v1207_v0  ;;  %v1259_v43 = vunpack.i.h.bf16 %v1257_v40  ;;  %v1258_v44 = vunpack.i.l.bf16 %v1257_v40  ;;  %v1060_v0 = vld [vmem:[%s1597_s1 + $0x80] sm:$0xff] }
  0xce   : > { %v685_v5 = vsel %vm681_vm6, %v1203_v63, %v1204_v62  ;;  %652 = vmatpush.msra.mxu2 %v623_v61  ;;  %v1049_v61 = vld [vmem:[%s1597_s1 + $0x58] sm:$0xff] }
  0xcf   : > { %708 = vmatpush.msra.mxu3 %v685_v5  ;;  %v567_v6 = vsel %vm563_vm7, %v1208_v3, %v1209_v2  ;;  %1054 = vmatmul.msk.f32.vlgmr.msra.gmra.mxu2 %vm308_vm1, %v1052_v1  ;;  %v743_v53 = vsel %vm740_vm8, %v1258_v44, %v1259_v43  ;;  %v361_v1 = vpop.f32.mrf.mxu2 }
  0xd0   : > { %590 = vmatpush.msra.mxu1 %v567_v6  ;;  %1047 = vmatmul.msk.f32.gmra.mxu0 %vm308_vm1, %v1045_v4 }
  0xd1   : > { %880 = vrot.lane.b32.xlu0 %v1389_v13, %s1300_s15  ;;  %v1061_v13 = vld [vmem:[%s1597_s1 + $0x88] sm:$0xff] }
  0xd2   : > { %821 = vperm.xlu2 %1270, %v803_v19  }
  0xd3   : > { %v1217_v7 = vpop.permute.xlu0 %1216 }
  0xd4   : > { %v1219_v11 = vunpack.i.h.bf16 %v1217_v7  ;;  %v1218_v12 = vunpack.i.l.bf16 %v1217_v7  ;;  %v1222_v14 = vpop.permute.xlu1 %1221 }
  0xd5   : > { %v1224_v18 = vunpack.i.h.bf16 %v1222_v14  ;;  %v1223_v21 = vunpack.i.l.bf16 %v1222_v14 }
  0xd6   : > { %v684_v22 = vsel %vm681_vm6, %v1218_v12, %v1219_v11 }
  0xd7   : > { %709 = vmatpush.msra.mxu3 %v684_v22  ;;  %v566_v24 = vsel %vm563_vm7, %v1223_v21, %v1224_v18  ;;  %1055 = vmatmul.msk.f32.gmra.mxu2 %vm308_vm1, %v1053_v16  ;;  %v364_v2 = vpop.f32.mrf.mxu2 }
  0xd8   : > { %591 = vmatpush.msra.mxu1 %v566_v24 }
  0xd9   : > { %886 = vrot.lane.b32.xlu0 %v1381_v8, %s1300_s15  ;;  %v800_v8 = vld [vmem:[%s1600_s4] sm:$0xff] }
  0xda   : > { %878 = vrot.lane.b32.xlu2 %v1385_v10, %s1300_s15  ;;  %806 = vperm.xlu1 %1272, %v800_v8  }
  0xdb   : > { %v1232_v29 = vpop.permute.xlu0 %1231 }
  0xdc   : > { %v1234_v31 = vunpack.i.h.bf16 %v1232_v29  ;;  %v1233_v32 = vunpack.i.l.bf16 %v1232_v29  ;;  %v1237_v33 = vpop.permute.xlu1 %1236 }
  0xdd   : > { %v1239_v34 = vunpack.i.h.bf16 %v1237_v33  ;;  %v1238_v35 = vunpack.i.l.bf16 %v1237_v33 }
  0xde   : > { %v683_v36 = vsel %vm681_vm6, %v1233_v32, %v1234_v31 }
  0xdf   : > { %710 = vmatpush.msra.mxu3 %v683_v36  ;;  %v565_v38 = vsel %vm563_vm7, %v1238_v35, %v1239_v34 }
  0xe0   : > { %592 = vmatpush.msra.mxu1 %v565_v38 }
  0xe1   : > { %711 = vmatpush.msra.mxu3 %v682_v37 }
  0xe2   : > { %1058 = vmatmul.msk.f32.vlgmr.msra.gmra.mxu3 %vm308_vm1, %v1056_v39  ;;  %884 = vrot.lane.b32.xlu2 %v1395_v17, %s1300_s15  ;;  %v802_v17 = vld [vmem:[%s1600_s4 + $0x10] sm:$0xff] }
  0xe3   : > { %v1247_v42 = vpop.permute.xlu0 %1246  ;;  %816 = vperm.xlu1 %1272, %v802_v17  }
  0xe4   : > { %v1249_v45 = vunpack.i.h.bf16 %v1247_v42  ;;  %v1248_v46 = vunpack.i.l.bf16 %v1247_v42  ;;  %v1252_v47 = vpop.permute.xlu1 %1251 }
  0xe5   : > { %v1254_v48 = vunpack.i.h.bf16 %v1252_v47  ;;  %v1253_v49 = vunpack.i.l.bf16 %v1252_v47  ;;  %v796_v47 = vld [vmem:[%s1599_s3] sm:$0xff] }
  0xe6   : > { %v564_v51 = vsel %vm563_vm7, %v1248_v46, %v1249_v45 }
  0xe7   : > { %593 = vmatpush.msra.mxu1 %v564_v51  ;;  %v744_v52 = vsel %vm740_vm8, %v1253_v49, %v1254_v48  ;;  %v798_v48 = vld [vmem:[%s1599_s3 + $0x10] sm:$0xff] }
  0xe8   : > { %1050 = vmatmul.msk.f32.vlgmr.msra.gmra.mxu1 %vm308_vm1, %v1048_v50  ;;  %767 = vmatpush.msra.mxu0 %v744_v52 }
  0xea   : > { %768 = vmatpush.msra.mxu0 %v743_v53  ;;  %1059 = vmatmul.msk.f32.gmra.mxu3 %vm308_vm1, %v1057_v54 }
  0xeb   : > { %v1262_v55 = vpop.permute.xlu0 %1261  ;;  %876 = vrot.lane.b32.xlu1 %v1399_v20, %s1300_s15 }
  0xec   : > { %v1264_v56 = vunpack.i.h.bf16 %v1262_v55  ;;  %v1263_v57 = vunpack.i.l.bf16 %v1262_v55  ;;  %v1267_v58 = vpop.permute.xlu1 %1266 }
  0xed   : > { %v1269_v59 = vunpack.i.h.bf16 %v1267_v58  ;;  %v1268_v60 = vunpack.i.l.bf16 %v1267_v58 }
  0xee   : > { %v742_v62 = vsel %vm740_vm8, %v1263_v57, %v1264_v56 }
  0xef   : > { %769 = vmatpush.msra.mxu0 %v742_v62  ;;  %v741_v63 = vsel %vm740_vm8, %v1268_v60, %v1269_v59 }
  0xf0   : > { %1051 = vmatmul.msk.f32.gmra.mxu1 %vm308_vm1, %v1049_v61 }
  0xf1   : > { %770 = vmatpush.msra.mxu0 %v741_v63 }
  0xf2   : > { %1062 = vmatmul.msk.f32.vlgmr.msra.gmra.mxu0 %vm308_vm1, %v1060_v0 }
  0xf3   : > { %882 = vrot.lane.b32.xlu1 %v1392_v15, %s1300_s15  ;;  %v797_v15 = vld [vmem:[%s1599_s3 + $0x8] sm:$0xff] }
  0xfa   : > { %1063 = vmatmul.msk.f32.gmra.mxu0 %vm308_vm1, %v1061_v13 }
  0xfb   : > { %888 = vrot.lane.b32.xlu1 %v1383_v9, %s1300_s15  ;;  %v799_v9 = vld [vmem:[%s1599_s3 + $0x18] sm:$0xff] }
 0x11c   : > { %v790_v43 = vpop.permute.xlu2 %789 }
 0x124   : > { %v812_v50 = vpop.permute.xlu2 %811 }
 0x129   : > { %v332_v4 = vpop.f32.mrf.mxu0 }
 0x12a   : > { %v362_v11 = vadd.f32 %v361_v1, %v332_v4 }
 0x12c   : > { %v822_v52 = vpop.permute.xlu2 %821 }
 0x12f   : > { %v335_v3 = vpop.f32.mrf.mxu3 }
 0x130   : > { %v365_v12 = vadd.f32 %v364_v2, %v335_v3 }
 0x133   : > { %v785_v40 = vpop.permute.xlu0 %784 }
 0x134   : > { %v879_v58 = vpop.permute.xlu2 %878 }
 0x13b   : > { %v418_v5 = vpop.f32.mrf.mxu2  ;;  %v875_v53 = vpop.permute.xlu0 %874 }
 0x13c   : > { %v424_v16 = vadd.f32 %v418_v5, %v362_v11  ;;  %v885_v2 = vpop.permute.xlu2 %884 }
 0x13e   : > { %v477_v6 = vpop.f32.mrf.mxu3 }
 0x13f   : > { %v483_v23 = vadd.f32 %v477_v6, %v424_v16 }
 0x143   : > { %v421_v7 = vpop.f32.mrf.mxu2  ;;  %v881_v60 = vpop.permute.xlu0 %880 }
 0x144   : > { %v425_v18 = vadd.f32 %v421_v7, %v365_v12  ;;  %v891_v62 = vsel %vm504_vm4, %v879_v58, %v881_v60 }
 0x145   : > { %v536_v10 = vpop.f32.mrf.mxu0 }
 0x146   : > { %v480_v14 = vpop.f32.mrf.mxu3  ;;  %v542_v27 = vadd.f32 %v536_v10, %v483_v23 }
 0x147   : > { %v484_v25 = vadd.f32 %v480_v14, %v425_v18 }
 0x14b   : > { %v887_v10 = vpop.permute.xlu0 %886 }
 0x14c   : > { %v807_v49 = vpop.permute.xlu1 %806 }
 0x14d   : > { %v539_v24 = vpop.f32.mrf.mxu0 }
 0x14e   : > { %v543_v28 = vadd.f32 %v539_v24, %v484_v25 }
 0x152   : > { %v654_v22 = vpop.f32.mrf.mxu2 }
 0x155   : > { %v817_v51 = vpop.permute.xlu1 %816 }
 0x15a   : > { %v657_v32 = vpop.f32.mrf.mxu2 }
 0x15d   : > { %v877_v54 = vpop.permute.xlu1 %876 }
 0x15e   : > { %v890_v55 = vsel %vm504_vm4, %v875_v53, %v877_v54 }
 0x165   : > { %v595_v21 = vpop.f32.mrf.mxu1  ;;  %v713_v26 = vpop.f32.mrf.mxu3 }
 0x166   : > { %v601_v29 = vadd.f32 %v595_v21, %v542_v27  ;;  %v883_v13 = vpop.permute.xlu1 %882 }
 0x167   : > { %v892_v4 = vsel %vm504_vm4, %v883_v13, %v885_v2 }
 0x168   : > { %v660_v34 = vadd.f32 %v654_v22, %v601_v29 }
 0x16a   : > { %v719_v37 = vadd.f32 %v713_v26, %v660_v34 }
 0x16d   : > { %v598_v30 = vpop.f32.mrf.mxu1  ;;  %v716_v36 = vpop.f32.mrf.mxu3 }
 0x16e   : > { %v602_v31 = vadd.f32 %v598_v30, %v543_v28  ;;  %v889_v7 = vpop.permute.xlu1 %888 }
 0x16f   : > { %v772_v33 = vpop.f32.mrf.mxu0  ;;  %v893_v12 = vsel %vm504_vm4, %v887_v10, %v889_v7 }
 0x170   : > { %v661_v35 = vadd.f32 %v657_v32, %v602_v31  ;;  %v778_v38 = vadd.f32 %v772_v33, %v719_v37 }
 0x172   : > { %v720_v39 = vadd.f32 %v716_v36, %v661_v35  ;;  %v792_v44 = vadd.f32 %v785_v40, %v778_v38 }
 0x174   : > { %v794_v20 = vmax.f32 %v792_v44, 0.0 }
 0x177   : > { %v775_v41 = vpop.f32.mrf.mxu0 }
 0x178   : > { %v779_v42 = vadd.f32 %v775_v41, %v720_v39 }
 0x17a   : > { %v793_v45 = vadd.f32 %v790_v43, %v779_v42 }
 0x17c   : > { %v795_v46 = vmax.f32 %v793_v45, 0.0 }
 0x17e   : > { %851 = vmatpush.msrb.mxu1 %v795_v46 }
 0x180   : > { %852 = vmatpush.msrb.mxu1 %v794_v20 }
 0x181   : > { %1064 = vmatmul.msk.f32.vlgmr.msrb.gmra.mxu1 %vm824_vm9, %v796_v47 }
 0x189   : > { %1065 = vmatmul.msk.f32.gmra.mxu1 %vm824_vm9, %v797_v15 }
 0x191   : > { %1066 = vmatmul.msk.f32.gmra.mxu1 %vm824_vm9, %v798_v48 }
 0x199   : > { %1067 = vmatmul.msk.f32.gmra.mxu1 %vm824_vm9, %v799_v9 }
 0x1fe   : > { %v854_v19 = vpop.f32.mrf.mxu1 }
 0x1ff   : > { %v855_v56 = vadd.f32 %v854_v19, %v807_v49 }
 0x201   : > { %v898_v57 = vadd.f32 %v890_v55, %v855_v56 }
 0x203   : > { %v902_v59 = vmax.f32 %v898_v57, 0.0 }
 0x205   : > { %906 = vst [vmem:[%s1566_s11] sm:$0xff] %v902_v59 }
 0x206   : > { %v857_v61 = vpop.f32.mrf.mxu1 }
 0x207   : > { %v858_v63 = vadd.f32 %v857_v61, %v812_v50 }
 0x209   : > { %v899_v0 = vadd.f32 %v891_v62, %v858_v63 }
 0x20b   : > { %v903_v1 = vmax.f32 %v899_v0, 0.0 }
 0x20c   : > { %v953_v17 = vld [vmem:[%s1566_s11] sm:$0xff] (%p1366_p5) }
 0x20d   : > { %907 = vst [vmem:[%s1566_s11 + $0x8] sm:$0xff] %v903_v1 }
 0x20e   : > { %v860_v3 = vpop.f32.mrf.mxu1  ;;  %954 = vst [vmem:[%s918_s13] sm:$0xff] (%p1366_p5), %v953_v17 }
 0x20f   : > { %v861_v5 = vadd.f32 %v860_v3, %v817_v51 }
 0x211   : > { %v900_v6 = vadd.f32 %v892_v4, %v861_v5 }
 0x213   : > { %v904_v8 = vmax.f32 %v900_v6, 0.0 }
 0x214   : > { %v955_v21 = vld [vmem:[%s1566_s11 + $0x8] sm:$0xff] (%p1366_p5) }
 0x215   : > { %908 = vst [vmem:[%s1566_s11 + $0x10] sm:$0xff] %v904_v8 }
 0x216   : > { %v863_v11 = vpop.f32.mrf.mxu1  ;;  %956 = vst [vmem:[%s918_s13 + $0x10] sm:$0xff] (%p1366_p5), %v955_v21 }
 0x217   : > { %v864_v14 = vadd.f32 %v863_v11, %v822_v52 }
 0x219   : > { %v901_v16 = vadd.f32 %v893_v12, %v864_v14  ;;  %916 = sbr.rel (!%p1366_p5) target bundleno = 550 (0x226), region = 67 }
 0x21b   : > { %v905_v18 = vmax.f32 %v901_v16, 0.0 }
 0x21c   : > { %v957_v22 = vld [vmem:[%s1566_s11 + $0x10] sm:$0xff] (%p1366_p5) }
 0x21d   : > { %909 = vst [vmem:[%s1566_s11 + $0x18] sm:$0xff] %v905_v18 }
 0x21e   : > { %958 = vst [vmem:[%s918_s13 + $0x20] sm:$0xff] %v957_v22 }
 0x224   : > { %v959_v23 = vld [vmem:[%s1566_s11 + $0x18] sm:$0xff] }
 0x225   : > { %960 = vst [vmem:[%s918_s13 + $0x30] sm:$0xff] %v959_v23 }
 0x226 PF: > { %p12_p10 = scmp.ge.s32.totalorder %s1353_s22, 4   ;;  %s1603_s18 = smov %s1291_s19 }
 0x227   : > { %s1604_s19 = smov %s1364_s25  ;;  %s1605_s20 = smov %s1353_s22 }
 0x228   :  { %14 = sbr.rel (!%p12_p10) target bundleno = 2 (0x2), region = 144 }

// kernel: decoder_forward.6
= control target key start
LH: loop header
LB: loop body
LE: loop exit
PB: predicated region body
PF: predicated region fallthrough
CT: control target
= control target key end

     0   :  { %s1332_s18 = smov 0   ;;  %s1334_s19 = smov 0   ;;  %s1582_s0 = inlined_call_operand.vmem [shape: f32[32,512], index: 0, kind: input, shape index: {}]   ;;  %s1583_s1 = inlined_call_operand.vmem [shape: f32[9,16,32], index: 1, kind: input, shape index: {}]   ;;  %s1584_s2 = inlined_call_operand.vmem [shape: f32[16,1], index: 2, kind: input, shape index: {}]   ;;  %s1585_s3 = inlined_call_operand.vmem [shape: f32[32,16], index: 3, kind: input, shape index: {}]   ;;  %s1586_s4 = inlined_call_operand.vmem [shape: f32[32,1], index: 4, kind: input, shape index: {}]   ;;  %s1587_s5 = inlined_call_operand.vmem [shape: f32[32,256], index: 5, kind: output, shape index: {}]  }
   0x1   :  { %s1336_s20 = smov 0  }
   0x2 LB: > { %s1016_s21 = sadd.s32 4294967295, %s1291_s20   ;;  %s1349_s22 = sadd.s32 1, %s1291_s20   ;;  %s1291_s20 = sphi %s1336_s20, %s1591_s20   ;;  %s1287_s19 = sphi %s1334_s19, %s1590_s19   ;;  %s1283_s18 = sphi %s1332_s18, %s1589_s18  }
   0x3   : > { %s19_s23 = ssub.s32 %s1291_s20, %s1349_s22  ;;  %s22_s24 = sadd.s32 1, %s1287_s19 }
   0x4   : > { %p20_p0 = scmp.eq.s32.totalorder %s19_s23, 0  ;;  %p29_p1 = scmp.ne.s32.totalorder %s1287_s19, %s1283_s18 }
   0x5   : > { %p30_p2 = scmp.eq.s32.totalorder %s1291_s20, 0  ;;  %p143_p3 = scmp.eq.s32.totalorder %s1016_s21, 1 }
   0x6   : > { %s1360_s25 = scalar_select %p20_p0, %s1287_s19, %s22_s24  }
   0x7   : > { %p31_p4 = por %p30_p2, %p29_p1  ;;  %p1362_p5 = por %p143_p3, %p29_p1 }
   0x8   : > { %p1019_p6 = scmp.ge.s32.totalorder %s1291_s20, 2 }
   0xa   : > { %177 = sbr.rel (%p1019_p6) target bundleno = 27 (0x1b), region = 32 }
   0xf   : > { %180 = sbr.rel (!%p31_p4) target bundleno = 27 (0x1b), region = 36  ;;  %s182_s27 = sand.u32 (%p31_p4), 1, %s1287_s19  }
  0x10   : > { %s1068_s28 = sshll.u32 (%p31_p4), %s1291_s20, 4  ;;  %s1020_s29 = sshll.u32 (%p31_p4), %s182_s27, 6 }
  0x11   : > { %s187_s7 = scalar_lea.vmem (%p31_p4), %s1582_s0, %s1068_s28  ;;  %s184_s8 = scalar_lea.vmem (%p31_p4), [#allocation2], %s1020_s29 }
  0x12   : > { %v200_v0 = vld [vmem:[%s187_s7] sm:$0xff] (%p31_p4)  ;;  %v202_v1 = vld [vmem:[%s187_s7 + $0x8] sm:$0xff] (%p31_p4) }
  0x13   : > { %v204_v2 = vld [vmem:[%s187_s7 + $0x20] sm:$0xff] (%p31_p4)  ;;  %201 = vst [vmem:[%s184_s8] sm:$0xff] (%p31_p4), %v200_v0  ;;  %v206_v3 = vld [vmem:[%s187_s7 + $0x28] sm:$0xff] (%p31_p4) }
  0x14   : > { %203 = vst [vmem:[%s184_s8 + $0x8] sm:$0xff] %v202_v1  ;;  %v208_v4 = vld [vmem:[%s187_s7 + $0x40] sm:$0xff]  ;;  %v210_v5 = vld [vmem:[%s187_s7 + $0x48] sm:$0xff] }
  0x15   : > { %205 = vst [vmem:[%s184_s8 + $0x10] sm:$0xff] %v204_v2  ;;  %v212_v6 = vld [vmem:[%s187_s7 + $0x60] sm:$0xff]  ;;  %v214_v7 = vld [vmem:[%s187_s7 + $0x68] sm:$0xff] }
  0x16   : > { %207 = vst [vmem:[%s184_s8 + $0x18] sm:$0xff] %v206_v3 }
  0x17   : > { %209 = vst [vmem:[%s184_s8 + $0x20] sm:$0xff] %v208_v4 }
  0x18   : > { %211 = vst [vmem:[%s184_s8 + $0x28] sm:$0xff] %v210_v5 }
  0x19   : > { %213 = vst [vmem:[%s184_s8 + $0x30] sm:$0xff] %v212_v6 }
  0x1a   : > { %215 = vst [vmem:[%s184_s8 + $0x38] sm:$0xff] %v214_v7 }
  0x1b PF: > { %p1023_p7 = scmp.ge.s32.totalorder %s1291_s20, 1  ;;  %p220_p8 = scmp.lt.s32.totalorder %s1291_s20, 3 }
  0x1d   : > { %p221_p9 = pnand %p1023_p7, %p220_p8 }
  0x1e   : > { %s227_s9 = sand.u32 (!%p221_p9), 1, %s1283_s18   ;;  %s1293_s12 = smov (!%p221_p9), 127  }
  0x1f   : > { %224 = sbr.rel (%p221_p9) target bundleno = 548 (0x224), region = 59  ;;  %s1024_s10 = sshll.u32 (!%p221_p9), %s227_s9, 6 }
  0x20   : > { %s229_s11 = scalar_lea.vmem (!%p221_p9), [#allocation2], %s1024_s10  ;;  %s1294_s13 = smov (!%p221_p9), 126  }
  0x21   : > { %s1295_s14 = smov (!%p221_p9), 118   ;;  %s1296_s15 = smov (!%p221_p9), 117  }
  0x22   : > { %s1297_s16 = smov (!%p221_p9), 108   ;;  %s1298_s17 = smov (!%p221_p9), 107  }
  0x23   : > { %s1299_s23 = smov (!%p221_p9), 116   ;;  %s1300_s24 = smov (!%p221_p9), 106  }
  0x24   : > { %v1377_v8 = vld [vmem:[%s229_s11 + $0x30] sm:$0xff]  ;;  %v1379_v9 = vld [vmem:[%s229_s11 + $0x38] sm:$0xff]  ;;  %v1388_v15 = vld [vmem:[%s229_s11 + $0x20] sm:$0xff]  ;;  %vm386_vm0 = vcmask 1031168   ;;  %vm308_vm1 = vcmask 261120   ;;  %vm299_vm2 = vcmask 1039360  }
  0x25   : > { %v1381_v10 = vld [vmem:[%s229_s11 + $0x10] sm:$0xff]  ;;  %v268_v11 = vmax.f32 %v1377_v8, 0.0  ;;  %v269_v12 = vmax.f32 %v1379_v9, 0.0  ;;  %v1385_v13 = vld [vmem:[%s229_s11 + $0x18] sm:$0xff]  ;;  %v1391_v17 = vld [vmem:[%s229_s11 + $0x28] sm:$0xff]  ;;  %v266_v22 = vmax.f32 %v1388_v15, 0.0 }
  0x26   : > { %v264_v14 = vmax.f32 %v1381_v10, 0.0  ;;  %v265_v16 = vmax.f32 %v1385_v13, 0.0  ;;  %v1393_v19 = vld [vmem:[%s229_s11] sm:$0xff]  ;;  %v1395_v20 = vld [vmem:[%s229_s11 + $0x8] sm:$0xff]  ;;  %v267_v23 = vmax.f32 %v1391_v17, 0.0  ;;  %v1027_v56 = vld [vmem:[%s1583_s1 + $0x18] sm:$0xff] }
  0x27   : > { %v1106_v18 = vpack.i.bf16 %v269_v12, %v268_v11  ;;  %356 = vmatpush.msra.mxu2 %v268_v11  ;;  %v262_v24 = vmax.f32 %v1393_v19, 0.0  ;;  %v263_v25 = vmax.f32 %v1395_v20, 0.0  ;;  %v270_v37 = vld [vmem:[%s1583_s1] sm:$0xff]  ;;  %v271_v44 = vld [vmem:[%s1583_s1 + $0x8] sm:$0xff]  ;;  %vm445_vm3 = vcmask 965632   ;;  %v1026_v61 = vld [vmem:[%s1583_s1 + $0x10] sm:$0xff] }
  0x28   : > { %v1116_v21 = vpack.i.bf16 %v265_v16, %v264_v14  ;;  %v1111_v26 = vpack.i.bf16 %v267_v23, %v266_v22  ;;  %v1032_v23 = vld [vmem:[%s1583_s1 + $0x20] sm:$0xff]  ;;  %vm504_vm4 = vcmask 957440   ;;  %vm622_vm5 = vcmask 883712   ;;  %s1025_s10 = sshll.u32 %s227_s9, 5  ;;  %s1065_s18 = sshll.u32 (%p1362_p5), %s1016_s21, 3 }
  0x29   : > { %1107 = vrot.lane.b32.xlu0 %v1106_v18, %s1293_s12  ;;  %357 = vmatpush.msra.mxu2 %v266_v22  ;;  %v1121_v27 = vpack.i.bf16 %v263_v25, %v262_v24  ;;  %vm681_vm6 = vcmask 875520   ;;  %vm563_vm7 = vcmask 949248   ;;  %vm740_vm8 = vcmask 867328   ;;  %s252_s11 = scalar_lea.vmem [#allocation3], %s1025_s10 }
  0x2a   : > { %1117 = vrot.lane.b32.xlu1 %v1116_v21, %s1293_s12  ;;  %1127 = vrot.lane.b32.xlu2 %v1106_v18, %s1294_s13  ;;  %vm824_vm9 = vcmask 130048  }
  0x2b   : > { %358 = vmatpush.msra.mxu2 %v264_v14 }
  0x2d   : > { %359 = vmatpush.msra.mxu2 %v262_v24 }
  0x2e   : > { %1030 = vmatmul.msk.f32.vlgmr.msra.gmra.mxu2 %vm308_vm1, %v270_v37  ;;  %v1033_v37 = vld [vmem:[%s1583_s1 + $0x28] sm:$0xff] }
  0x31   : > { %1112 = vrot.lane.b32.xlu0 %v1111_v26, %s1293_s12 }
  0x32   : > { %1122 = vrot.lane.b32.xlu1 %v1121_v27, %s1293_s12  ;;  %1132 = vrot.lane.b32.xlu2 %v1111_v26, %s1294_s13 }
  0x36   : > { %1031 = vmatmul.msk.f32.gmra.mxu2 %vm308_vm1, %v271_v44 }
  0x39   : > { %1137 = vrot.lane.b32.xlu0 %v1106_v18, %s1295_s14 }
  0x3a   : > { %1142 = vrot.lane.b32.xlu1 %v1116_v21, %s1294_s13  ;;  %1147 = vrot.lane.b32.xlu2 %v1111_v26, %s1295_s14 }
  0x41   : > { %1152 = vrot.lane.b32.xlu0 %v1121_v27, %s1294_s13  ;;  %s914_s13 = scalar_lea.vmem (%p1362_p5), %s1587_s5, %s1065_s18 }
  0x42   : > { %1157 = vrot.lane.b32.xlu1 %v1116_v21, %s1295_s14  ;;  %1162 = vrot.lane.b32.xlu2 %v1121_v27, %s1295_s14 }
  0x49   : > { %1167 = vrot.lane.b32.xlu0 %v1106_v18, %s1296_s15 }
  0x4a   : > { %1172 = vrot.lane.b32.xlu1 %v1111_v26, %s1296_s15  ;;  %1177 = vrot.lane.b32.xlu2 %v1116_v21, %s1296_s15 }
  0x51   : > { %1182 = vrot.lane.b32.xlu0 %v1121_v27, %s1296_s15 }
  0x52   : > { %1187 = vrot.lane.b32.xlu1 %v1106_v18, %s1297_s16  ;;  %1192 = vrot.lane.b32.xlu2 %v1111_v26, %s1297_s16 }
  0x59   : > { %1197 = vrot.lane.b32.xlu0 %v1106_v18, %s1298_s17 }
  0x5a   : > { %1202 = vrot.lane.b32.xlu1 %v1106_v18, %s1299_s23  ;;  %1207 = vrot.lane.b32.xlu2 %v1116_v21, %s1297_s16 }
  0x61   : > { %1212 = vrot.lane.b32.xlu0 %v1111_v26, %s1298_s17 }
  0x62   : > { %1217 = vrot.lane.b32.xlu1 %v1111_v26, %s1299_s23  ;;  %1222 = vrot.lane.b32.xlu2 %v1121_v27, %s1297_s16 }
  0x69   : > { %1227 = vrot.lane.b32.xlu0 %v1116_v21, %s1298_s17 }
  0x6a   : > { %1232 = vrot.lane.b32.xlu1 %v1116_v21, %s1299_s23  ;;  %1237 = vrot.lane.b32.xlu2 %v1121_v27, %s1298_s17 }
  0x71   : > { %1242 = vrot.lane.b32.xlu0 %v1121_v27, %s1299_s23 }
  0x72   : > { %1247 = vrot.lane.b32.xlu1 %v1106_v18, %s1300_s24  ;;  %1252 = vrot.lane.b32.xlu2 %v1111_v26, %s1300_s24 }
  0x79   : > { %1257 = vrot.lane.b32.xlu0 %v1116_v21, %s1300_s24 }
  0x7a   : > { %1262 = vrot.lane.b32.xlu1 %v1121_v27, %s1300_s24  ;;  %v1036_v27 = vld [vmem:[%s1583_s1 + $0x30] sm:$0xff] }
  0x84   : > { %v1128_v28 = vpop.permute.xlu2 %1127 }
  0x85   : > { %v1130_v29 = vunpack.i.h.bf16 %v1128_v28  ;;  %v1129_v30 = vunpack.i.l.bf16 %v1128_v28 }
  0x87   : > { %v390_v31 = vsel %vm386_vm0, %v1129_v30, %v1130_v29 }
  0x88   : > { %413 = vmatpush.msrb.mxu2 %v390_v31 }
  0x8c   : > { %v1133_v32 = vpop.permute.xlu2 %1132 }
  0x8d   : > { %v1135_v33 = vunpack.i.h.bf16 %v1133_v32  ;;  %v1134_v34 = vunpack.i.l.bf16 %v1133_v32 }
  0x8f   : > { %v389_v35 = vsel %vm386_vm0, %v1134_v34, %v1135_v33 }
  0x90   : > { %414 = vmatpush.msrb.mxu2 %v389_v35 }
  0x94   : > { %v1148_v36 = vpop.permute.xlu2 %1147 }
  0x95   : > { %v1150_v58 = vunpack.i.h.bf16 %v1148_v36  ;;  %v1149_v59 = vunpack.i.l.bf16 %v1148_v36 }
  0x97   : > { %v448_v4 = vsel %vm445_vm3, %v1149_v59, %v1150_v58 }
  0x9b   : > { %v1108_v38 = vpop.permute.xlu0 %1107 }
  0x9c   : > { %v1110_v39 = vunpack.i.h.bf16 %v1108_v38  ;;  %v1109_v40 = vunpack.i.l.bf16 %v1108_v38  ;;  %v1118_v41 = vpop.permute.xlu1 %1117  ;;  %v1163_v42 = vpop.permute.xlu2 %1162 }
  0x9d   : > { %v1120_v46 = vunpack.i.h.bf16 %v1118_v41  ;;  %v1119_v47 = vunpack.i.l.bf16 %v1118_v41  ;;  %v1165_v11 = vunpack.i.h.bf16 %v1163_v42  ;;  %v1164_v12 = vunpack.i.l.bf16 %v1163_v42  ;;  %v1037_v41 = vld [vmem:[%s1583_s1 + $0x38] sm:$0xff] }
  0x9e   : > { %v303_v43 = vsel %vm299_vm2, %v1109_v40, %v1110_v39 }
  0x9f   : > { %327 = vmatpush.msra.mxu0 %v303_v43  ;;  %1069 = vmatpush.msra.mxu3 %v303_v43  ;;  %v301_v55 = vsel %vm299_vm2, %v1119_v47, %v1120_v46  ;;  %v446_v26 = vsel %vm445_vm3, %v1164_v12, %v1165_v11 }
  0xa3   : > { %v1113_v45 = vpop.permute.xlu0 %1112 }
  0xa4   : > { %v1115_v48 = vunpack.i.h.bf16 %v1113_v45  ;;  %v1114_v49 = vunpack.i.l.bf16 %v1113_v45  ;;  %v1123_v50 = vpop.permute.xlu1 %1122  ;;  %v1417_v54 = vpop.permute.xlu2 %1177 }
  0xa5   : > { %v1125_v51 = vunpack.i.h.bf16 %v1123_v50  ;;  %v1124_v52 = vunpack.i.l.bf16 %v1123_v50  ;;  %v1180_v33 = vunpack.i.h.bf16 %v1417_v54  ;;  %v1179_v34 = vunpack.i.l.bf16 %v1417_v54 }
  0xa6   : > { %v302_v53 = vsel %vm299_vm2, %v1114_v49, %v1115_v48 }
  0xa7   : > { %328 = vmatpush.msra.mxu0 %v302_v53  ;;  %1070 = vmatpush.msra.mxu3 %v302_v53  ;;  %v300_v57 = vsel %vm299_vm2, %v1124_v52, %v1125_v51  ;;  %v506_v40 = vsel %vm504_vm4, %v1179_v34, %v1180_v33  ;;  %v1040_v53 = vld [vmem:[%s1583_s1 + $0x40] sm:$0xff] }
  0xa9   : > { %329 = vmatpush.msra.mxu0 %v301_v55  ;;  %1071 = vmatpush.msra.mxu3 %v301_v55 }
  0xab   : > { %v1138_v60 = vpop.permute.xlu0 %1137  ;;  %330 = vmatpush.msra.mxu0 %v300_v57  ;;  %1072 = vmatpush.msra.mxu3 %v300_v57 }
  0xac   : > { %v1140_v62 = vunpack.i.h.bf16 %v1138_v60  ;;  %v1139_v63 = vunpack.i.l.bf16 %v1138_v60  ;;  %v1143_v0 = vpop.permute.xlu1 %1142  ;;  %1029 = vmatmul.msk.f32.vlgmr.msra.gmra.mxu3 %vm308_vm1, %v1027_v56  ;;  %1028 = vmatmul.msk.f32.vlgmr.msra.gmra.mxu0 %vm308_vm1, %v1026_v61  ;;  %v1193_v6 = vpop.permute.xlu2 %1192 }
  0xad   : > { %v1145_v1 = vunpack.i.h.bf16 %v1143_v0  ;;  %v1144_v2 = vunpack.i.l.bf16 %v1143_v0  ;;  %v1195_v43 = vunpack.i.h.bf16 %v1193_v6  ;;  %v1194_v44 = vunpack.i.l.bf16 %v1193_v6 }
  0xae   : > { %v449_v3 = vsel %vm445_vm3, %v1139_v63, %v1140_v62 }
  0xaf   : > { %472 = vmatpush.msrb.mxu3 %v449_v3  ;;  %v388_v5 = vsel %vm386_vm0, %v1144_v2, %v1145_v1  ;;  %v625_v56 = vsel %vm622_vm5, %v1194_v44, %v1195_v43  ;;  %v1048_v1 = vld [vmem:[%s1583_s1 + $0x60] sm:$0xff] }
  0xb0   : > { %415 = vmatpush.msrb.mxu2 %v388_v5 }
  0xb1   : > { %473 = vmatpush.msrb.mxu3 %v448_v4  ;;  %v1041_v4 = vld [vmem:[%s1583_s1 + $0x48] sm:$0xff] }
  0xb3   : > { %v1153_v7 = vpop.permute.xlu0 %1152 }
  0xb4   : > { %v1155_v14 = vunpack.i.h.bf16 %v1153_v7  ;;  %v1154_v16 = vunpack.i.l.bf16 %v1153_v7  ;;  %v1158_v18 = vpop.permute.xlu1 %1157  ;;  %v1208_v28 = vpop.permute.xlu2 %1207 }
  0xb5   : > { %v1160_v21 = vunpack.i.h.bf16 %v1158_v18  ;;  %v1159_v22 = vunpack.i.l.bf16 %v1158_v18  ;;  %v1210_v51 = vunpack.i.h.bf16 %v1208_v28  ;;  %v1209_v52 = vunpack.i.l.bf16 %v1208_v28  ;;  %v781_v28 = vld [vmem:[%s1584_s2 + $0x8] sm:$0xff] }
  0xb6   : > { %v387_v24 = vsel %vm386_vm0, %v1154_v16, %v1155_v14  ;;  %v1049_v16 = vld [vmem:[%s1583_s1 + $0x68] sm:$0xff] }
  0xb7   : > { %416 = vmatpush.msrb.mxu2 %v387_v24  ;;  %v447_v25 = vsel %vm445_vm3, %v1159_v22, %v1160_v21  ;;  %v624_v59 = vsel %vm622_vm5, %v1209_v52, %v1210_v51 }
  0xb8   : > { %474 = vmatpush.msrb.mxu3 %v447_v25  ;;  %1034 = vmatmul.msk.f32.vlgmr.msrb.gmra.mxu2 %vm308_vm1, %v1032_v23 }
  0xba   : > { %475 = vmatpush.msrb.mxu3 %v446_v26 }
  0xbb   : > { %v1168_v29 = vpop.permute.xlu0 %1167  ;;  %1038 = vmatmul.msk.f32.vlgmr.msrb.gmra.mxu3 %vm308_vm1, %v1036_v27  ;;  %v780_v27 = vld [vmem:[%s1584_s2] sm:$0xff] }
  0xbc   : > { %v1170_v30 = vunpack.i.h.bf16 %v1168_v29  ;;  %v1169_v31 = vunpack.i.l.bf16 %v1168_v29  ;;  %v1173_v32 = vpop.permute.xlu1 %1172  ;;  %v1223_v48 = vpop.permute.xlu2 %1222 }
  0xbd   : > { %v1175_v35 = vunpack.i.h.bf16 %v1173_v32  ;;  %v1174_v36 = vunpack.i.l.bf16 %v1173_v32  ;;  %v1225_v57 = vunpack.i.h.bf16 %v1223_v48  ;;  %v1224_v58 = vunpack.i.l.bf16 %v1223_v48 }
  0xbe   : > { %v508_v38 = vsel %vm504_vm4, %v1169_v31, %v1170_v30  ;;  %v1301_v30 = vmov 0  }
  0xbf   : > { %531 = vmatpush.msrb.mxu0 %v508_v38  ;;  %v507_v39 = vsel %vm504_vm4, %v1174_v36, %v1175_v35  ;;  %v623_v61 = vsel %vm622_vm5, %v1224_v58, %v1225_v57  ;;  %1267 = vset.pattern.permute.xlu0 %v1301_v30 }
  0xc0   : > { %1035 = vmatmul.msk.f32.gmra.mxu2 %vm308_vm1, %v1033_v37  ;;  %1266 = vset.pattern.permute.xlu2 %v1301_v30 }
  0xc1   : > { %532 = vmatpush.msrb.mxu0 %v507_v39  ;;  %784 = vperm.xlu0 %1267, %v780_v27   ;;  %v1052_v39 = vld [vmem:[%s1583_s1 + $0x70] sm:$0xff] }
  0xc2   : > { %789 = vperm.xlu2 %1266, %v781_v28   ;;  %1268 = vset.pattern.permute.xlu1 %v1301_v30 }
  0xc3   : > { %v1183_v42 = vpop.permute.xlu0 %1182  ;;  %533 = vmatpush.msrb.mxu0 %v506_v40  ;;  %1039 = vmatmul.msk.f32.gmra.mxu3 %vm308_vm1, %v1037_v41  ;;  %v801_v41 = vld [vmem:[%s1586_s4 + $0x8] sm:$0xff] }
  0xc4   : > { %v1185_v45 = vunpack.i.h.bf16 %v1183_v42  ;;  %v1184_v46 = vunpack.i.l.bf16 %v1183_v42  ;;  %v1188_v47 = vpop.permute.xlu1 %1187  ;;  %v1238_v23 = vpop.permute.xlu2 %1237 }
  0xc5   : > { %v1190_v49 = vunpack.i.h.bf16 %v1188_v47  ;;  %v1189_v50 = vunpack.i.l.bf16 %v1188_v47  ;;  %v1240_v25 = vunpack.i.h.bf16 %v1238_v23  ;;  %v1239_v26 = vunpack.i.l.bf16 %v1238_v23 }
  0xc6   : > { %v505_v54 = vsel %vm504_vm4, %v1184_v46, %v1185_v45 }
  0xc7   : > { %534 = vmatpush.msrb.mxu0 %v505_v54  ;;  %v626_v55 = vsel %vm622_vm5, %v1189_v50, %v1190_v49  ;;  %v682_v37 = vsel %vm681_vm6, %v1239_v26, %v1240_v25  ;;  %v1044_v50 = vld [vmem:[%s1583_s1 + $0x50] sm:$0xff]  ;;  %v1053_v54 = vld [vmem:[%s1583_s1 + $0x78] sm:$0xff] }
  0xc8   : > { %649 = vmatpush.msra.mxu2 %v626_v55  ;;  %1042 = vmatmul.msk.f32.vlgmr.msrb.gmra.mxu0 %vm308_vm1, %v1040_v53 }
  0xc9   : > { %874 = vrot.lane.b32.xlu0 %v1393_v19, %s1296_s15  ;;  %v803_v19 = vld [vmem:[%s1586_s4 + $0x18] sm:$0xff] }
  0xca   : > { %650 = vmatpush.msra.mxu2 %v625_v56  ;;  %811 = vperm.xlu2 %1266, %v801_v41  }
  0xcb   : > { %v1198_v60 = vpop.permute.xlu0 %1197 }
  0xcc   : > { %v1200_v62 = vunpack.i.h.bf16 %v1198_v60  ;;  %v1199_v63 = vunpack.i.l.bf16 %v1198_v60  ;;  %v1203_v0 = vpop.permute.xlu1 %1202  ;;  %651 = vmatpush.msra.mxu2 %v624_v59  ;;  %v1253_v40 = vpop.permute.xlu2 %1252 }
  0xcd   : > { %v1205_v2 = vunpack.i.h.bf16 %v1203_v0  ;;  %v1204_v3 = vunpack.i.l.bf16 %v1203_v0  ;;  %v1255_v43 = vunpack.i.h.bf16 %v1253_v40  ;;  %v1254_v44 = vunpack.i.l.bf16 %v1253_v40  ;;  %v1056_v0 = vld [vmem:[%s1583_s1 + $0x80] sm:$0xff] }
  0xce   : > { %v685_v5 = vsel %vm681_vm6, %v1199_v63, %v1200_v62  ;;  %652 = vmatpush.msra.mxu2 %v623_v61  ;;  %v1045_v61 = vld [vmem:[%s1583_s1 + $0x58] sm:$0xff] }
  0xcf   : > { %708 = vmatpush.msra.mxu3 %v685_v5  ;;  %v567_v6 = vsel %vm563_vm7, %v1204_v3, %v1205_v2  ;;  %1050 = vmatmul.msk.f32.vlgmr.msra.gmra.mxu2 %vm308_vm1, %v1048_v1  ;;  %v743_v53 = vsel %vm740_vm8, %v1254_v44, %v1255_v43  ;;  %v361_v1 = vpop.f32.mrf.mxu2 }
  0xd0   : > { %590 = vmatpush.msra.mxu1 %v567_v6  ;;  %1043 = vmatmul.msk.f32.gmra.mxu0 %vm308_vm1, %v1041_v4 }
  0xd1   : > { %880 = vrot.lane.b32.xlu0 %v1385_v13, %s1296_s15  ;;  %v1057_v13 = vld [vmem:[%s1583_s1 + $0x88] sm:$0xff] }
  0xd2   : > { %821 = vperm.xlu2 %1266, %v803_v19  }
  0xd3   : > { %v1213_v7 = vpop.permute.xlu0 %1212 }
  0xd4   : > { %v1215_v11 = vunpack.i.h.bf16 %v1213_v7  ;;  %v1214_v12 = vunpack.i.l.bf16 %v1213_v7  ;;  %v1218_v14 = vpop.permute.xlu1 %1217 }
  0xd5   : > { %v1220_v18 = vunpack.i.h.bf16 %v1218_v14  ;;  %v1219_v21 = vunpack.i.l.bf16 %v1218_v14 }
  0xd6   : > { %v684_v22 = vsel %vm681_vm6, %v1214_v12, %v1215_v11 }
  0xd7   : > { %709 = vmatpush.msra.mxu3 %v684_v22  ;;  %v566_v24 = vsel %vm563_vm7, %v1219_v21, %v1220_v18  ;;  %1051 = vmatmul.msk.f32.gmra.mxu2 %vm308_vm1, %v1049_v16  ;;  %v364_v2 = vpop.f32.mrf.mxu2 }
  0xd8   : > { %591 = vmatpush.msra.mxu1 %v566_v24 }
  0xd9   : > { %886 = vrot.lane.b32.xlu0 %v1377_v8, %s1296_s15  ;;  %v800_v8 = vld [vmem:[%s1586_s4] sm:$0xff] }
  0xda   : > { %878 = vrot.lane.b32.xlu2 %v1381_v10, %s1296_s15  ;;  %806 = vperm.xlu1 %1268, %v800_v8  }
  0xdb   : > { %v1228_v29 = vpop.permute.xlu0 %1227 }
  0xdc   : > { %v1230_v31 = vunpack.i.h.bf16 %v1228_v29  ;;  %v1229_v32 = vunpack.i.l.bf16 %v1228_v29  ;;  %v1233_v33 = vpop.permute.xlu1 %1232 }
  0xdd   : > { %v1235_v34 = vunpack.i.h.bf16 %v1233_v33  ;;  %v1234_v35 = vunpack.i.l.bf16 %v1233_v33 }
  0xde   : > { %v683_v36 = vsel %vm681_vm6, %v1229_v32, %v1230_v31 }
  0xdf   : > { %710 = vmatpush.msra.mxu3 %v683_v36  ;;  %v565_v38 = vsel %vm563_vm7, %v1234_v35, %v1235_v34 }
  0xe0   : > { %592 = vmatpush.msra.mxu1 %v565_v38 }
  0xe1   : > { %711 = vmatpush.msra.mxu3 %v682_v37 }
  0xe2   : > { %1054 = vmatmul.msk.f32.vlgmr.msra.gmra.mxu3 %vm308_vm1, %v1052_v39  ;;  %884 = vrot.lane.b32.xlu2 %v1391_v17, %s1296_s15  ;;  %v802_v17 = vld [vmem:[%s1586_s4 + $0x10] sm:$0xff] }
  0xe3   : > { %v1243_v42 = vpop.permute.xlu0 %1242  ;;  %816 = vperm.xlu1 %1268, %v802_v17  }
  0xe4   : > { %v1245_v45 = vunpack.i.h.bf16 %v1243_v42  ;;  %v1244_v46 = vunpack.i.l.bf16 %v1243_v42  ;;  %v1248_v47 = vpop.permute.xlu1 %1247 }
  0xe5   : > { %v1250_v48 = vunpack.i.h.bf16 %v1248_v47  ;;  %v1249_v49 = vunpack.i.l.bf16 %v1248_v47  ;;  %v796_v47 = vld [vmem:[%s1585_s3] sm:$0xff] }
  0xe6   : > { %v564_v51 = vsel %vm563_vm7, %v1244_v46, %v1245_v45 }
  0xe7   : > { %593 = vmatpush.msra.mxu1 %v564_v51  ;;  %v744_v52 = vsel %vm740_vm8, %v1249_v49, %v1250_v48  ;;  %v798_v48 = vld [vmem:[%s1585_s3 + $0x10] sm:$0xff] }
  0xe8   : > { %1046 = vmatmul.msk.f32.vlgmr.msra.gmra.mxu1 %vm308_vm1, %v1044_v50  ;;  %767 = vmatpush.msra.mxu0 %v744_v52 }
  0xea   : > { %768 = vmatpush.msra.mxu0 %v743_v53  ;;  %1055 = vmatmul.msk.f32.gmra.mxu3 %vm308_vm1, %v1053_v54 }
  0xeb   : > { %v1258_v55 = vpop.permute.xlu0 %1257  ;;  %876 = vrot.lane.b32.xlu1 %v1395_v20, %s1296_s15 }
  0xec   : > { %v1260_v56 = vunpack.i.h.bf16 %v1258_v55  ;;  %v1259_v57 = vunpack.i.l.bf16 %v1258_v55  ;;  %v1263_v58 = vpop.permute.xlu1 %1262 }
  0xed   : > { %v1265_v59 = vunpack.i.h.bf16 %v1263_v58  ;;  %v1264_v60 = vunpack.i.l.bf16 %v1263_v58 }
  0xee   : > { %v742_v62 = vsel %vm740_vm8, %v1259_v57, %v1260_v56 }
  0xef   : > { %769 = vmatpush.msra.mxu0 %v742_v62  ;;  %v741_v63 = vsel %vm740_vm8, %v1264_v60, %v1265_v59 }
  0xf0   : > { %1047 = vmatmul.msk.f32.gmra.mxu1 %vm308_vm1, %v1045_v61 }
  0xf1   : > { %770 = vmatpush.msra.mxu0 %v741_v63 }
  0xf2   : > { %1058 = vmatmul.msk.f32.vlgmr.msra.gmra.mxu0 %vm308_vm1, %v1056_v0 }
  0xf3   : > { %882 = vrot.lane.b32.xlu1 %v1388_v15, %s1296_s15  ;;  %v797_v15 = vld [vmem:[%s1585_s3 + $0x8] sm:$0xff] }
  0xfa   : > { %1059 = vmatmul.msk.f32.gmra.mxu0 %vm308_vm1, %v1057_v13 }
  0xfb   : > { %888 = vrot.lane.b32.xlu1 %v1379_v9, %s1296_s15  ;;  %v799_v9 = vld [vmem:[%s1585_s3 + $0x18] sm:$0xff] }
 0x11c   : > { %v790_v43 = vpop.permute.xlu2 %789 }
 0x124   : > { %v812_v50 = vpop.permute.xlu2 %811 }
 0x129   : > { %v332_v4 = vpop.f32.mrf.mxu0 }
 0x12a   : > { %v362_v11 = vadd.f32 %v361_v1, %v332_v4 }
 0x12c   : > { %v822_v52 = vpop.permute.xlu2 %821 }
 0x12f   : > { %v335_v3 = vpop.f32.mrf.mxu3 }
 0x130   : > { %v365_v12 = vadd.f32 %v364_v2, %v335_v3 }
 0x133   : > { %v785_v40 = vpop.permute.xlu0 %784 }
 0x134   : > { %v879_v58 = vpop.permute.xlu2 %878 }
 0x13b   : > { %v418_v5 = vpop.f32.mrf.mxu2  ;;  %v875_v53 = vpop.permute.xlu0 %874 }
 0x13c   : > { %v424_v16 = vadd.f32 %v418_v5, %v362_v11  ;;  %v885_v13 = vpop.permute.xlu2 %884 }
 0x13e   : > { %v477_v6 = vpop.f32.mrf.mxu3 }
 0x13f   : > { %v483_v23 = vadd.f32 %v477_v6, %v424_v16 }
 0x143   : > { %v421_v7 = vpop.f32.mrf.mxu2  ;;  %v881_v59 = vpop.permute.xlu0 %880 }
 0x144   : > { %v425_v18 = vadd.f32 %v421_v7, %v365_v12  ;;  %v891_v61 = vsel %vm504_vm4, %v879_v58, %v881_v59 }
 0x145   : > { %v536_v10 = vpop.f32.mrf.mxu0 }
 0x146   : > { %v480_v14 = vpop.f32.mrf.mxu3  ;;  %v542_v27 = vadd.f32 %v536_v10, %v483_v23 }
 0x147   : > { %v484_v25 = vadd.f32 %v480_v14, %v425_v18 }
 0x14b   : > { %v887_v5 = vpop.permute.xlu0 %886 }
 0x14c   : > { %v807_v49 = vpop.permute.xlu1 %806 }
 0x14d   : > { %v539_v24 = vpop.f32.mrf.mxu0 }
 0x14e   : > { %v543_v28 = vadd.f32 %v539_v24, %v484_v25 }
 0x152   : > { %v654_v22 = vpop.f32.mrf.mxu2 }
 0x155   : > { %v817_v51 = vpop.permute.xlu1 %816 }
 0x15a   : > { %v657_v32 = vpop.f32.mrf.mxu2 }
 0x15d   : > { %v877_v54 = vpop.permute.xlu1 %876 }
 0x15e   : > { %v890_v55 = vsel %vm504_vm4, %v875_v53, %v877_v54 }
 0x165   : > { %v595_v21 = vpop.f32.mrf.mxu1  ;;  %v713_v26 = vpop.f32.mrf.mxu3 }
 0x166   : > { %v601_v29 = vadd.f32 %v595_v21, %v542_v27  ;;  %v883_v0 = vpop.permute.xlu1 %882 }
 0x167   : > { %v892_v2 = vsel %vm504_vm4, %v883_v0, %v885_v13 }
 0x168   : > { %v660_v34 = vadd.f32 %v654_v22, %v601_v29 }
 0x16a   : > { %v719_v37 = vadd.f32 %v713_v26, %v660_v34 }
 0x16d   : > { %v598_v30 = vpop.f32.mrf.mxu1  ;;  %v716_v36 = vpop.f32.mrf.mxu3 }
 0x16e   : > { %v602_v31 = vadd.f32 %v598_v30, %v543_v28  ;;  %v889_v6 = vpop.permute.xlu1 %888 }
 0x16f   : > { %v772_v33 = vpop.f32.mrf.mxu0  ;;  %v893_v10 = vsel %vm504_vm4, %v887_v5, %v889_v6 }
 0x170   : > { %v661_v35 = vadd.f32 %v657_v32, %v602_v31  ;;  %v778_v38 = vadd.f32 %v772_v33, %v719_v37 }
 0x172   : > { %v720_v39 = vadd.f32 %v716_v36, %v661_v35  ;;  %v792_v44 = vadd.f32 %v785_v40, %v778_v38 }
 0x174   : > { %v794_v20 = vmax.f32 %v792_v44, 0.0 }
 0x177   : > { %v775_v41 = vpop.f32.mrf.mxu0 }
 0x178   : > { %v779_v42 = vadd.f32 %v775_v41, %v720_v39 }
 0x17a   : > { %v793_v45 = vadd.f32 %v790_v43, %v779_v42 }
 0x17c   : > { %v795_v46 = vmax.f32 %v793_v45, 0.0 }
 0x17e   : > { %851 = vmatpush.msrb.mxu1 %v795_v46 }
 0x180   : > { %852 = vmatpush.msrb.mxu1 %v794_v20 }
 0x181   : > { %1060 = vmatmul.msk.f32.vlgmr.msrb.gmra.mxu1 %vm824_vm9, %v796_v47 }
 0x189   : > { %1061 = vmatmul.msk.f32.gmra.mxu1 %vm824_vm9, %v797_v15 }
 0x191   : > { %1062 = vmatmul.msk.f32.gmra.mxu1 %vm824_vm9, %v798_v48 }
 0x199   : > { %1063 = vmatmul.msk.f32.gmra.mxu1 %vm824_vm9, %v799_v9 }
 0x1fe   : > { %v854_v19 = vpop.f32.mrf.mxu1 }
 0x1ff   : > { %v855_v56 = vadd.f32 %v854_v19, %v807_v49 }
 0x201   : > { %v898_v57 = vadd.f32 %v890_v55, %v855_v56 }
 0x203   : > { %902 = vst [vmem:[%s252_s11] sm:$0xff] %v898_v57 }
 0x206   : > { %v857_v60 = vpop.f32.mrf.mxu1 }
 0x207   : > { %v858_v62 = vadd.f32 %v857_v60, %v812_v50 }
 0x209   : > { %v899_v63 = vadd.f32 %v891_v61, %v858_v62 }
 0x20a   : > { %v949_v12 = vld [vmem:[%s252_s11] sm:$0xff] (%p1362_p5) }
 0x20b   : > { %903 = vst [vmem:[%s252_s11 + $0x8] sm:$0xff] %v899_v63 }
 0x20c   : > { %950 = vst [vmem:[%s914_s13] sm:$0xff] (%p1362_p5), %v949_v12 }
 0x20e   : > { %v860_v1 = vpop.f32.mrf.mxu1 }
 0x20f   : > { %v861_v3 = vadd.f32 %v860_v1, %v817_v51 }
 0x211   : > { %v900_v4 = vadd.f32 %v892_v2, %v861_v3 }
 0x212   : > { %v951_v14 = vld [vmem:[%s252_s11 + $0x8] sm:$0xff] (%p1362_p5) }
 0x213   : > { %904 = vst [vmem:[%s252_s11 + $0x10] sm:$0xff] %v900_v4 }
 0x214   : > { %952 = vst [vmem:[%s914_s13 + $0x10] sm:$0xff] (%p1362_p5), %v951_v14 }
 0x216   : > { %v863_v8 = vpop.f32.mrf.mxu1 }
 0x217   : > { %v864_v7 = vadd.f32 %v863_v8, %v822_v52  ;;  %912 = sbr.rel (!%p1362_p5) target bundleno = 548 (0x224), region = 67 }
 0x219   : > { %v901_v11 = vadd.f32 %v893_v10, %v864_v7 }
 0x21a   : > { %v953_v16 = vld [vmem:[%s252_s11 + $0x10] sm:$0xff] (%p1362_p5) }
 0x21b   : > { %905 = vst [vmem:[%s252_s11 + $0x18] sm:$0xff] %v901_v11 }
 0x21c   : > { %954 = vst [vmem:[%s914_s13 + $0x20] sm:$0xff] %v953_v16 }
 0x222   : > { %v955_v18 = vld [vmem:[%s252_s11 + $0x18] sm:$0xff] }
 0x223   : > { %956 = vst [vmem:[%s914_s13 + $0x30] sm:$0xff] %v955_v18 }
 0x224 PF: > { %p12_p10 = scmp.ge.s32.totalorder %s1349_s22, 4   ;;  %s1589_s18 = smov %s1287_s19 }
 0x225   : > { %s1590_s19 = smov %s1360_s25  ;;  %s1591_s20 = smov %s1349_s22 }
 0x226   :  { %14 = sbr.rel (!%p12_p10) target bundleno = 2 (0x2), region = 144 }

// kernel: decoder_forward.8
= control target key start
LH: loop header
LB: loop body
LE: loop exit
PB: predicated region body
PF: predicated region fallthrough
CT: control target
= control target key end

     0   :  { %s1477_s12 = smov 0   ;;  %s1479_s13 = smov 0   ;;  %s1783_s0 = inlined_call_operand.vmem [shape: f32[32,512], index: 0, kind: input, shape index: {}]   ;;  %s1784_s1 = inlined_call_operand.vmem [shape: f32[16,16,32], index: 1, kind: input, shape index: {}]   ;;  %s1785_s2 = inlined_call_operand.vmem [shape: f32[16,1], index: 2, kind: input, shape index: {}]   ;;  %s1786_s3 = inlined_call_operand.vmem [shape: f32[4,16,256], index: 3, kind: output, shape index: {}]  }
   0x1   :  { %s1481_s14 = smov 0  }
   0x2 LB: > { %s1145_s15 = sadd.s32 4294967295, %s1446_s14   ;;  %s1494_s16 = sadd.s32 1, %s1446_s14   ;;  %s1446_s14 = sphi %s1481_s14, %s1790_s14   ;;  %s1442_s13 = sphi %s1479_s13, %s1789_s13   ;;  %s1438_s12 = sphi %s1477_s12, %s1788_s12  }
   0x3   : > { %s17_s17 = ssub.s32 %s1446_s14, %s1494_s16  ;;  %s20_s18 = sadd.s32 1, %s1442_s13 }
   0x4   : > { %p18_p0 = scmp.eq.s32.totalorder %s17_s17, 0  ;;  %p27_p1 = scmp.ne.s32.totalorder %s1442_s13, %s1438_s12 }
   0x5   : > { %p28_p2 = scmp.eq.s32.totalorder %s1446_s14, 0  ;;  %p99_p3 = scmp.eq.s32.totalorder %s1145_s15, 1 }
   0x6   : > { %s1505_s19 = scalar_select %p18_p0, %s1442_s13, %s20_s18  }
   0x7   : > { %p29_p4 = por %p28_p2, %p27_p1  ;;  %p1507_p5 = por %p99_p3, %p27_p1 }
   0x8   : > { %p1148_p6 = scmp.ge.s32.totalorder %s1446_s14, 2 }
   0xa   : > { %127 = sbr.rel (%p1148_p6) target bundleno = 27 (0x1b), region = 24 }
   0xf   : > { %130 = sbr.rel (!%p29_p4) target bundleno = 27 (0x1b), region = 28  ;;  %s132_s21 = sand.u32 (%p29_p4), 1, %s1442_s13  }
  0x10   : > { %s1227_s22 = sshll.u32 (%p29_p4), %s1446_s14, 4  ;;  %s1149_s23 = sshll.u32 (%p29_p4), %s132_s21, 6 }
  0x11   : > { %s137_s26 = scalar_lea.vmem (%p29_p4), %s1783_s0, %s1227_s22  ;;  %s134_s27 = scalar_lea.vmem (%p29_p4), [#allocation2], %s1149_s23 }
  0x12   : > { %v150_v0 = vld [vmem:[%s137_s26] sm:$0xff] (%p29_p4)  ;;  %v152_v1 = vld [vmem:[%s137_s26 + $0x8] sm:$0xff] (%p29_p4) }
  0x13   : > { %v154_v2 = vld [vmem:[%s137_s26 + $0x20] sm:$0xff] (%p29_p4)  ;;  %151 = vst [vmem:[%s134_s27] sm:$0xff] (%p29_p4), %v150_v0  ;;  %v156_v3 = vld [vmem:[%s137_s26 + $0x28] sm:$0xff] (%p29_p4) }
  0x14   : > { %153 = vst [vmem:[%s134_s27 + $0x8] sm:$0xff] %v152_v1  ;;  %v158_v4 = vld [vmem:[%s137_s26 + $0x40] sm:$0xff]  ;;  %v160_v5 = vld [vmem:[%s137_s26 + $0x48] sm:$0xff] }
  0x15   : > { %155 = vst [vmem:[%s134_s27 + $0x10] sm:$0xff] %v154_v2  ;;  %v162_v6 = vld [vmem:[%s137_s26 + $0x60] sm:$0xff]  ;;  %v164_v7 = vld [vmem:[%s137_s26 + $0x68] sm:$0xff] }
  0x16   : > { %157 = vst [vmem:[%s134_s27 + $0x18] sm:$0xff] %v156_v3 }
  0x17   : > { %159 = vst [vmem:[%s134_s27 + $0x20] sm:$0xff] %v158_v4 }
  0x18   : > { %161 = vst [vmem:[%s134_s27 + $0x28] sm:$0xff] %v160_v5 }
  0x19   : > { %163 = vst [vmem:[%s134_s27 + $0x30] sm:$0xff] %v162_v6 }
  0x1a   : > { %165 = vst [vmem:[%s134_s27 + $0x38] sm:$0xff] %v164_v7 }
  0x1b PF: > { %p1152_p7 = scmp.ge.s32.totalorder %s1446_s14, 1  ;;  %p170_p8 = scmp.lt.s32.totalorder %s1446_s14, 3 }
  0x1d   : > { %p171_p9 = pnand %p1152_p7, %p170_p8 }
  0x1e   : > { %s177_s28 = sand.u32 (!%p171_p9), 1, %s1438_s12   ;;  %s1448_s4 = smov (!%p171_p9), 117  }
  0x1f   : > { %174 = sbr.rel (%p171_p9) target bundleno = 401 (0x191), region = 51  ;;  %s1520_s29 = sshll.u32 (!%p171_p9), %s177_s28, 6 }
  0x20   : > { %s179_s30 = scalar_lea.vmem (!%p171_p9), [#allocation2], %s1520_s29  ;;  %s1449_s5 = smov (!%p171_p9), 118  }
  0x21   : > { %s1450_s6 = smov (!%p171_p9), 127   ;;  %s1451_s7 = smov (!%p171_p9), 116  }
  0x22   : > { %s1452_s8 = smov (!%p171_p9), 126   ;;  %s1453_s9 = smov (!%p171_p9), 108  }
  0x23   : > { %s1454_s10 = smov (!%p171_p9), 107   ;;  %s1455_s11 = smov (!%p171_p9), 106  }
  0x24   : > { %v206_v8 = vld [vmem:[%s179_s30 + $0x30] sm:$0xff]  ;;  %v207_v9 = vld [vmem:[%s179_s30 + $0x38] sm:$0xff]  ;;  %v204_v13 = vld [vmem:[%s179_s30 + $0x20] sm:$0xff]  ;;  %vm246_vm0 = vcmask 261120   ;;  %vm324_vm1 = vcmask 965632   ;;  %vm383_vm2 = vcmask 957440  }
  0x25   : > { %v1271_v10 = vpack.i.bf16 %v207_v9, %v206_v8  ;;  %294 = vmatpush.msra.mxu1 %v206_v8  ;;  %v202_v11 = vld [vmem:[%s179_s30 + $0x10] sm:$0xff]  ;;  %v203_v12 = vld [vmem:[%s179_s30 + $0x18] sm:$0xff]  ;;  %v205_v15 = vld [vmem:[%s179_s30 + $0x28] sm:$0xff]  ;;  %vm237_vm3 = vcmask 1039360   ;;  %vm725_vm4 = vcmask 883712   ;;  %vm583_vm5 = vcmask 949248  }
  0x26   : > { %v1281_v14 = vpack.i.bf16 %v203_v12, %v202_v11  ;;  %v1266_v16 = vpack.i.bf16 %v205_v15, %v204_v13  ;;  %v200_v17 = vld [vmem:[%s179_s30] sm:$0xff]  ;;  %v201_v18 = vld [vmem:[%s179_s30 + $0x8] sm:$0xff]  ;;  %v1155_v12 = vld [vmem:[%s1784_s1 + $0x10] sm:$0xff]  ;;  %vm463_vm6 = vcmask 1031168   ;;  %vm784_vm7 = vcmask 875520   ;;  %s1748_s26 = scalar_lea.vmem [#allocation3], %s1520_s29 }
  0x27   : > { %1272 = vrot.lane.b32.xlu1 %v1271_v10, %s1448_s4  ;;  %1262 = vrot.lane.b32.xlu0 %v1271_v10, %s1449_s5  ;;  %v1296_v19 = vpack.i.bf16 %v201_v18, %v200_v17  ;;  %v208_v22 = vld [vmem:[%s1784_s1] sm:$0xff]  ;;  %v209_v24 = vld [vmem:[%s1784_s1 + $0x8] sm:$0xff]  ;;  %vm960_vm8 = vcmask 867328   ;;  %s1224_s29 = sshll.u32 (%p1507_p5), %s1145_s15, 3 }
  0x28   : > { %295 = vmatpush.msra.mxu1 %v204_v13  ;;  %1282 = vrot.lane.b32.xlu2 %v1281_v14, %s1449_s5  ;;  %v1161_v61 = vld [vmem:[%s1784_s1 + $0x20] sm:$0xff]  ;;  %v1162_v15 = vld [vmem:[%s1784_s1 + $0x28] sm:$0xff]  ;;  %s1027_s30 = scalar_lea.vmem (%p1507_p5), %s1786_s3, %s1224_s29 }
  0x29   : > { %v1169_v13 = vld [vmem:[%s1784_s1 + $0x40] sm:$0xff] }
  0x2a   : > { %296 = vmatpush.msra.mxu1 %v202_v11 }
  0x2c   : > { %297 = vmatpush.msra.mxu1 %v200_v17 }
  0x2d   : > { %1159 = vmatmul.msk.f32.vlgmr.msra.gmra.mxu1 %vm246_vm0, %v208_v22 }
  0x2f   : > { %1277 = vrot.lane.b32.xlu1 %v1271_v10, %s1450_s6  ;;  %1267 = vrot.lane.b32.xlu0 %v1266_v16, %s1449_s5 }
  0x30   : > { %1287 = vrot.lane.b32.xlu2 %v1266_v16, %s1448_s4 }
  0x35   : > { %1160 = vmatmul.msk.f32.gmra.mxu1 %vm246_vm0, %v209_v24 }
  0x37   : > { %1292 = vrot.lane.b32.xlu0 %v1266_v16, %s1450_s6  ;;  %1297 = vrot.lane.b32.xlu1 %v1296_v19, %s1449_s5 }
  0x38   : > { %1302 = vrot.lane.b32.xlu2 %v1281_v14, %s1448_s4 }
  0x3f   : > { %1307 = vrot.lane.b32.xlu0 %v1281_v14, %s1450_s6  ;;  %1312 = vrot.lane.b32.xlu1 %v1296_v19, %s1448_s4 }
  0x40   : > { %1317 = vrot.lane.b32.xlu2 %v1296_v19, %s1450_s6 }
  0x47   : > { %1322 = vrot.lane.b32.xlu0 %v1271_v10, %s1451_s7  ;;  %1327 = vrot.lane.b32.xlu1 %v1271_v10, %s1452_s8 }
  0x48   : > { %1332 = vrot.lane.b32.xlu2 %v1266_v16, %s1451_s7 }
  0x4f   : > { %1337 = vrot.lane.b32.xlu0 %v1266_v16, %s1452_s8  ;;  %1342 = vrot.lane.b32.xlu1 %v1281_v14, %s1451_s7 }
  0x50   : > { %1347 = vrot.lane.b32.xlu2 %v1281_v14, %s1452_s8 }
  0x57   : > { %1352 = vrot.lane.b32.xlu0 %v1296_v19, %s1451_s7  ;;  %1357 = vrot.lane.b32.xlu1 %v1296_v19, %s1452_s8 }
  0x58   : > { %1362 = vrot.lane.b32.xlu2 %v1271_v10, %s1453_s9 }
  0x5f   : > { %1367 = vrot.lane.b32.xlu0 %v1266_v16, %s1453_s9  ;;  %1372 = vrot.lane.b32.xlu1 %v1271_v10, %s1454_s10 }
  0x60   : > { %1377 = vrot.lane.b32.xlu2 %v1281_v14, %s1453_s9 }
  0x67   : > { %1382 = vrot.lane.b32.xlu0 %v1266_v16, %s1454_s10  ;;  %1387 = vrot.lane.b32.xlu1 %v1296_v19, %s1453_s9 }
  0x68   : > { %1392 = vrot.lane.b32.xlu2 %v1281_v14, %s1454_s10 }
  0x6f   : > { %1397 = vrot.lane.b32.xlu0 %v1296_v19, %s1454_s10  ;;  %1402 = vrot.lane.b32.xlu1 %v1271_v10, %s1455_s11 }
  0x70   : > { %1407 = vrot.lane.b32.xlu2 %v1266_v16, %s1455_s11 }
  0x77   : > { %1412 = vrot.lane.b32.xlu0 %v1281_v14, %s1455_s11  ;;  %1417 = vrot.lane.b32.xlu1 %v1296_v19, %s1455_s11  ;;  %v1165_v14 = vld [vmem:[%s1784_s1 + $0x30] sm:$0xff] }
  0x82   : > { %v1283_v20 = vpop.permute.xlu2 %1282 }
  0x83   : > { %v1285_v40 = vunpack.i.h.bf16 %v1283_v20  ;;  %v1284_v41 = vunpack.i.l.bf16 %v1283_v20 }
  0x85   : > { %v326_v51 = vsel %vm324_vm1, %v1284_v41, %v1285_v40 }
  0x8a   : > { %v1288_v21 = vpop.permute.xlu2 %1287 }
  0x8b   : > { %v1290_v25 = vunpack.i.h.bf16 %v1288_v21  ;;  %v1289_v26 = vunpack.i.l.bf16 %v1288_v21 }
  0x8d   : > { %v1538_v38 = vsel %vm383_vm2, %v1289_v26, %v1290_v25 }
  0x92   : > { %v1303_v23 = vpop.permute.xlu2 %1302 }
  0x93   : > { %v1305_v29 = vunpack.i.h.bf16 %v1303_v23  ;;  %v1304_v30 = vunpack.i.l.bf16 %v1303_v23 }
  0x95   : > { %v1543_v39 = vsel %vm383_vm2, %v1304_v30, %v1305_v29  ;;  %v1166_v29 = vld [vmem:[%s1784_s1 + $0x38] sm:$0xff]  ;;  %v1177_v30 = vld [vmem:[%s1784_s1 + $0x60] sm:$0xff] }
  0x99   : > { %v1273_v27 = vpop.permute.xlu1 %1272  ;;  %v1263_v28 = vpop.permute.xlu0 %1262 }
  0x9a   : > { %v1275_v31 = vunpack.i.h.bf16 %v1273_v27  ;;  %v1274_v32 = vunpack.i.l.bf16 %v1273_v27  ;;  %v1265_v33 = vunpack.i.h.bf16 %v1263_v28  ;;  %v1264_v34 = vunpack.i.l.bf16 %v1263_v28  ;;  %v1318_v35 = vpop.permute.xlu2 %1317  ;;  %v1156_v28 = vld [vmem:[%s1784_s1 + $0x18] sm:$0xff] }
  0x9b   : > { %v1320_v62 = vunpack.i.h.bf16 %v1318_v35  ;;  %v1319_v63 = vunpack.i.l.bf16 %v1318_v35 }
  0x9c   : > { %v1532_v36 = vsel %vm324_vm1, %v1264_v34, %v1265_v33  ;;  %v1535_v37 = vsel %vm383_vm2, %v1274_v32, %v1275_v31  ;;  %v1170_v31 = vld [vmem:[%s1784_s1 + $0x48] sm:$0xff] }
  0x9d   : > { %351 = vmatpush.msra.mxu2 %v1532_v36  ;;  %410 = vmatpush.msra.mxu3 %v1535_v37  ;;  %v238_v6 = vsel %vm237_vm3, %v1319_v63, %v1320_v62  ;;  %v1188_v62 = vld [vmem:[%s1784_s1 + $0x88] sm:$0xff] }
  0x9f   : > { %411 = vmatpush.msra.mxu3 %v1538_v38 }
  0xa1   : > { %v1278_v42 = vpop.permute.xlu1 %1277  ;;  %v1268_v43 = vpop.permute.xlu0 %1267  ;;  %412 = vmatpush.msra.mxu3 %v1543_v39 }
  0xa2   : > { %v1280_v44 = vunpack.i.h.bf16 %v1278_v42  ;;  %v1279_v45 = vunpack.i.l.bf16 %v1278_v42  ;;  %v1270_v46 = vunpack.i.h.bf16 %v1268_v43  ;;  %v1269_v47 = vunpack.i.l.bf16 %v1268_v43  ;;  %v1547_v48 = vpop.permute.xlu2 %1332 }
  0xa3   : > { %v1335_v16 = vunpack.i.h.bf16 %v1547_v48  ;;  %v1334_v17 = vunpack.i.l.bf16 %v1547_v48  ;;  %v1178_v48 = vld [vmem:[%s1784_s1 + $0x68] sm:$0xff] }
  0xa4   : > { %v1550_v49 = vsel %vm324_vm1, %v1269_v47, %v1270_v46  ;;  %v241_v50 = vsel %vm237_vm3, %v1279_v45, %v1280_v44  ;;  %v1456_v44 = vmov 0  }
  0xa5   : > { %352 = vmatpush.msra.mxu2 %v1550_v49  ;;  %265 = vmatpush.msra.mxu0 %v241_v50  ;;  %v1599_v27 = vsel %vm583_vm5, %v1334_v17, %v1335_v16 }
  0xa6   : > { %519 = vmatpush.msrb.mxu1 %v241_v50  ;;  %1422 = vset.pattern.permute.xlu0 %v1456_v44  ;;  %v623_v50 = vld [vmem:[%s1785_s2] sm:$0xff] }
  0xa7   : > { %353 = vmatpush.msra.mxu2 %v326_v51  ;;  %1423 = vset.pattern.permute.xlu1 %v1456_v44 }
  0xa8   : > { %1421 = vset.pattern.permute.xlu2 %v1456_v44  ;;  %627 = vperm.xlu1 %1423, %v623_v50  }
  0xa9   : > { %v1293_v52 = vpop.permute.xlu0 %1292  ;;  %v1298_v53 = vpop.permute.xlu1 %1297  ;;  %427 = vperm.xlu2 %1421, %v623_v50  }
  0xaa   : > { %v1295_v54 = vunpack.i.h.bf16 %v1293_v52  ;;  %v1294_v55 = vunpack.i.l.bf16 %v1293_v52  ;;  %v1300_v56 = vunpack.i.h.bf16 %v1298_v53  ;;  %v1299_v57 = vunpack.i.l.bf16 %v1298_v53  ;;  %v1555_v58 = vpop.permute.xlu2 %1347 }
  0xab   : > { %v1350_v32 = vunpack.i.h.bf16 %v1555_v58  ;;  %v1349_v33 = vunpack.i.l.bf16 %v1555_v58  ;;  %v1181_v58 = vld [vmem:[%s1784_s1 + $0x70] sm:$0xff] }
  0xac   : > { %v240_v59 = vsel %vm237_vm3, %v1294_v55, %v1295_v54  ;;  %v325_v60 = vsel %vm324_vm1, %v1299_v57, %v1300_v56 }
  0xad   : > { %266 = vmatpush.msra.mxu0 %v240_v59  ;;  %354 = vmatpush.msra.mxu2 %v325_v60  ;;  %v465_v46 = vsel %vm463_vm6, %v1349_v33, %v1350_v32 }
  0xae   : > { %520 = vmatpush.msrb.mxu1 %v240_v59  ;;  %1163 = vmatmul.msk.f32.vlgmr.msra.gmra.mxu2 %vm246_vm0, %v1161_v61  ;;  %v1171_v61 = vld [vmem:[%s1784_s1 + $0x50] sm:$0xff] }
  0xaf   : > { %551 = vmatpush.msrb.mxu2 %v1535_v37 }
  0xb0   : > { %828 = vperm.xlu1 %1423, %v623_v50  }
  0xb1   : > { %552 = vmatpush.msrb.mxu2 %v1538_v38  ;;  %v1308_v0 = vpop.permute.xlu0 %1307  ;;  %v1313_v1 = vpop.permute.xlu1 %1312 }
  0xb2   : > { %v1310_v2 = vunpack.i.h.bf16 %v1308_v0  ;;  %v1309_v3 = vunpack.i.l.bf16 %v1308_v0  ;;  %v1315_v4 = vunpack.i.h.bf16 %v1313_v1  ;;  %v1314_v5 = vunpack.i.l.bf16 %v1313_v1  ;;  %v1363_v7 = vpop.permute.xlu2 %1362 }
  0xb3   : > { %553 = vmatpush.msrb.mxu2 %v1543_v39  ;;  %v1365_v10 = vunpack.i.h.bf16 %v1363_v7  ;;  %v1364_v11 = vunpack.i.l.bf16 %v1363_v7 }
  0xb4   : > { %v239_v8 = vsel %vm237_vm3, %v1309_v3, %v1310_v2  ;;  %v1569_v9 = vsel %vm383_vm2, %v1314_v5, %v1315_v4 }
  0xb5   : > { %267 = vmatpush.msra.mxu0 %v239_v8  ;;  %521 = vmatpush.msrb.mxu1 %v239_v8  ;;  %v729_v18 = vsel %vm725_vm4, %v1364_v11, %v1365_v10  ;;  %v1182_v10 = vld [vmem:[%s1784_s1 + $0x78] sm:$0xff] }
  0xb6   : > { %413 = vmatpush.msra.mxu3 %v1569_v9  ;;  %554 = vmatpush.msrb.mxu2 %v1569_v9 }
  0xb7   : > { %522 = vmatpush.msrb.mxu1 %v238_v6  ;;  %268 = vmatpush.msra.mxu0 %v238_v6 }
  0xb8   : > { %1157 = vmatmul.msk.f32.vlgmr.msra.gmra.mxu0 %vm246_vm0, %v1155_v12  ;;  %1175 = vmatmul.msk.f32.vlgmr.msrb.gmra.mxu1 %vm246_vm0, %v1169_v13 }
  0xb9   : > { %695 = vmatpush.msra.mxu1 %v1532_v36  ;;  %v1323_v19 = vpop.permute.xlu0 %1322  ;;  %v1328_v20 = vpop.permute.xlu1 %1327  ;;  %1167 = vmatmul.msk.f32.vlgmr.msra.gmra.mxu3 %vm246_vm0, %v1165_v14  ;;  %v1624_v36 = vld [vmem:[%s1785_s2 + $0x8] sm:$0xff] }
  0xba   : > { %v1325_v21 = vunpack.i.h.bf16 %v1323_v19  ;;  %v1324_v22 = vunpack.i.l.bf16 %v1323_v19  ;;  %v1330_v23 = vunpack.i.h.bf16 %v1328_v20  ;;  %v1329_v24 = vunpack.i.l.bf16 %v1328_v20  ;;  %1164 = vmatmul.msk.f32.gmra.mxu2 %vm246_vm0, %v1162_v15  ;;  %432 = vperm.xlu0 %1422, %v1624_v36   ;;  %v1378_v57 = vpop.permute.xlu2 %1377 }
  0xbb   : > { %696 = vmatpush.msra.mxu1 %v1550_v49  ;;  %752 = vmatpush.msra.mxu2 %v729_v18  ;;  %v1187_v49 = vld [vmem:[%s1784_s1 + $0x80] sm:$0xff]  ;;  %v1380_v63 = vunpack.i.h.bf16 %v1378_v57  ;;  %v1379_v0 = vunpack.i.l.bf16 %v1378_v57  ;;  %v1218_v57 = vld [vmem:[%s1784_s1 + $0xf8] sm:$0xff] }
  0xbc   : > { %v1595_v25 = vsel %vm583_vm5, %v1324_v22, %v1325_v21  ;;  %v467_v26 = vsel %vm463_vm6, %v1329_v24, %v1330_v23  ;;  %632 = vperm.xlu2 %1421, %v1624_v36   ;;  %1009 = vperm.xlu1 %1423, %v1624_v36   ;;  %v1195_v22 = vld [vmem:[%s1784_s1 + $0xa0] sm:$0xff]  ;;  %v1189_v23 = vld [vmem:[%s1784_s1 + $0x90] sm:$0xff] }
  0xbd   : > { %697 = vmatpush.msra.mxu1 %v326_v51  ;;  %610 = vmatpush.msrb.mxu3 %v1595_v25  ;;  %v727_v6 = vsel %vm725_vm4, %v1379_v0, %v1380_v63 }
  0xbe   : > { %490 = vmatpush.msrb.mxu0 %v467_v26 }
  0xbf   : > { %698 = vmatpush.msra.mxu1 %v325_v60  ;;  %611 = vmatpush.msrb.mxu3 %v1599_v27 }
  0xc0   : > { %1158 = vmatmul.msk.f32.gmra.mxu0 %vm246_vm0, %v1156_v28  ;;  %1176 = vmatmul.msk.f32.gmra.mxu1 %vm246_vm0, %v1170_v31 }
  0xc1   : > { %896 = vmatpush.msrb.mxu1 %v1535_v37  ;;  %v1338_v34 = vpop.permute.xlu0 %1337  ;;  %v1343_v35 = vpop.permute.xlu1 %1342  ;;  %1168 = vmatmul.msk.f32.gmra.mxu3 %vm246_vm0, %v1166_v29 }
  0xc2   : > { %v1340_v40 = vunpack.i.h.bf16 %v1338_v34  ;;  %v1339_v41 = vunpack.i.l.bf16 %v1338_v34  ;;  %v1345_v42 = vunpack.i.h.bf16 %v1343_v35  ;;  %v1344_v43 = vunpack.i.l.bf16 %v1343_v35  ;;  %1179 = vmatmul.msk.f32.vlgmr.msrb.gmra.mxu2 %vm246_vm0, %v1177_v30  ;;  %1004 = vperm.xlu0 %1422, %v623_v50   ;;  %v1393_v8 = vpop.permute.xlu2 %1392  ;;  %v1199_v34 = vld [vmem:[%s1784_s1 + $0xb0] sm:$0xff] }
  0xc3   : > { %897 = vmatpush.msrb.mxu1 %v1538_v38  ;;  %v1395_v11 = vunpack.i.h.bf16 %v1393_v8  ;;  %v1394_v12 = vunpack.i.l.bf16 %v1393_v8 }
  0xc4   : > { %v466_v45 = vsel %vm463_vm6, %v1339_v41, %v1340_v40  ;;  %v1632_v47 = vsel %vm583_vm5, %v1344_v43, %v1345_v42  ;;  %833 = vperm.xlu2 %1421, %v1624_v36   ;;  %v1196_v40 = vld [vmem:[%s1784_s1 + $0xa8] sm:$0xff]  ;;  %v1190_v41 = vld [vmem:[%s1784_s1 + $0x98] sm:$0xff] }
  0xc5   : > { %898 = vmatpush.msrb.mxu1 %v1543_v39  ;;  %491 = vmatpush.msrb.mxu0 %v466_v45  ;;  %v786_v21 = vsel %vm784_vm7, %v1394_v12, %v1395_v11 }
  0xc6   : > { %612 = vmatpush.msrb.mxu3 %v1632_v47 }
  0xc7   : > { %899 = vmatpush.msrb.mxu1 %v1569_v9  ;;  %492 = vmatpush.msrb.mxu0 %v465_v46 }
  0xc8   : > { %1193 = vmatmul.msk.f32.vlgmr.msra.gmra.mxu1 %vm246_vm0, %v1187_v49  ;;  %v1200_v49 = vld [vmem:[%s1784_s1 + $0xb8] sm:$0xff] }
  0xc9   : > { %v1353_v51 = vpop.permute.xlu0 %1352  ;;  %v1358_v52 = vpop.permute.xlu1 %1357 }
  0xca   : > { %v1355_v53 = vunpack.i.h.bf16 %v1353_v51  ;;  %v1354_v54 = vunpack.i.l.bf16 %v1353_v51  ;;  %v1360_v55 = vunpack.i.h.bf16 %v1358_v52  ;;  %v1359_v56 = vunpack.i.l.bf16 %v1358_v52  ;;  %1180 = vmatmul.msk.f32.gmra.mxu2 %vm246_vm0, %v1178_v48  ;;  %v1408_v24 = vpop.permute.xlu2 %1407  ;;  %v1213_v51 = vld [vmem:[%s1784_s1 + $0xe0] sm:$0xff] }
  0xcb   : > { %v1410_v28 = vunpack.i.h.bf16 %v1408_v24  ;;  %v1409_v29 = vunpack.i.l.bf16 %v1408_v24 }
  0xcc   : > { %v464_v59 = vsel %vm463_vm6, %v1359_v56, %v1360_v55  ;;  %v584_v60 = vsel %vm583_vm5, %v1354_v54, %v1355_v53  ;;  %v1207_v53 = vld [vmem:[%s1784_s1 + $0xd0] sm:$0xff]  ;;  %v1214_v55 = vld [vmem:[%s1784_s1 + $0xe8] sm:$0xff]  ;;  %v1208_v56 = vld [vmem:[%s1784_s1 + $0xd8] sm:$0xff] }
  0xcd   : > { %493 = vmatpush.msrb.mxu0 %v464_v59  ;;  %613 = vmatpush.msrb.mxu3 %v584_v60  ;;  %v963_v42 = vsel %vm960_vm8, %v1409_v29, %v1410_v28  ;;  %v1217_v54 = vld [vmem:[%s1784_s1 + $0xf0] sm:$0xff] }
  0xce   : > { %1183 = vmatmul.msk.f32.vlgmr.msrb.gmra.mxu3 %vm246_vm0, %v1181_v58  ;;  %1173 = vmatmul.msk.f32.vlgmr.msrb.gmra.mxu0 %vm246_vm0, %v1171_v61  ;;  %v299_v58 = vpop.f32.mrf.mxu1 }
  0xcf   : > { %666 = vmatpush.msra.mxu0 %v1535_v37 }
  0xd0   : > { %1194 = vmatmul.msk.f32.gmra.mxu1 %vm246_vm0, %v1188_v62 }
  0xd1   : > { %667 = vmatpush.msra.mxu0 %v1538_v38  ;;  %v1368_v1 = vpop.permute.xlu0 %1367  ;;  %v1373_v2 = vpop.permute.xlu1 %1372 }
  0xd2   : > { %v1370_v3 = vunpack.i.h.bf16 %v1368_v1  ;;  %v1369_v37 = vunpack.i.l.bf16 %v1368_v1  ;;  %v1375_v4 = vunpack.i.h.bf16 %v1373_v2  ;;  %v1374_v5 = vunpack.i.l.bf16 %v1373_v2 }
  0xd3   : > { %668 = vmatpush.msra.mxu0 %v1543_v39  ;;  %v1172_v39 = vld [vmem:[%s1784_s1 + $0x58] sm:$0xff] }
  0xd4   : > { %v728_v38 = vsel %vm725_vm4, %v1369_v37, %v1370_v3  ;;  %v788_v7 = vsel %vm784_vm7, %v1374_v5, %v1375_v4 }
  0xd5   : > { %669 = vmatpush.msra.mxu0 %v1569_v9  ;;  %753 = vmatpush.msra.mxu2 %v728_v38  ;;  %v1205_v9 = vld [vmem:[%s1784_s1 + $0xc0] sm:$0xff] }
  0xd6   : > { %811 = vmatpush.msra.mxu3 %v788_v7  ;;  %1174 = vmatmul.msk.f32.gmra.mxu0 %vm246_vm0, %v1172_v39  ;;  %v302_v63 = vpop.f32.mrf.mxu1 }
  0xd7   : > { %867 = vmatpush.msrb.mxu0 %v1595_v25  ;;  %754 = vmatpush.msra.mxu2 %v727_v6  ;;  %v1206_v25 = vld [vmem:[%s1784_s1 + $0xc8] sm:$0xff] }
  0xd8   : > { %1184 = vmatmul.msk.f32.gmra.mxu3 %vm246_vm0, %v1182_v10  ;;  %1211 = vmatmul.msk.f32.vlgmr.msrb.gmra.mxu1 %vm246_vm0, %v1205_v9 }
  0xd9   : > { %868 = vmatpush.msrb.mxu0 %v1599_v27  ;;  %v1383_v13 = vpop.permute.xlu0 %1382  ;;  %v1388_v14 = vpop.permute.xlu1 %1387 }
  0xda   : > { %v1385_v15 = vunpack.i.h.bf16 %v1383_v13  ;;  %v1384_v16 = vunpack.i.l.bf16 %v1383_v13  ;;  %v1390_v17 = vunpack.i.h.bf16 %v1388_v14  ;;  %v1389_v18 = vunpack.i.l.bf16 %v1388_v14 }
  0xdb   : > { %869 = vmatpush.msrb.mxu0 %v1632_v47 }
  0xdc   : > { %v726_v19 = vsel %vm725_vm4, %v1389_v18, %v1390_v17  ;;  %v787_v20 = vsel %vm784_vm7, %v1384_v16, %v1385_v15 }
  0xdd   : > { %870 = vmatpush.msrb.mxu0 %v584_v60  ;;  %755 = vmatpush.msra.mxu2 %v726_v19 }
  0xde   : > { %812 = vmatpush.msra.mxu3 %v787_v20  ;;  %1197 = vmatmul.msk.f32.vlgmr.msra.gmra.mxu2 %vm246_vm0, %v1195_v22 }
  0xdf   : > { %928 = vmatpush.msrb.mxu2 %v788_v7  ;;  %1191 = vmatmul.msk.f32.vlgmr.msra.gmra.mxu0 %vm246_vm0, %v1189_v23 }
  0xe0   : > { %813 = vmatpush.msra.mxu3 %v786_v21  ;;  %1212 = vmatmul.msk.f32.gmra.mxu1 %vm246_vm0, %v1206_v25 }
  0xe1   : > { %929 = vmatpush.msrb.mxu2 %v787_v20  ;;  %v1398_v26 = vpop.permute.xlu0 %1397  ;;  %v1403_v27 = vpop.permute.xlu1 %1402 }
  0xe2   : > { %v1400_v30 = vunpack.i.h.bf16 %v1398_v26  ;;  %v1399_v31 = vunpack.i.l.bf16 %v1398_v26  ;;  %v1405_v32 = vunpack.i.h.bf16 %v1403_v27  ;;  %v1404_v33 = vunpack.i.l.bf16 %v1403_v27 }
  0xe3   : > { %930 = vmatpush.msrb.mxu2 %v786_v21 }
  0xe4   : > { %v785_v35 = vsel %vm784_vm7, %v1399_v31, %v1400_v30  ;;  %v964_v36 = vsel %vm960_vm8, %v1404_v33, %v1405_v32 }
  0xe5   : > { %814 = vmatpush.msra.mxu3 %v785_v35  ;;  %931 = vmatpush.msrb.mxu2 %v785_v35 }
  0xe6   : > { %1201 = vmatmul.msk.f32.vlgmr.msra.gmra.mxu3 %vm246_vm0, %v1199_v34  ;;  %1198 = vmatmul.msk.f32.gmra.mxu2 %vm246_vm0, %v1196_v40 }
  0xe7   : > { %987 = vmatpush.msrb.mxu3 %v964_v36  ;;  %1192 = vmatmul.msk.f32.gmra.mxu0 %vm246_vm0, %v1190_v41 }
  0xe9   : > { %v1413_v43 = vpop.permute.xlu0 %1412  ;;  %988 = vmatpush.msrb.mxu3 %v963_v42  ;;  %v1418_v44 = vpop.permute.xlu1 %1417 }
  0xea   : > { %v1415_v45 = vunpack.i.h.bf16 %v1413_v43  ;;  %v1414_v46 = vunpack.i.l.bf16 %v1413_v43  ;;  %v1420_v47 = vunpack.i.h.bf16 %v1418_v44  ;;  %v1419_v48 = vunpack.i.l.bf16 %v1418_v44 }
  0xec   : > { %v962_v50 = vsel %vm960_vm8, %v1414_v46, %v1415_v45  ;;  %v961_v52 = vsel %vm960_vm8, %v1419_v48, %v1420_v47 }
  0xed   : > { %989 = vmatpush.msrb.mxu3 %v962_v50 }
  0xee   : > { %1202 = vmatmul.msk.f32.gmra.mxu3 %vm246_vm0, %v1200_v49  ;;  %1215 = vmatmul.msk.f32.vlgmr.msrb.gmra.mxu2 %vm246_vm0, %v1213_v51 }
  0xef   : > { %990 = vmatpush.msrb.mxu3 %v961_v52  ;;  %1209 = vmatmul.msk.f32.vlgmr.msrb.gmra.mxu0 %vm246_vm0, %v1207_v53 }
  0xf6   : > { %1219 = vmatmul.msk.f32.vlgmr.msrb.gmra.mxu3 %vm246_vm0, %v1217_v54  ;;  %1216 = vmatmul.msk.f32.gmra.mxu2 %vm246_vm0, %v1214_v55 }
  0xf7   : > { %1210 = vmatmul.msk.f32.gmra.mxu0 %vm246_vm0, %v1208_v56 }
  0xfe   : > { %1220 = vmatmul.msk.f32.gmra.mxu3 %vm246_vm0, %v1218_v57 }
 0x103   : > { %v428_v1 = vpop.permute.xlu2 %427 }
 0x116   : > { %v633_v28 = vpop.permute.xlu2 %632 }
 0x11a   : > { %v628_v18 = vpop.permute.xlu1 %627 }
 0x11e   : > { %v834_v52 = vpop.permute.xlu2 %833 }
 0x122   : > { %v829_v42 = vpop.permute.xlu1 %828 }
 0x12c   : > { %v433_v8 = vpop.permute.xlu0 %432 }
 0x131   : > { %v356_v59 = vpop.f32.mrf.mxu2 }
 0x135   : > { %v270_v60 = vpop.f32.mrf.mxu0  ;;  %v524_v39 = vpop.f32.mrf.mxu1 }
 0x136   : > { %v300_v61 = vadd.f32 %v299_v58, %v270_v60 }
 0x138   : > { %v362_v62 = vadd.f32 %v356_v59, %v300_v61 }
 0x13c   : > { %v415_v0 = vpop.f32.mrf.mxu3 }
 0x13d   : > { %v421_v2 = vadd.f32 %v415_v0, %v362_v62  ;;  %v273_v3 = vpop.f32.mrf.mxu0  ;;  %v359_v4 = vpop.f32.mrf.mxu2 }
 0x13e   : > { %v303_v37 = vadd.f32 %v302_v63, %v273_v3  ;;  %v527_v16 = vpop.f32.mrf.mxu1  ;;  %v1005_v62 = vpop.permute.xlu0 %1004 }
 0x13f   : > { %v435_v5 = vadd.f32 %v428_v1, %v421_v2 }
 0x140   : > { %v363_v6 = vadd.f32 %v359_v4, %v303_v37 }
 0x141   : > { %v437_v38 = vmax.f32 %v435_v5, 0.0 }
 0x143   : > { %439 = vst [vmem:[%s1748_s26] sm:$0xff] %v437_v38  ;;  %v1010_v38 = vpop.permute.xlu1 %1009 }
 0x144   : > { %v418_v7 = vpop.f32.mrf.mxu3 }
 0x145   : > { %v422_v10 = vadd.f32 %v418_v7, %v363_v6  ;;  %v556_v12 = vpop.f32.mrf.mxu2 }
 0x146   : > { %v700_v26 = vpop.f32.mrf.mxu1 }
 0x147   : > { %v436_v9 = vadd.f32 %v433_v8, %v422_v10 }
 0x149   : > { %v438_v11 = vmax.f32 %v436_v9, 0.0 }
 0x14a   : > { %v1070_v8 = vld [vmem:[%s1748_s26] sm:$0xff] (%p1507_p5) }
 0x14b   : > { %440 = vst [vmem:[%s1748_s26 + $0x8] sm:$0xff] %v438_v11  ;;  %v495_v13 = vpop.f32.mrf.mxu0 }
 0x14c   : > { %v525_v14 = vadd.f32 %v524_v39, %v495_v13  ;;  %1071 = vst [vmem:[%s1027_s30] sm:$0xff] (%p1507_p5), %v1070_v8 }
 0x14d   : > { %v559_v22 = vpop.f32.mrf.mxu2 }
 0x14e   : > { %v562_v15 = vadd.f32 %v556_v12, %v525_v14  ;;  %v703_v35 = vpop.f32.mrf.mxu1 }
 0x151   : > { %v615_v17 = vpop.f32.mrf.mxu3 }
 0x152   : > { %v621_v19 = vadd.f32 %v615_v17, %v562_v15  ;;  %v1072_v10 = vld [vmem:[%s1748_s26 + $0x8] sm:$0xff] (%p1507_p5) }
 0x153   : > { %v498_v21 = vpop.f32.mrf.mxu0  ;;  %1073 = vst [vmem:[%s1027_s30 + $0x10] sm:$0xff] (%p1507_p5), %v1072_v10 }
 0x154   : > { %v635_v20 = vadd.f32 %v628_v18, %v621_v19  ;;  %v528_v23 = vadd.f32 %v527_v16, %v498_v21 }
 0x156   : > { %v637_v24 = vmax.f32 %v635_v20, 0.0  ;;  %v563_v25 = vadd.f32 %v559_v22, %v528_v23  ;;  %v901_v48 = vpop.f32.mrf.mxu1 }
 0x158   : > { %1185 = vst [vmem:[%s1748_s26 + $0x10] sm:$0xff] %v637_v24 }
 0x15b   : > { %v618_v27 = vpop.f32.mrf.mxu3 }
 0x15c   : > { %v622_v29 = vadd.f32 %v618_v27, %v563_v25  ;;  %v671_v30 = vpop.f32.mrf.mxu0 }
 0x15d   : > { %v701_v33 = vadd.f32 %v700_v26, %v671_v30 }
 0x15e   : > { %v636_v31 = vadd.f32 %v633_v28, %v622_v29  ;;  %v904_v60 = vpop.f32.mrf.mxu1 }
 0x15f   : > { %v1074_v39 = vld [vmem:[%s1748_s26 + $0x10] sm:$0xff] (%p1507_p5) }
 0x160   : > { %v638_v32 = vmax.f32 %v636_v31, 0.0  ;;  %1075 = vst [vmem:[%s1027_s30 + $0x20] sm:$0xff] (%p1507_p5), %v1074_v39 }
 0x161   : > { %v757_v34 = vpop.f32.mrf.mxu2 }
 0x162   : > { %1186 = vst [vmem:[%s1748_s26 + $0x18] sm:$0xff] %v638_v32  ;;  %v763_v40 = vadd.f32 %v757_v34, %v701_v33 }
 0x164   : > { %v674_v36 = vpop.f32.mrf.mxu0 }
 0x165   : > { %v704_v44 = vadd.f32 %v703_v35, %v674_v36 }
 0x169   : > { %v816_v41 = vpop.f32.mrf.mxu3  ;;  %v760_v45 = vpop.f32.mrf.mxu2  ;;  %v1076_v9 = vld [vmem:[%s1748_s26 + $0x18] sm:$0xff] (%p1507_p5) }
 0x16a   : > { %v822_v43 = vadd.f32 %v816_v41, %v763_v40  ;;  %v764_v50 = vadd.f32 %v760_v45, %v704_v44  ;;  %1077 = vst [vmem:[%s1027_s30 + $0x30] sm:$0xff] (%p1507_p5), %v1076_v9 }
 0x16c   : > { %v836_v46 = vadd.f32 %v829_v42, %v822_v43  ;;  %v872_v47 = vpop.f32.mrf.mxu0 }
 0x16d   : > { %v902_v54 = vadd.f32 %v901_v48, %v872_v47 }
 0x16e   : > { %v838_v49 = vmax.f32 %v836_v46, 0.0 }
 0x170   : > { %1203 = vst [vmem:[%s1748_s26 + $0x20] sm:$0xff] %v838_v49 }
 0x171   : > { %v819_v51 = vpop.f32.mrf.mxu3  ;;  %v933_v55 = vpop.f32.mrf.mxu2 }
 0x172   : > { %v823_v53 = vadd.f32 %v819_v51, %v764_v50  ;;  %v939_v58 = vadd.f32 %v933_v55, %v902_v54 }
 0x174   : > { %v837_v56 = vadd.f32 %v834_v52, %v823_v53  ;;  %v875_v59 = vpop.f32.mrf.mxu0 }
 0x175   : > { %v905_v0 = vadd.f32 %v904_v60, %v875_v59 }
 0x176   : > { %v839_v57 = vmax.f32 %v837_v56, 0.0 }
 0x177   : > { %v1078_v11 = vld [vmem:[%s1748_s26 + $0x20] sm:$0xff] (%p1507_p5) }
 0x178   : > { %1204 = vst [vmem:[%s1748_s26 + $0x28] sm:$0xff] %v839_v57 }
 0x179   : > { %v992_v61 = vpop.f32.mrf.mxu3  ;;  %v936_v1 = vpop.f32.mrf.mxu2  ;;  %1079 = vst [vmem:[%s1027_s30 + $0x40] sm:$0xff] (%p1507_p5), %v1078_v11 }
 0x17a   : > { %v998_v63 = vadd.f32 %v992_v61, %v939_v58  ;;  %v940_v37 = vadd.f32 %v936_v1, %v905_v0 }
 0x17c   : > { %v1012_v2 = vadd.f32 %v1005_v62, %v998_v63 }
 0x17e   : > { %v1014_v3 = vmax.f32 %v1012_v2, 0.0 }
 0x17f   : > { %v1080_v12 = vld [vmem:[%s1748_s26 + $0x28] sm:$0xff] (%p1507_p5) }
 0x180   : > { %1221 = vst [vmem:[%s1748_s26 + $0x30] sm:$0xff] %v1014_v3 }
 0x181   : > { %v995_v4 = vpop.f32.mrf.mxu3  ;;  %1081 = vst [vmem:[%s1027_s30 + $0x50] sm:$0xff] (%p1507_p5), %v1080_v12 }
 0x182   : > { %v999_v5 = vadd.f32 %v995_v4, %v940_v37 }
 0x184   : > { %v1013_v6 = vadd.f32 %v1010_v38, %v999_v5  ;;  %1025 = sbr.rel (!%p1507_p5) target bundleno = 401 (0x191), region = 59 }
 0x186   : > { %v1015_v7 = vmax.f32 %v1013_v6, 0.0 }
 0x187   : > { %v1082_v13 = vld [vmem:[%s1748_s26 + $0x30] sm:$0xff] (%p1507_p5) }
 0x188   : > { %1222 = vst [vmem:[%s1748_s26 + $0x38] sm:$0xff] %v1015_v7 }
 0x189   : > { %1083 = vst [vmem:[%s1027_s30 + $0x60] sm:$0xff] %v1082_v13 }
 0x18f   : > { %v1084_v14 = vld [vmem:[%s1748_s26 + $0x38] sm:$0xff] }
 0x190   : > { %1085 = vst [vmem:[%s1027_s30 + $0x70] sm:$0xff] %v1084_v14 }
 0x191 PF: > { %p10_p10 = scmp.ge.s32.totalorder %s1494_s16, 4   ;;  %s1788_s12 = smov %s1442_s13 }
 0x192   : > { %s1789_s13 = smov %s1505_s19  ;;  %s1790_s14 = smov %s1494_s16 }
 0x193   :  { %12 = sbr.rel (!%p10_p10) target bundleno = 2 (0x2), region = 146 }

// kernel: decoder_forward.9
= control target key start
LH: loop header
LB: loop body
LE: loop exit
PB: predicated region body
PF: predicated region fallthrough
CT: control target
= control target key end

     0   :  { %s2005_s12 = smov 0   ;;  %s2007_s13 = smov 0   ;;  %s2419_s0 = inlined_call_operand.vmem [shape: f32[16,1024], index: 0, kind: input, shape index: {}]   ;;  %s2420_s1 = inlined_call_operand.vmem [shape: f32[16,8,16], index: 1, kind: input, shape index: {}]   ;;  %s2421_s2 = inlined_call_operand.vmem [shape: f32[8,1], index: 2, kind: input, shape index: {}]   ;;  %s2422_s3 = inlined_call_operand.vmem [shape: f32[4,8,768], index: 3, kind: output, shape index: {}]  }
   0x1   :  { %s2009_s14 = smov 0  }
   0x2 LB: > { %s1669_s15 = sadd.s32 4294967295, %s1974_s14   ;;  %s2022_s16 = sadd.s32 1, %s1974_s14   ;;  %s1974_s14 = sphi %s2009_s14, %s2426_s14   ;;  %s1970_s13 = sphi %s2007_s13, %s2425_s13   ;;  %s1966_s12 = sphi %s2005_s12, %s2424_s12  }
   0x3   : > { %s17_s17 = ssub.s32 %s1974_s14, %s2022_s16  ;;  %s20_s18 = sadd.s32 1, %s1970_s13 }
   0x4   : > { %p18_p0 = scmp.eq.s32.totalorder %s17_s17, 0  ;;  %p27_p1 = scmp.ne.s32.totalorder %s1970_s13, %s1966_s12 }
   0x5   : > { %p28_p2 = scmp.eq.s32.totalorder %s1974_s14, 0  ;;  %p99_p3 = scmp.eq.s32.totalorder %s1669_s15, 1 }
   0x6   : > { %s2033_s19 = scalar_select %p18_p0, %s1970_s13, %s20_s18  }
   0x7   : > { %p29_p4 = por %p28_p2, %p27_p1  ;;  %p2035_p5 = por %p99_p3, %p27_p1 }
   0x8   : > { %p1672_p6 = scmp.ge.s32.totalorder %s1974_s14, 2 }
   0xa   : > { %127 = sbr.rel (%p1672_p6) target bundleno = 27 (0x1b), region = 24 }
   0xf   : > { %130 = sbr.rel (!%p29_p4) target bundleno = 27 (0x1b), region = 28  ;;  %s132_s21 = sand.u32 (%p29_p4), 1, %s1970_s13  }
  0x10   : > { %s1753_s22 = sshll.u32 (%p29_p4), %s1974_s14, 5  ;;  %s1673_s23 = sshll.u32 (%p29_p4), %s132_s21, 6 }
  0x11   : > { %s137_s26 = scalar_lea.vmem (%p29_p4), %s2419_s0, %s1753_s22  ;;  %s134_s27 = scalar_lea.vmem (%p29_p4), [#allocation2], %s1673_s23 }
  0x12   : > { %v150_v0 = vld [vmem:[%s137_s26] sm:$0xff] (%p29_p4)  ;;  %v152_v1 = vld [vmem:[%s137_s26 + $0x8] sm:$0xff] (%p29_p4)  ;;  %v154_v2 = vld [vmem:[%s137_s26 + $0x10] sm:$0xff] (%p29_p4) }
  0x13   : > { %151 = vst [vmem:[%s134_s27] sm:$0xff] (%p29_p4), %v150_v0  ;;  %v156_v3 = vld [vmem:[%s137_s26 + $0x18] sm:$0xff] (%p29_p4)  ;;  %v158_v4 = vld [vmem:[%s137_s26 + $0x40] sm:$0xff] (%p29_p4)  ;;  %v160_v5 = vld [vmem:[%s137_s26 + $0x48] sm:$0xff] (%p29_p4) }
  0x14   : > { %153 = vst [vmem:[%s134_s27 + $0x8] sm:$0xff] %v152_v1  ;;  %v162_v6 = vld [vmem:[%s137_s26 + $0x50] sm:$0xff]  ;;  %v164_v7 = vld [vmem:[%s137_s26 + $0x58] sm:$0xff] }
  0x15   : > { %155 = vst [vmem:[%s134_s27 + $0x10] sm:$0xff] %v154_v2 }
  0x16   : > { %157 = vst [vmem:[%s134_s27 + $0x18] sm:$0xff] %v156_v3 }
  0x17   : > { %159 = vst [vmem:[%s134_s27 + $0x20] sm:$0xff] %v158_v4 }
  0x18   : > { %161 = vst [vmem:[%s134_s27 + $0x28] sm:$0xff] %v160_v5 }
  0x19   : > { %163 = vst [vmem:[%s134_s27 + $0x30] sm:$0xff] %v162_v6 }
  0x1a   : > { %165 = vst [vmem:[%s134_s27 + $0x38] sm:$0xff] %v164_v7 }
  0x1b PF: > { %p1676_p7 = scmp.ge.s32.totalorder %s1974_s14, 1  ;;  %p170_p8 = scmp.lt.s32.totalorder %s1974_s14, 3 }
  0x1d   : > { %p171_p9 = pnand %p1676_p7, %p170_p8 }
  0x1e   : > { %s177_s28 = sand.u32 (!%p171_p9), 1, %s1966_s12   ;;  %s1976_s4 = smov (!%p171_p9), 127  }
  0x1f   : > { %174 = sbr.rel (%p171_p9) target bundleno = 405 (0x195), region = 51  ;;  %s1677_s29 = sshll.u32 (!%p171_p9), %s177_s28, 6 }
  0x20   : > { %s179_s30 = scalar_lea.vmem (!%p171_p9), [#allocation2], %s1677_s29  ;;  %s1977_s5 = smov (!%p171_p9), 110  }
  0x21   : > { %s1978_s6 = smov (!%p171_p9), 109   ;;  %s1979_s7 = smov (!%p171_p9), 126  }
  0x22   : > { %s1980_s8 = smov (!%p171_p9), 108   ;;  %s1981_s9 = smov (!%p171_p9), 92  }
  0x23   : > { %s1982_s10 = smov (!%p171_p9), 91   ;;  %s1983_s11 = smov (!%p171_p9), 90  }
  0x24   : > { %v2050_v8 = vld [vmem:[%s179_s30 + $0x30] sm:$0xff]  ;;  %v208_v9 = vld [vmem:[%s179_s30 + $0x38] sm:$0xff]  ;;  %v205_v10 = vld [vmem:[%s179_s30 + $0x20] sm:$0xff]  ;;  %vm249_vm0 = vcmask 130048   ;;  %vm394_vm1 = vcmask 900096   ;;  %vm236_vm2 = vcmask 1039360  }
  0x25   : > { %v1789_v11 = vpack.i.bf16 %v208_v9, %v2050_v8  ;;  %v2053_v12 = vld [vmem:[%s179_s30 + $0x28] sm:$0xff]  ;;  %330 = vmatpush.msra.mxu3 %v205_v10  ;;  %v2056_v14 = vld [vmem:[%s179_s30 + $0x10] sm:$0xff]  ;;  %v204_v15 = vld [vmem:[%s179_s30 + $0x18] sm:$0xff]  ;;  %vm491_vm3 = vcmask 891904   ;;  %vm602_vm4 = vcmask 1031168   ;;  %vm827_vm5 = vcmask 883712  }
  0x26   : > { %v1799_v13 = vpack.i.bf16 %v2053_v12, %v205_v10  ;;  %v201_v16 = vld [vmem:[%s179_s30] sm:$0xff]  ;;  %v2058_v17 = vld [vmem:[%s179_s30 + $0x8] sm:$0xff]  ;;  %v1794_v18 = vpack.i.bf16 %v204_v15, %v2056_v14  ;;  %v1824_v22 = vpack.i.bf16 %v2050_v8, %v2053_v12  ;;  %v1839_v24 = vpack.i.bf16 %v204_v15, %v208_v9  ;;  %v1685_v2 = vld [vmem:[%s2420_s1 + $0x10] sm:$0xff]  ;;  %s1754_s12 = smul.u32 (%p2035_p5), 24, %s1669_s15 }
  0x27   : > { %1790 = vrot.lane.b32.xlu0 %v1789_v11, %s1976_s4  ;;  %331 = vmatpush.msra.mxu3 %v201_v16  ;;  %v1804_v19 = vpack.i.bf16 %v2058_v17, %v201_v16  ;;  %v1814_v20 = vpack.i.bf16 %v201_v16, %v2050_v8  ;;  %v1819_v21 = vpack.i.bf16 %v2056_v14, %v2058_v17  ;;  %v2071_v27 = vld [vmem:[%s2420_s1] sm:$0xff]  ;;  %v1678_v49 = vld [vmem:[%s2420_s1 + $0x8] sm:$0xff]  ;;  %vm1067_vm6 = vcmask 752640  }
  0x28   : > { %1800 = vrot.lane.b32.xlu1 %v1799_v13, %s1976_s4  ;;  %1810 = vrot.lane.b32.xlu2 %v1799_v13, %s1977_s5  ;;  %v1829_v23 = vpack.i.bf16 %v2058_v17, %v208_v9  ;;  %v1844_v25 = vpack.i.bf16 %v201_v16, %v205_v10  ;;  %v1689_v16 = vld [vmem:[%s2420_s1 + $0x18] sm:$0xff]  ;;  %vm1164_vm7 = vcmask 744448   ;;  %vm1472_vm8 = vcmask 736256   ;;  %s1573_s20 = scalar_lea.vmem (%p2035_p5), %s2422_s3, %s1754_s12 }
  0x29   : > { %1682 = vmatmul.msk.f32.vlgmr.msra.gmra.mxu3 %vm249_vm0, %v2071_v27 }
  0x2f   : > { %1795 = vrot.lane.b32.xlu0 %v1794_v18, %s1976_s4 }
  0x30   : > { %1805 = vrot.lane.b32.xlu1 %v1804_v19, %s1976_s4  ;;  %1815 = vrot.lane.b32.xlu2 %v1814_v20, %s1977_s5 }
  0x37   : > { %1820 = vrot.lane.b32.xlu0 %v1819_v21, %s1977_s5 }
  0x38   : > { %1825 = vrot.lane.b32.xlu1 %v1824_v22, %s1978_s6  ;;  %1830 = vrot.lane.b32.xlu2 %v1829_v23, %s1978_s6 }
  0x3f   : > { %1835 = vrot.lane.b32.xlu0 %v1794_v18, %s1978_s6 }
  0x40   : > { %1840 = vrot.lane.b32.xlu1 %v1839_v24, %s1977_s5  ;;  %1845 = vrot.lane.b32.xlu2 %v1844_v25, %s1978_s6 }
  0x47   : > { %1850 = vrot.lane.b32.xlu0 %v1789_v11, %s1979_s7 }
  0x48   : > { %1855 = vrot.lane.b32.xlu1 %v1794_v18, %s1979_s7  ;;  %1860 = vrot.lane.b32.xlu2 %v1799_v13, %s1979_s7 }
  0x4f   : > { %1865 = vrot.lane.b32.xlu0 %v1804_v19, %s1979_s7 }
  0x50   : > { %1870 = vrot.lane.b32.xlu1 %v1824_v22, %s1980_s8  ;;  %1875 = vrot.lane.b32.xlu2 %v1829_v23, %s1980_s8 }
  0x57   : > { %1880 = vrot.lane.b32.xlu0 %v1794_v18, %s1980_s8 }
  0x58   : > { %1885 = vrot.lane.b32.xlu1 %v1844_v25, %s1980_s8  ;;  %1890 = vrot.lane.b32.xlu2 %v1799_v13, %s1981_s9  ;;  %s1755_s8 = smul.u32 96, %s177_s28 }
  0x5f   : > { %1895 = vrot.lane.b32.xlu0 %v1814_v20, %s1981_s9 }
  0x60   : > { %1900 = vrot.lane.b32.xlu1 %v1819_v21, %s1981_s9  ;;  %1905 = vrot.lane.b32.xlu2 %v1824_v22, %s1982_s10 }
  0x67   : > { %1910 = vrot.lane.b32.xlu0 %v1829_v23, %s1982_s10 }
  0x68   : > { %1915 = vrot.lane.b32.xlu1 %v1794_v18, %s1982_s10  ;;  %1920 = vrot.lane.b32.xlu2 %v1839_v24, %s1981_s9  ;;  %s2376_s9 = scalar_lea.vmem [#allocation3], %s1755_s8 }
  0x6f   : > { %1925 = vrot.lane.b32.xlu0 %v1844_v25, %s1982_s10 }
  0x70   : > { %1930 = vrot.lane.b32.xlu1 %v1824_v22, %s1983_s11  ;;  %1935 = vrot.lane.b32.xlu2 %v1829_v23, %s1983_s11 }
  0x77   : > { %1940 = vrot.lane.b32.xlu0 %v1794_v18, %s1983_s11 }
  0x78   : > { %1945 = vrot.lane.b32.xlu1 %v1844_v25, %s1983_s11 }
  0x82   : > { %v1811_v26 = vpop.permute.xlu2 %1810 }
  0x83   : > { %v1813_v28 = vunpack.i.h.bf16 %v1811_v26  ;;  %v1812_v43 = vunpack.i.l.bf16 %v1811_v26 }
  0x85   : > { %v2114_v54 = vsel %vm394_vm1, %v1812_v43, %v1813_v28 }
  0x8a   : > { %v2075_v29 = vpop.permute.xlu2 %1815 }
  0x8b   : > { %v1817_v30 = vunpack.i.l.bf16 %v2075_v29  ;;  %v1818_v58 = vunpack.i.h.bf16 %v2075_v29  ;;  %v570_v29 = vld [vmem:[%s2421_s2] sm:$0xff] }
  0x8d   : > { %v2081_v31 = vsel %vm394_vm1, %v1813_v28, %v1817_v30 }
  0x8e   : > { %444 = vmatpush.msrb.mxu3 %v2081_v31 }
  0x92   : > { %v2084_v38 = vpop.permute.xlu2 %1830 }
  0x93   : > { %v1832_v55 = vunpack.i.l.bf16 %v2084_v38  ;;  %v1833_v62 = vunpack.i.h.bf16 %v2084_v38  ;;  %v1694_v38 = vld [vmem:[%s2420_s1 + $0x28] sm:$0xff] }
  0x99   : > { %v1791_v32 = vpop.permute.xlu0 %1790 }
  0x9a   : > { %v1793_v33 = vunpack.i.h.bf16 %v1791_v32  ;;  %v1792_v34 = vunpack.i.l.bf16 %v1791_v32  ;;  %v1801_v35 = vpop.permute.xlu1 %1800  ;;  %v1846_v53 = vpop.permute.xlu2 %1845 }
  0x9b   : > { %v1803_v36 = vunpack.i.h.bf16 %v1801_v35  ;;  %v1802_v37 = vunpack.i.l.bf16 %v1801_v35  ;;  %v1847_v57 = vunpack.i.l.bf16 %v1846_v53  ;;  %v1848_v1 = vunpack.i.h.bf16 %v1846_v53  ;;  %v2219_v53 = vld [vmem:[%s2420_s1 + $0x30] sm:$0xff] }
  0x9c   : > { %v2087_v39 = vsel %vm236_vm2, %v1792_v34, %v1793_v33  ;;  %v1984_v33 = vmov 0  }
  0x9d   : > { %v2090_v40 = vsel %vm236_vm2, %v1803_v36, %v1792_v34  ;;  %307 = vmatpush.msra.mxu2 %v2087_v39  ;;  %v2094_v41 = vsel %vm236_vm2, %v1802_v37, %v1803_v36  ;;  %v2152_v9 = vsel %vm491_vm3, %v1848_v1, %v1833_v62  ;;  %1949 = vset.pattern.permute.xlu2 %v1984_v33  ;;  %v2199_v36 = vld [vmem:[%s2420_s1 + $0x20] sm:$0xff] }
  0x9e   : > { %287 = vmatpush.msra.mxu1 %v2090_v40  ;;  %267 = vmatpush.msra.mxu0 %v2094_v41 }
  0x9f   : > { %573 = vperm.xlu2 %1949, %v570_v29   ;;  %1950 = vset.pattern.permute.xlu0 %v1984_v33 }
  0xa0   : > { %909 = vperm.xlu0 %1950, %v570_v29   ;;  %1951 = vset.pattern.permute.xlu1 %v1984_v33 }
  0xa1   : > { %v1796_v42 = vpop.permute.xlu0 %1795  ;;  %1246 = vperm.xlu1 %1951, %v570_v29  }
  0xa2   : > { %v1798_v44 = vunpack.i.h.bf16 %v1796_v42  ;;  %v1797_v45 = vunpack.i.l.bf16 %v1796_v42  ;;  %v1806_v46 = vpop.permute.xlu1 %1805 }
  0xa3   : > { %v1808_v47 = vunpack.i.h.bf16 %v1806_v46  ;;  %v1807_v48 = vunpack.i.l.bf16 %v1806_v46 }
  0xa4   : > { %v2102_v50 = vsel %vm236_vm2, %v1797_v45, %v1798_v44 }
  0xa5   : > { %v2105_v51 = vsel %vm236_vm2, %v1808_v47, %v1797_v45  ;;  %308 = vmatpush.msra.mxu2 %v2102_v50  ;;  %v2109_v52 = vsel %vm236_vm2, %v1807_v48, %v1808_v47 }
  0xa6   : > { %288 = vmatpush.msra.mxu1 %v2105_v51  ;;  %1681 = vmatmul.msk.f32.vlgmr.msra.gmra.mxu2 %vm249_vm0, %v1678_v49 }
  0xa7   : > { %1680 = vmatmul.msk.f32.vlgmr.msra.gmra.mxu1 %vm249_vm0, %v1678_v49  ;;  %424 = vmatpush.msrb.mxu2 %v2114_v54 }
  0xa8   : > { %268 = vmatpush.msra.mxu0 %v2109_v52  ;;  %370 = vmatpush.msrb.mxu1 %v2050_v8  ;;  %v1861_v8 = vpop.permute.xlu2 %1860 }
  0xa9   : > { %1679 = vmatmul.msk.f32.vlgmr.msra.gmra.mxu0 %vm249_vm0, %v1678_v49  ;;  %v1821_v56 = vpop.permute.xlu0 %1820  ;;  %v1863_v21 = vunpack.i.h.bf16 %v1861_v8  ;;  %1554 = vperm.xlu2 %1949, %v570_v29  }
  0xaa   : > { %v1823_v59 = vunpack.i.h.bf16 %v1821_v56  ;;  %v1822_v60 = vunpack.i.l.bf16 %v1821_v56  ;;  %v1826_v61 = vpop.permute.xlu1 %1825  ;;  %350 = vmatpush.msrb.mxu0 %v2053_v12  ;;  %371 = vmatpush.msrb.mxu1 %v2056_v14 }
  0xab   : > { %v1828_v63 = vunpack.i.h.bf16 %v1826_v61  ;;  %v1827_v0 = vunpack.i.l.bf16 %v1826_v61 }
  0xac   : > { %v2130_v3 = vsel %vm394_vm1, %v1818_v58, %v1822_v60  ;;  %v2133_v4 = vsel %vm394_vm1, %v1822_v60, %v1823_v59  ;;  %351 = vmatpush.msrb.mxu0 %v2058_v17  ;;  %v1862_v17 = vunpack.i.l.bf16 %v1861_v8 }
  0xad   : > { %425 = vmatpush.msrb.mxu2 %v2130_v3  ;;  %445 = vmatpush.msrb.mxu3 %v2133_v4  ;;  %v2139_v5 = vsel %vm491_vm3, %v1847_v57, %v1827_v0  ;;  %v2142_v6 = vsel %vm491_vm3, %v1827_v0, %v1828_v63  ;;  %v2145_v7 = vsel %vm491_vm3, %v1828_v63, %v1832_v55 }
  0xae   : > { %1686 = vmatmul.msk.f32.vlgmr.msrb.gmra.mxu2 %vm249_vm0, %v1685_v2  ;;  %1687 = vmatmul.msk.f32.vlgmr.msrb.gmra.mxu3 %vm249_vm0, %v1685_v2  ;;  %v606_v24 = vsel %vm602_vm4, %v1862_v17, %v1863_v21 }
  0xaf   : > { %1684 = vmatmul.msk.f32.vlgmr.msrb.gmra.mxu1 %vm249_vm0, %v2071_v27  ;;  %541 = vmatpush.msra.mxu2 %v2142_v6 }
  0xb0   : > { %521 = vmatpush.msra.mxu1 %v2139_v5  ;;  %561 = vmatpush.msra.mxu3 %v2145_v7  ;;  %v2183_v23 = vpop.permute.xlu2 %1875 }
  0xb1   : > { %1683 = vmatmul.msk.f32.vlgmr.msrb.gmra.mxu0 %vm249_vm0, %v2071_v27  ;;  %v1836_v10 = vpop.permute.xlu0 %1835  ;;  %v1877_v48 = vunpack.i.l.bf16 %v2183_v23  ;;  %v1878_v56 = vunpack.i.h.bf16 %v2183_v23  ;;  %v1712_v23 = vld [vmem:[%s2420_s1 + $0x40] sm:$0xff] }
  0xb2   : > { %v1838_v11 = vunpack.i.h.bf16 %v1836_v10  ;;  %v1837_v12 = vunpack.i.l.bf16 %v1836_v10  ;;  %v1841_v13 = vpop.permute.xlu1 %1840  ;;  %522 = vmatpush.msra.mxu1 %v2152_v9 }
  0xb3   : > { %v1843_v14 = vunpack.i.h.bf16 %v1841_v13  ;;  %v1842_v15 = vunpack.i.l.bf16 %v1841_v13 }
  0xb4   : > { %v2164_v18 = vsel %vm491_vm3, %v1833_v62, %v1837_v12  ;;  %v2167_v19 = vsel %vm491_vm3, %v1837_v12, %v1838_v11 }
  0xb5   : > { %v2172_v20 = vsel %vm394_vm1, %v1817_v30, %v1842_v15  ;;  %542 = vmatpush.msra.mxu2 %v2164_v18  ;;  %562 = vmatpush.msra.mxu3 %v2167_v19  ;;  %v2181_v22 = vsel %vm394_vm1, %v1823_v59, %v1843_v14 }
  0xb6   : > { %464 = vmatpush.msra.mxu0 %v2172_v20  ;;  %1691 = vmatmul.msk.f32.vlgmr.msra.gmra.mxu2 %vm249_vm0, %v1689_v16 }
  0xb7   : > { %1690 = vmatmul.msk.f32.vlgmr.msra.gmra.mxu1 %vm249_vm0, %v1689_v16  ;;  %1692 = vmatmul.msk.f32.vlgmr.msra.gmra.mxu3 %vm249_vm0, %v1689_v16 }
  0xb8   : > { %695 = vmatpush.msrb.mxu3 %v2094_v41  ;;  %465 = vmatpush.msra.mxu0 %v2181_v22  ;;  %v2209_v42 = vpop.permute.xlu2 %1890 }
  0xb9   : > { %1688 = vmatmul.msk.f32.vlgmr.msra.gmra.mxu0 %vm249_vm0, %v1685_v2  ;;  %v1851_v25 = vpop.permute.xlu0 %1850  ;;  %v1893_v63 = vunpack.i.h.bf16 %v2209_v42  ;;  %v1892_v0 = vunpack.i.l.bf16 %v2209_v42  ;;  %v1705_v2 = vld [vmem:[%s2420_s1 + $0x38] sm:$0xff] }
  0xba   : > { %696 = vmatpush.msrb.mxu3 %v2109_v52  ;;  %v1853_v26 = vunpack.i.h.bf16 %v1851_v25  ;;  %v1852_v27 = vunpack.i.l.bf16 %v1851_v25  ;;  %v1856_v28 = vpop.permute.xlu1 %1855  ;;  %632 = vmatpush.msrb.mxu0 %v606_v24 }
  0xbb   : > { %v1858_v30 = vunpack.i.h.bf16 %v1856_v28  ;;  %v1857_v32 = vunpack.i.l.bf16 %v1856_v28  ;;  %v1071_v11 = vsel %vm1067_vm6, %v1892_v0, %v1893_v63  ;;  %v333_v0 = vpop.f32.mrf.mxu3 }
  0xbc   : > { %780 = vmatpush.msra.mxu3 %v2142_v6  ;;  %v607_v34 = vsel %vm602_vm4, %v1863_v21, %v1852_v27  ;;  %v608_v35 = vsel %vm602_vm4, %v1852_v27, %v1853_v26  ;;  %v1713_v26 = vld [vmem:[%s2420_s1 + $0x48] sm:$0xff] }
  0xbd   : > { %652 = vmatpush.msrb.mxu1 %v607_v34  ;;  %v605_v37 = vsel %vm602_vm4, %v1857_v32, %v1858_v30  ;;  %672 = vmatpush.msrb.mxu2 %v608_v35 }
  0xbe   : > { %781 = vmatpush.msra.mxu3 %v2164_v18 }
  0xbf   : > { %1698 = vmatmul.msk.f32.vlgmr.msrb.gmra.mxu3 %vm249_vm0, %v2199_v36  ;;  %673 = vmatpush.msrb.mxu2 %v605_v37 }
  0xc0   : > { %1697 = vmatmul.msk.f32.vlgmr.msrb.gmra.mxu2 %vm249_vm0, %v1694_v38  ;;  %v2241_v62 = vpop.permute.xlu2 %1905 }
  0xc1   : > { %v1866_v41 = vpop.permute.xlu0 %1865  ;;  %760 = vmatpush.msra.mxu2 %v2139_v5  ;;  %v1907_v17 = vunpack.i.l.bf16 %v2241_v62 }
  0xc2   : > { %v1868_v43 = vunpack.i.h.bf16 %v1866_v41  ;;  %v1867_v44 = vunpack.i.l.bf16 %v1866_v41  ;;  %v1871_v45 = vpop.permute.xlu1 %1870 }
  0xc3   : > { %v1873_v46 = vunpack.i.h.bf16 %v1871_v45  ;;  %v1872_v47 = vunpack.i.l.bf16 %v1871_v45  ;;  %761 = vmatpush.msra.mxu2 %v2152_v9 }
  0xc4   : > { %v603_v49 = vsel %vm602_vm4, %v1867_v44, %v1868_v43  ;;  %v604_v52 = vsel %vm602_vm4, %v1868_v43, %v1857_v32 }
  0xc5   : > { %633 = vmatpush.msrb.mxu0 %v603_v49  ;;  %653 = vmatpush.msrb.mxu1 %v604_v52  ;;  %v2222_v55 = vsel %vm827_vm5, %v1872_v47, %v1873_v46  ;;  %v2233_v57 = vsel %vm827_vm5, %v1873_v46, %v1877_v48  ;;  %v1724_v46 = vld [vmem:[%s2420_s1 + $0x58] sm:$0xff] }
  0xc6   : > { %1695 = vmatmul.msk.f32.vlgmr.msrb.gmra.mxu0 %vm249_vm0, %v1694_v38  ;;  %1696 = vmatmul.msk.f32.vlgmr.msrb.gmra.mxu1 %vm249_vm0, %v1694_v38 }
  0xc7   : > { %715 = vmatpush.msra.mxu0 %v2090_v40  ;;  %735 = vmatpush.msra.mxu1 %v2087_v39 }
  0xc8   : > { %1703 = vmatmul.msk.f32.vlgmr.msra.gmra.mxu3 %vm249_vm0, %v2219_v53  ;;  %877 = vmatpush.msrb.mxu2 %v2222_v55  ;;  %v1921_v24 = vpop.permute.xlu2 %1920 }
  0xc9   : > { %716 = vmatpush.msra.mxu0 %v2105_v51  ;;  %736 = vmatpush.msra.mxu1 %v2102_v50  ;;  %v1881_v58 = vpop.permute.xlu0 %1880  ;;  %v1922_v27 = vunpack.i.l.bf16 %v1921_v24  ;;  %v1923_v30 = vunpack.i.h.bf16 %v1921_v24 }
  0xca   : > { %1702 = vmatmul.msk.f32.vlgmr.msra.gmra.mxu2 %vm249_vm0, %v2219_v53  ;;  %v1883_v40 = vunpack.i.h.bf16 %v1881_v58  ;;  %v1882_v39 = vunpack.i.l.bf16 %v1881_v58  ;;  %v1886_v59 = vpop.permute.xlu1 %1885  ;;  %897 = vmatpush.msrb.mxu3 %v2233_v57 }
  0xcb   : > { %800 = vmatpush.msrb.mxu0 %v2145_v7  ;;  %v1888_v60 = vunpack.i.h.bf16 %v1886_v59  ;;  %v1887_v61 = vunpack.i.l.bf16 %v1886_v59 }
  0xcc   : > { %v2245_v51 = vsel %vm827_vm5, %v1878_v56, %v1882_v39  ;;  %v2248_v50 = vsel %vm827_vm5, %v1882_v39, %v1883_v40  ;;  %v1732_v39 = vld [vmem:[%s2420_s1 + $0x68] sm:$0xff] }
  0xcd   : > { %801 = vmatpush.msrb.mxu0 %v2167_v19  ;;  %v2253_v1 = vsel %vm827_vm5, %v1887_v61, %v1872_v47  ;;  %878 = vmatpush.msrb.mxu2 %v2245_v51  ;;  %v2264_v8 = vsel %vm827_vm5, %v1888_v60, %v1878_v56  ;;  %v1731_v56 = vld [vmem:[%s2420_s1 + $0x60] sm:$0xff] }
  0xce   : > { %898 = vmatpush.msrb.mxu3 %v2248_v50  ;;  %857 = vmatpush.msrb.mxu1 %v2253_v1 }
  0xcf   : > { %1699 = vmatmul.msk.f32.vlgmr.msra.gmra.mxu0 %vm249_vm0, %v2199_v36  ;;  %1700 = vmatmul.msk.f32.vlgmr.msra.gmra.mxu1 %vm249_vm0, %v2199_v36 }
  0xd0   : > { %940 = vmatpush.msra.mxu0 %v2139_v5  ;;  %1708 = vmatmul.msk.f32.vlgmr.msrb.gmra.mxu3 %vm249_vm0, %v1705_v2  ;;  %v1936_v47 = vpop.permute.xlu2 %1935 }
  0xd1   : > { %980 = vmatpush.msra.mxu2 %v2145_v7  ;;  %1003 = vmatpush.msra.mxu3 %v2114_v54  ;;  %v1896_v10 = vpop.permute.xlu0 %1895  ;;  %v1908_v54 = vunpack.i.h.bf16 %v2241_v62  ;;  %v1937_v48 = vunpack.i.l.bf16 %v1936_v47 }
  0xd2   : > { %858 = vmatpush.msrb.mxu1 %v2264_v8  ;;  %1707 = vmatmul.msk.f32.vlgmr.msrb.gmra.mxu2 %vm249_vm0, %v1705_v2  ;;  %v1898_v12 = vunpack.i.h.bf16 %v1896_v10  ;;  %v1897_v13 = vunpack.i.l.bf16 %v1896_v10  ;;  %v1901_v14 = vpop.permute.xlu1 %1900 }
  0xd3   : > { %941 = vmatpush.msra.mxu0 %v2152_v9  ;;  %981 = vmatpush.msra.mxu2 %v2167_v19  ;;  %v1903_v15 = vunpack.i.h.bf16 %v1901_v14  ;;  %v1902_v16 = vunpack.i.l.bf16 %v1901_v14  ;;  %v1169_v28 = vsel %vm1164_vm7, %v1907_v17, %v1908_v54 }
  0xd4   : > { %960 = vmatpush.msra.mxu1 %v2142_v6  ;;  %1004 = vmatpush.msra.mxu3 %v2130_v3  ;;  %v1072_v21 = vsel %vm1067_vm6, %v1893_v63, %v1897_v13  ;;  %v1073_v36 = vsel %vm1067_vm6, %v1897_v13, %v1922_v27 }
  0xd5   : > { %1097 = vmatpush.msrb.mxu2 %v1071_v11  ;;  %v1068_v25 = vsel %vm1067_vm6, %v1898_v12, %v1902_v16  ;;  %v1069_v3 = vsel %vm1067_vm6, %v1902_v16, %v1903_v15  ;;  %v1070_v38 = vsel %vm1067_vm6, %v1903_v15, %v1923_v30 }
  0xd6   : > { %961 = vmatpush.msra.mxu1 %v2164_v18  ;;  %1117 = vmatpush.msrb.mxu3 %v1072_v21 }
  0xd7   : > { %1704 = vmatmul.msk.f32.vlgmr.msrb.gmra.mxu0 %vm249_vm0, %v2219_v53  ;;  %1098 = vmatpush.msrb.mxu2 %v1068_v25 }
  0xd8   : > { %1706 = vmatmul.msk.f32.vlgmr.msrb.gmra.mxu1 %vm249_vm0, %v1705_v2  ;;  %1023 = vmatpush.msrb.mxu0 %v2081_v31 }
  0xd9   : > { %1717 = vmatmul.msk.f32.vlgmr.msra.gmra.mxu3 %vm249_vm0, %v1712_v23  ;;  %1043 = vmatpush.msrb.mxu1 %v2172_v20  ;;  %v1911_v29 = vpop.permute.xlu0 %1910 }
  0xda   : > { %1024 = vmatpush.msrb.mxu0 %v2133_v4  ;;  %1118 = vmatpush.msrb.mxu3 %v1069_v3  ;;  %v1913_v31 = vunpack.i.h.bf16 %v1911_v29  ;;  %v1912_v32 = vunpack.i.l.bf16 %v1911_v29  ;;  %v1916_v33 = vpop.permute.xlu1 %1915  ;;  %v1720_v4 = vld [vmem:[%s2420_s1 + $0x50] sm:$0xff] }
  0xdb   : > { %1716 = vmatmul.msk.f32.vlgmr.msra.gmra.mxu2 %vm249_vm0, %v1713_v26  ;;  %1044 = vmatpush.msrb.mxu1 %v2181_v22  ;;  %v1918_v34 = vunpack.i.h.bf16 %v1916_v33  ;;  %v1917_v35 = vunpack.i.l.bf16 %v1916_v33 }
  0xdc   : > { %1214 = vmatpush.msra.mxu2 %v1169_v28  ;;  %v2302_v20 = vsel %vm1164_vm7, %v1908_v54, %v1912_v32 }
  0xdd   : > { %1234 = vmatpush.msra.mxu3 %v2302_v20  ;;  %v1166_v37 = vsel %vm1164_vm7, %v1913_v31, %v1917_v35  ;;  %v2312_v22 = vsel %vm1164_vm7, %v1917_v35, %v1918_v34 }
  0xde   : > { %1215 = vmatpush.msra.mxu2 %v1166_v37 }
  0xdf   : > { %1714 = vmatmul.msk.f32.vlgmr.msra.gmra.mxu0 %vm249_vm0, %v1713_v26  ;;  %1235 = vmatpush.msra.mxu3 %v2312_v22 }
  0xe0   : > { %1715 = vmatmul.msk.f32.vlgmr.msra.gmra.mxu1 %vm249_vm0, %v1713_v26  ;;  %1137 = vmatpush.msra.mxu0 %v1073_v36 }
  0xe1   : > { %1722 = vmatmul.msk.f32.vlgmr.msrb.gmra.mxu3 %vm249_vm0, %v1720_v4  ;;  %v1926_v41 = vpop.permute.xlu0 %1925 }
  0xe2   : > { %1138 = vmatpush.msra.mxu0 %v1070_v38  ;;  %1340 = vmatpush.msrb.mxu3 %v2139_v5  ;;  %v1927_v42 = vunpack.i.l.bf16 %v1926_v41  ;;  %v1928_v43 = vunpack.i.h.bf16 %v1926_v41  ;;  %v1931_v45 = vpop.permute.xlu1 %1930 }
  0xe3   : > { %1721 = vmatmul.msk.f32.vlgmr.msrb.gmra.mxu2 %vm249_vm0, %v1720_v4  ;;  %v1932_v52 = vunpack.i.l.bf16 %v1931_v45 }
  0xe4   : > { %1317 = vmatpush.msrb.mxu2 %v2233_v57  ;;  %1341 = vmatpush.msrb.mxu3 %v2152_v9  ;;  %v1168_v44 = vsel %vm1164_vm7, %v1927_v42, %v1907_v17  ;;  %v1165_v5 = vsel %vm1164_vm7, %v1928_v43, %v1913_v31  ;;  %v1933_v9 = vunpack.i.h.bf16 %v1931_v45  ;;  %v1938_v57 = vunpack.i.h.bf16 %v1936_v47 }
  0xe5   : > { %1194 = vmatpush.msra.mxu1 %v1168_v44 }
  0xe6   : > { %1318 = vmatpush.msrb.mxu2 %v2248_v50  ;;  %v1478_v40 = vsel %vm1472_vm8, %v1933_v9, %v1937_v48  ;;  %v1477_v59 = vsel %vm1472_vm8, %v1932_v52, %v1933_v9 }
  0xe7   : > { %1718 = vmatmul.msk.f32.vlgmr.msrb.gmra.mxu0 %vm249_vm0, %v1712_v23  ;;  %1195 = vmatpush.msra.mxu1 %v1165_v5 }
  0xe8   : > { %1719 = vmatmul.msk.f32.vlgmr.msrb.gmra.mxu1 %vm249_vm0, %v1712_v23  ;;  %1277 = vmatpush.msrb.mxu0 %v2253_v1 }
  0xe9   : > { %1727 = vmatmul.msk.f32.vlgmr.msra.gmra.mxu3 %vm249_vm0, %v1724_v46  ;;  %1297 = vmatpush.msrb.mxu1 %v2222_v55  ;;  %v1941_v49 = vpop.permute.xlu0 %1940 }
  0xea   : > { %1425 = vmatpush.msra.mxu3 %v1169_v28  ;;  %1278 = vmatpush.msrb.mxu0 %v2264_v8  ;;  %v1943_v53 = vunpack.i.h.bf16 %v1941_v49  ;;  %v1946_v58 = vpop.permute.xlu1 %1945  ;;  %v1942_v55 = vunpack.i.l.bf16 %v1941_v49 }
  0xeb   : > { %1726 = vmatmul.msk.f32.vlgmr.msra.gmra.mxu2 %vm249_vm0, %v1724_v46  ;;  %1298 = vmatpush.msrb.mxu1 %v2245_v51  ;;  %v1947_v61 = vunpack.i.l.bf16 %v1946_v58  ;;  %v1948_v62 = vunpack.i.h.bf16 %v1946_v58  ;;  %v1743_v51 = vld [vmem:[%s2420_s1 + $0x78] sm:$0xff] }
  0xec   : > { %1405 = vmatpush.msra.mxu2 %v1168_v44  ;;  %1426 = vmatpush.msra.mxu3 %v1166_v37  ;;  %v1475_v60 = vsel %vm1472_vm8, %v1942_v55, %v1943_v53 }
  0xee   : > { %1406 = vmatpush.msra.mxu2 %v1165_v5 }
  0xef   : > { %1723 = vmatmul.msk.f32.vlgmr.msra.gmra.mxu0 %vm249_vm0, %v1720_v4 }
  0xf0   : > { %1725 = vmatmul.msk.f32.vlgmr.msra.gmra.mxu1 %vm249_vm0, %v1724_v46  ;;  %1360 = vmatpush.msra.mxu0 %v2142_v6  ;;  %v1474_v6 = vsel %vm1472_vm8, %v1938_v57, %v1942_v55 }
  0xf1   : > { %1380 = vmatpush.msra.mxu1 %v2145_v7  ;;  %1736 = vmatmul.msk.f32.vlgmr.msrb.gmra.mxu3 %vm249_vm0, %v1731_v56  ;;  %v1476_v7 = vsel %vm1472_vm8, %v1947_v61, %v1932_v52 }
  0xf2   : > { %1361 = vmatpush.msra.mxu0 %v2164_v18  ;;  %1542 = vmatpush.msrb.mxu3 %v1478_v40  ;;  %v1739_v18 = vld [vmem:[%s2420_s1 + $0x70] sm:$0xff] }
  0xf3   : > { %1735 = vmatmul.msk.f32.vlgmr.msrb.gmra.mxu2 %vm249_vm0, %v1732_v39  ;;  %1381 = vmatpush.msra.mxu1 %v2167_v19  ;;  %v1473_v19 = vsel %vm1472_vm8, %v1948_v62, %v1938_v57 }
  0xf4   : > { %1522 = vmatpush.msrb.mxu2 %v1477_v59  ;;  %1543 = vmatpush.msrb.mxu3 %v1475_v60 }
  0xf6   : > { %1523 = vmatpush.msrb.mxu2 %v1474_v6 }
  0xf7   : > { %1733 = vmatmul.msk.f32.vlgmr.msrb.gmra.mxu0 %vm249_vm0, %v1732_v39 }
  0xf8   : > { %1734 = vmatmul.msk.f32.vlgmr.msrb.gmra.mxu1 %vm249_vm0, %v1732_v39  ;;  %1445 = vmatpush.msrb.mxu0 %v2302_v20 }
  0xf9   : > { %1741 = vmatmul.msk.f32.vlgmr.msra.gmra.mxu3 %vm249_vm0, %v1739_v18  ;;  %1502 = vmatpush.msrb.mxu1 %v1476_v7  ;;  %v574_v15 = vpop.permute.xlu2 %573 }
  0xfa   : > { %1446 = vmatpush.msrb.mxu0 %v2312_v22 }
  0xfb   : > { %1740 = vmatmul.msk.f32.vlgmr.msra.gmra.mxu2 %vm249_vm0, %v1739_v18  ;;  %1503 = vmatpush.msrb.mxu1 %v1473_v19 }
  0xff   : > { %1737 = vmatmul.msk.f32.vlgmr.msra.gmra.mxu0 %vm249_vm0, %v1731_v56 }
 0x100   : > { %1738 = vmatmul.msk.f32.vlgmr.msra.gmra.mxu1 %vm249_vm0, %v1731_v56 }
 0x101   : > { %1746 = vmatmul.msk.f32.vlgmr.msrb.gmra.mxu3 %vm249_vm0, %v1743_v51 }
 0x103   : > { %1745 = vmatmul.msk.f32.vlgmr.msrb.gmra.mxu2 %vm249_vm0, %v1743_v51 }
 0x107   : > { %1742 = vmatmul.msk.f32.vlgmr.msrb.gmra.mxu0 %vm249_vm0, %v1739_v18 }
 0x108   : > { %1744 = vmatmul.msk.f32.vlgmr.msrb.gmra.mxu1 %vm249_vm0, %v1743_v51 }
 0x112   : > { %v910_v5 = vpop.permute.xlu0 %909 }
 0x124   : > { %v290_v50 = vpop.f32.mrf.mxu1 }
 0x126   : > { %v270_v63 = vpop.f32.mrf.mxu0 }
 0x127   : > { %v334_v10 = vadd.f32 %v333_v0, %v270_v63 }
 0x129   : > { %v310_v1 = vpop.f32.mrf.mxu2 }
 0x12c   : > { %v373_v2 = vpop.f32.mrf.mxu1 }
 0x12d   : > { %v374_v21 = vadd.f32 %v373_v2, %v310_v1  ;;  %v1247_v1 = vpop.permute.xlu1 %1246 }
 0x12e   : > { %v353_v8 = vpop.f32.mrf.mxu0 }
 0x12f   : > { %v354_v54 = vadd.f32 %v353_v8, %v290_v50 }
 0x131   : > { %v427_v11 = vpop.f32.mrf.mxu2  ;;  %v447_v12 = vpop.f32.mrf.mxu3 }
 0x132   : > { %v470_v13 = vadd.f32 %v427_v11, %v334_v10  ;;  %v471_v24 = vadd.f32 %v447_v12, %v354_v54 }
 0x134   : > { %v524_v14 = vpop.f32.mrf.mxu1 }
 0x135   : > { %v567_v16 = vadd.f32 %v524_v14, %v470_v13 }
 0x136   : > { %v467_v17 = vpop.f32.mrf.mxu0 }
 0x137   : > { %v576_v23 = vadd.f32 %v574_v15, %v567_v16  ;;  %v472_v25 = vadd.f32 %v467_v17, %v374_v21 }
 0x139   : > { %579 = vst [vmem:[%s2376_s9] sm:$0xff] %v576_v23  ;;  %v544_v3 = vpop.f32.mrf.mxu2 }
 0x13a   : > { %v568_v26 = vadd.f32 %v544_v3, %v471_v24  ;;  %v564_v27 = vpop.f32.mrf.mxu3 }
 0x13b   : > { %v569_v28 = vadd.f32 %v564_v27, %v472_v25 }
 0x13c   : > { %v577_v29 = vadd.f32 %v574_v15, %v568_v26 }
 0x13d   : > { %v578_v30 = vadd.f32 %v574_v15, %v569_v28 }
 0x13e   : > { %580 = vst [vmem:[%s2376_s9 + $0x8] sm:$0xff] %v577_v29 }
 0x13f   : > { %581 = vst [vmem:[%s2376_s9 + $0x10] sm:$0xff] %v578_v30 }
 0x142   : > { %v698_v31 = vpop.f32.mrf.mxu3 }
 0x143   : > { %v635_v32 = vpop.f32.mrf.mxu0  ;;  %v655_v33 = vpop.f32.mrf.mxu1 }
 0x144   : > { %v675_v34 = vpop.f32.mrf.mxu2  ;;  %v699_v22 = vadd.f32 %v698_v31, %v635_v32 }
 0x14b   : > { %v783_v20 = vpop.f32.mrf.mxu3 }
 0x14c   : > { %v718_v35 = vpop.f32.mrf.mxu0  ;;  %v738_v36 = vpop.f32.mrf.mxu1 }
 0x14d   : > { %v763_v4 = vpop.f32.mrf.mxu2  ;;  %v719_v37 = vadd.f32 %v718_v35, %v655_v33  ;;  %v739_v38 = vadd.f32 %v738_v36, %v675_v34 }
 0x14e   : > { %v806_v41 = vadd.f32 %v763_v4, %v699_v22 }
 0x14f   : > { %v807_v44 = vadd.f32 %v783_v20, %v719_v37  ;;  %v1555_v20 = vpop.permute.xlu2 %1554 }
 0x153   : > { %v900_v43 = vpop.f32.mrf.mxu3 }
 0x154   : > { %v803_v42 = vpop.f32.mrf.mxu0 }
 0x155   : > { %v808_v45 = vadd.f32 %v803_v42, %v739_v38  ;;  %v860_v46 = vpop.f32.mrf.mxu1  ;;  %v880_v9 = vpop.f32.mrf.mxu2  ;;  %v1588_v42 = vld [vmem:[%s2376_s9 + $0x8] sm:$0xff] (%p2035_p5) }
 0x156   : > { %v903_v47 = vadd.f32 %v860_v46, %v806_v41  ;;  %v904_v48 = vadd.f32 %v880_v9, %v807_v44  ;;  %v1586_v41 = vld [vmem:[%s2376_s9] sm:$0xff] (%p2035_p5)  ;;  %1589 = vst [vmem:[%s1573_s20 + $0x8] sm:$0xff] (%p2035_p5), %v1588_v42 }
 0x157   : > { %v905_v49 = vadd.f32 %v900_v43, %v808_v45  ;;  %v1590_v43 = vld [vmem:[%s2376_s9 + $0x10] sm:$0xff] (%p2035_p5)  ;;  %1587 = vst [vmem:[%s1573_s20] sm:$0xff] (%p2035_p5), %v1586_v41 }
 0x158   : > { %v912_v52 = vadd.f32 %v910_v5, %v903_v47  ;;  %v913_v53 = vadd.f32 %v910_v5, %v904_v48  ;;  %1591 = vst [vmem:[%s1573_s20 + $0x10] sm:$0xff] (%p2035_p5), %v1590_v43 }
 0x159   : > { %v914_v56 = vadd.f32 %v910_v5, %v905_v49 }
 0x15a   : > { %1709 = vst [vmem:[%s2376_s9 + $0x18] sm:$0xff] %v912_v52 }
 0x15b   : > { %1710 = vst [vmem:[%s2376_s9 + $0x20] sm:$0xff] %v913_v53 }
 0x15c   : > { %1711 = vst [vmem:[%s2376_s9 + $0x28] sm:$0xff] %v914_v56  ;;  %v943_v57 = vpop.f32.mrf.mxu0  ;;  %v1006_v58 = vpop.f32.mrf.mxu3 }
 0x15d   : > { %v963_v55 = vpop.f32.mrf.mxu1  ;;  %v1007_v62 = vadd.f32 %v1006_v58, %v943_v57 }
 0x15e   : > { %v983_v40 = vpop.f32.mrf.mxu2 }
 0x161   : > { %v1592_v44 = vld [vmem:[%s2376_s9 + $0x18] sm:$0xff] (%p2035_p5) }
 0x162   : > { %v1594_v45 = vld [vmem:[%s2376_s9 + $0x20] sm:$0xff] (%p2035_p5)  ;;  %1593 = vst [vmem:[%s1573_s20 + $0x30] sm:$0xff] (%p2035_p5), %v1592_v44 }
 0x163   : > { %v1596_v46 = vld [vmem:[%s2376_s9 + $0x28] sm:$0xff] (%p2035_p5)  ;;  %1595 = vst [vmem:[%s1573_s20 + $0x38] sm:$0xff] (%p2035_p5), %v1594_v45 }
 0x164   : > { %v1026_v39 = vpop.f32.mrf.mxu0  ;;  %v1120_v59 = vpop.f32.mrf.mxu3  ;;  %1597 = vst [vmem:[%s1573_s20 + $0x40] sm:$0xff] (%p2035_p5), %v1596_v46 }
 0x165   : > { %v1046_v60 = vpop.f32.mrf.mxu1  ;;  %v1027_v6 = vadd.f32 %v1026_v39, %v963_v55 }
 0x166   : > { %v1100_v61 = vpop.f32.mrf.mxu2  ;;  %v1047_v7 = vadd.f32 %v1046_v60, %v983_v40 }
 0x167   : > { %v1143_v18 = vadd.f32 %v1100_v61, %v1007_v62  ;;  %v1144_v50 = vadd.f32 %v1120_v59, %v1027_v6 }
 0x16c   : > { %v1140_v19 = vpop.f32.mrf.mxu0  ;;  %v1237_v51 = vpop.f32.mrf.mxu3 }
 0x16d   : > { %v1145_v63 = vadd.f32 %v1140_v19, %v1047_v7  ;;  %v1197_v0 = vpop.f32.mrf.mxu1 }
 0x16e   : > { %v1240_v2 = vadd.f32 %v1197_v0, %v1143_v18  ;;  %v1217_v8 = vpop.f32.mrf.mxu2 }
 0x16f   : > { %v1241_v10 = vadd.f32 %v1217_v8, %v1144_v50  ;;  %v1242_v11 = vadd.f32 %v1237_v51, %v1145_v63 }
 0x170   : > { %v1249_v12 = vadd.f32 %v1247_v1, %v1240_v2 }
 0x171   : > { %v1250_v13 = vadd.f32 %v1247_v1, %v1241_v10  ;;  %v1251_v14 = vadd.f32 %v1247_v1, %v1242_v11 }
 0x172   : > { %1728 = vst [vmem:[%s2376_s9 + $0x30] sm:$0xff] %v1249_v12 }
 0x173   : > { %1729 = vst [vmem:[%s2376_s9 + $0x38] sm:$0xff] %v1250_v13 }
 0x174   : > { %1730 = vst [vmem:[%s2376_s9 + $0x40] sm:$0xff] %v1251_v14  ;;  %v1280_v15 = vpop.f32.mrf.mxu0  ;;  %v1343_v16 = vpop.f32.mrf.mxu3 }
 0x175   : > { %v1300_v54 = vpop.f32.mrf.mxu1  ;;  %v1344_v26 = vadd.f32 %v1343_v16, %v1280_v15 }
 0x176   : > { %v1320_v17 = vpop.f32.mrf.mxu2 }
 0x179   : > { %v1598_v5 = vld [vmem:[%s2376_s9 + $0x30] sm:$0xff] (%p2035_p5) }
 0x17a   : > { %v1600_v47 = vld [vmem:[%s2376_s9 + $0x38] sm:$0xff] (%p2035_p5)  ;;  %1599 = vst [vmem:[%s1573_s20 + $0x60] sm:$0xff] (%p2035_p5), %v1598_v5 }
 0x17b   : > { %v1602_v9 = vld [vmem:[%s2376_s9 + $0x40] sm:$0xff] (%p2035_p5)  ;;  %1601 = vst [vmem:[%s1573_s20 + $0x68] sm:$0xff] (%p2035_p5), %v1600_v47 }
 0x17c   : > { %v1363_v21 = vpop.f32.mrf.mxu0  ;;  %v1428_v23 = vpop.f32.mrf.mxu3  ;;  %1603 = vst [vmem:[%s1573_s20 + $0x70] sm:$0xff] (%p2035_p5), %v1602_v9 }
 0x17d   : > { %v1383_v24 = vpop.f32.mrf.mxu1  ;;  %v1364_v3 = vadd.f32 %v1363_v21, %v1300_v54 }
 0x17e   : > { %v1408_v25 = vpop.f32.mrf.mxu2  ;;  %v1384_v27 = vadd.f32 %v1383_v24, %v1320_v17 }
 0x17f   : > { %v1451_v28 = vadd.f32 %v1408_v25, %v1344_v26  ;;  %v1452_v31 = vadd.f32 %v1428_v23, %v1364_v3 }
 0x184   : > { %v1448_v29 = vpop.f32.mrf.mxu0  ;;  %v1545_v30 = vpop.f32.mrf.mxu3 }
 0x185   : > { %v1453_v32 = vadd.f32 %v1448_v29, %v1384_v27  ;;  %v1505_v33 = vpop.f32.mrf.mxu1 }
 0x186   : > { %v1548_v34 = vadd.f32 %v1505_v33, %v1451_v28  ;;  %v1525_v35 = vpop.f32.mrf.mxu2 }
 0x187   : > { %v1549_v36 = vadd.f32 %v1525_v35, %v1452_v31  ;;  %v1550_v4 = vadd.f32 %v1545_v30, %v1453_v32 }
 0x188   : > { %v1557_v37 = vadd.f32 %v1555_v20, %v1548_v34  ;;  %1570 = sbr.rel (!%p2035_p5) target bundleno = 405 (0x195), region = 59 }
 0x189   : > { %v1558_v22 = vadd.f32 %v1555_v20, %v1549_v36  ;;  %v1559_v38 = vadd.f32 %v1555_v20, %v1550_v4 }
 0x18a   : > { %1747 = vst [vmem:[%s2376_s9 + $0x48] sm:$0xff] %v1557_v37 }
 0x18b   : > { %1748 = vst [vmem:[%s2376_s9 + $0x50] sm:$0xff] %v1558_v22 }
 0x18c   : > { %1749 = vst [vmem:[%s2376_s9 + $0x58] sm:$0xff] %v1559_v38 }
 0x191   : > { %v1604_v48 = vld [vmem:[%s2376_s9 + $0x48] sm:$0xff] }
 0x192   : > { %v1606_v49 = vld [vmem:[%s2376_s9 + $0x50] sm:$0xff]  ;;  %1605 = vst [vmem:[%s1573_s20 + $0x90] sm:$0xff] %v1604_v48 }
 0x193   : > { %v1608_v52 = vld [vmem:[%s2376_s9 + $0x58] sm:$0xff]  ;;  %1607 = vst [vmem:[%s1573_s20 + $0x98] sm:$0xff] %v1606_v49 }
 0x194   : > { %1609 = vst [vmem:[%s1573_s20 + $0xa0] sm:$0xff] %v1608_v52 }
 0x195 PF: > { %p10_p10 = scmp.ge.s32.totalorder %s2022_s16, 4   ;;  %s2424_s12 = smov %s1970_s13 }
 0x196   : > { %s2425_s13 = smov %s2033_s19  ;;  %s2426_s14 = smov %s2022_s16 }
 0x197   :  { %12 = sbr.rel (!%p10_p10) target bundleno = 2 (0x2), region = 131 }

</bundles_post_ra>
